<compile_context>
chip_gen: v7x
topology: tpu7x:2x2x1
jax: 0.10.0
libtpu: 0.0.40
codegen_flags: <defaults>
</compile_context>

<pallas_src>
import functools

import jax
import jax.numpy as jnp
from jax.experimental import pallas as pl
from jax.experimental.pallas import tpu as pltpu

LRELU_SLOPE = 0.2
BN_EPS = 1e-5


def _round_up(a, b):
    return -(-a // b) * b


def _pick_tm(m):
    for tm in (512, 256, 128):
        if m >= 2 * tm:
            return tm
    return 128


# ---------------------------------------------------------------------------
# Fused conv kernel.  For one tile of TM flattened output positions it:
#   1) loads a band of the resident flattened activation,
#   2) applies the fused input transform (prev layer's BN affine + LeakyReLU),
#   3) accumulates ke*ke offset matmuls (the conv taps) on the MXU,
#   4) applies the per-channel output affine (conv bias),
#   5) optionally emits masked per-channel sum / sum-of-squares (BN stats).
# ---------------------------------------------------------------------------
def _fused_conv_kernel(*refs, offs, in_affine, in_act, with_stats,
                       cout_is_one):
    if with_stats:
        (x_ref, w_ref, si_ref, hi_ref, so_ref, ho_ref, mask_ref,
         y_ref, ssum_ref, ssq_ref, band_ref, acc_ref) = refs
    else:
        (x_ref, w_ref, si_ref, hi_ref, so_ref, ho_ref,
         y_ref, band_ref, acc_ref) = refs

    tm = y_ref.shape[0]
    tband = band_ref.shape[0]
    m0 = pl.multiple_of(pl.program_id(0) * tm, tm)

    # Load the input band once and apply the fused input transform.
    band = x_ref[pl.ds(m0, tband), :]
    if in_affine:
        band = band * si_ref[...] + hi_ref[...]
    if in_act:
        band = jnp.where(band >= 0.0, band, LRELU_SLOPE * band)
    band_ref[...] = band

    # Accumulate the ke*ke conv taps.
    acc_ref[...] = jnp.zeros_like(acc_ref)
    for t, off in enumerate(offs):
        lhs = band_ref[pl.ds(off, tm), :]
        if cout_is_one:
            # Final Cout=1 conv: lane reduction instead of a 1-wide matmul.
            acc_ref[...] += jnp.sum(lhs * w_ref[t], axis=1, keepdims=True)
        else:
            acc_ref[...] += jnp.dot(lhs, w_ref[t],
                                    preferred_element_type=jnp.float32)

    y = acc_ref[...] * so_ref[...] + ho_ref[...]
    y_ref[...] = y

    if with_stats:
        m = mask_ref[...]                       # (TM, 1) validity mask
        ym = y * m
        ssum_ref[...] = jnp.sum(ym, axis=0, keepdims=True)[None]
        ssq_ref[...] = jnp.sum(y * ym, axis=0, keepdims=True)[None]


# ---------------------------------------------------------------------------
# Layer wrapper: Conv2d(k=4, pad=1 reflect, stride 1|2) with fused input
# transform and output affine.  Returns the raw conv output (NHWC) and, when
# requested, its per-channel (sum, sum_of_squares) for BatchNorm.
# ---------------------------------------------------------------------------
def fused_conv_layer(x_nhwc, w_hwio, stride, *, in_scale=None, in_shift=None,
                     in_act=False, out_scale=None, out_shift=None,
                     with_stats=False):
    N, H, W, Cin = x_nhwc.shape
    Cout = w_hwio.shape[-1]
    x_nhwc = x_nhwc.astype(jnp.float32)
    xpad = jnp.pad(x_nhwc, ((0, 0), (1, 1), (1, 1), (0, 0)), mode="reflect")
    Hp, Wp = H + 2, W + 2

    if stride == 2:
        # Space-to-depth: the stride-2 4x4 conv becomes a stride-1 2x2 conv so
        # every tap is a contiguous row offset of the flattened input.
        assert Hp % 2 == 0 and Wp % 2 == 0, "stride-2 layer needs even H, W"
        ke, He, We, Ce = 2, Hp // 2, Wp // 2, 4 * Cin
        xe = xpad.reshape(N, He, 2, We, 2, Cin).transpose(
            0, 1, 3, 2, 4, 5).reshape(N, He, We, Ce)
        wt = w_hwio.reshape(2, 2, 2, 2, Cin, Cout).transpose(
            0, 2, 1, 3, 4, 5).reshape(4, Ce, Cout)
        if in_scale is not None:
            in_scale = jnp.tile(in_scale, 4)
            in_shift = jnp.tile(in_shift, 4)
        Ho, Wo = H // 2, W // 2
    else:
        ke, He, We, Ce = 4, Hp, Wp, Cin
        xe = xpad
        wt = w_hwio.reshape(16, Cin, Cout)
        Ho, Wo = H - 1, W - 1

    in_affine = in_scale is not None
    sc_in = (in_scale if in_affine else jnp.ones((Ce,))).reshape(1, Ce)
    sh_in = (in_shift if in_affine else jnp.zeros((Ce,))).reshape(1, Ce)
    sc_out = (out_scale if out_scale is not None
              else jnp.ones((Cout,))).reshape(1, Cout)
    sh_out = (out_shift if out_shift is not None
              else jnp.zeros((Cout,))).reshape(1, Cout)
    sc_in, sh_in = sc_in.astype(jnp.float32), sh_in.astype(jnp.float32)
    sc_out, sh_out = sc_out.astype(jnp.float32), sh_out.astype(jnp.float32)

    offs = tuple(a * We + b for a in range(ke) for b in range(ke))
    m_raw = N * He * We
    tm = _pick_tm(m_raw)
    mp = _round_up(m_raw, tm)
    band_slack = _round_up(offs[-1], 8)
    tband = tm + band_slack
    rows = mp + band_slack

    xf = jnp.pad(xe.reshape(m_raw, Ce), ((0, rows - m_raw), (0, 0)))

    cout_is_one = (Cout == 1)
    if cout_is_one:
        wt = jnp.transpose(wt, (0, 2, 1))           # (ke*ke, 1, Ce)
    wt = wt.astype(jnp.float32)

    grid = (mp // tm,)
    resident2 = lambda i: (0, 0)
    in_specs = [
        pl.BlockSpec((rows, Ce), resident2),        # activation (resident)
        pl.BlockSpec(wt.shape, lambda i: (0, 0, 0)),
        pl.BlockSpec((1, Ce), resident2),           # in scale
        pl.BlockSpec((1, Ce), resident2),           # in shift
        pl.BlockSpec((1, Cout), resident2),         # out scale
        pl.BlockSpec((1, Cout), resident2),         # out shift
    ]
    inputs = [xf, wt, sc_in, sh_in, sc_out, sh_out]
    out_shapes = [jax.ShapeDtypeStruct((mp, Cout), jnp.float32)]
    out_specs = [pl.BlockSpec((tm, Cout), lambda i: (i, 0))]

    if with_stats:
        mimg = jnp.zeros((He, We), jnp.float32).at[:Ho, :Wo].set(1.0)
        mask = jnp.tile(mimg.reshape(1, He * We), (N, 1)).reshape(m_raw)
        mask = jnp.pad(mask, (0, mp - m_raw)).reshape(mp, 1)
        inputs.append(mask)
        in_specs.append(pl.BlockSpec((tm, 1), lambda i: (i, 0)))
        n_tiles = mp // tm
        out_shapes += [jax.ShapeDtypeStruct((n_tiles, 1, Cout),
                                            jnp.float32)] * 2
        out_specs += [pl.BlockSpec((1, 1, Cout), lambda i: (i, 0, 0))] * 2

    kern = functools.partial(_fused_conv_kernel, offs=offs,
                             in_affine=in_affine, in_act=in_act,
                             with_stats=with_stats, cout_is_one=cout_is_one)

    outs = pl.pallas_call(
        kern,
        out_shape=tuple(out_shapes),
        grid_spec=pltpu.PrefetchScalarGridSpec(
            num_scalar_prefetch=0,
            grid=grid,
            in_specs=in_specs,
            out_specs=out_specs,
            scratch_shapes=[pltpu.VMEM((tband, Ce), jnp.float32),
                            pltpu.VMEM((tm, Cout), jnp.float32)]),
        compiler_params=pltpu.CompilerParams(
            dimension_semantics=("parallel",)),
    )(*inputs)

    y = outs[0][:m_raw].reshape(N, He, We, Cout)[:, :Ho, :Wo, :]
    if with_stats:
        return y, (jnp.sum(outs[1], axis=(0, 1)), jnp.sum(outs[2], axis=(0, 1)))
    return y, None


# ---------------------------------------------------------------------------
# PatchDiscriminator forward
# ---------------------------------------------------------------------------
def init_params(key, x_channels, y_channels, features):
    cin = x_channels + y_channels
    keys = iter(jax.random.split(key, 4 * len(features) + 8))
    params = {}
    params["initial"] = (
        0.05 * jax.random.normal(next(keys), (4, 4, cin, features[0]),
                                 jnp.float32),
        0.05 * jax.random.normal(next(keys), (features[0],), jnp.float32),
    )
    blocks = []
    for i in range(1, len(features)):
        stride = 1 if i == len(features) - 1 else 2
        w = 0.05 * jax.random.normal(next(keys),
                                     (4, 4, features[i - 1], features[i]),
                                     jnp.float32)
        gamma = 1.0 + 0.05 * jax.random.normal(next(keys), (features[i],),
                                               jnp.float32)
        beta = 0.05 * jax.random.normal(next(keys), (features[i],),
                                        jnp.float32)
        blocks.append((w, gamma, beta, stride))
    params["blocks"] = blocks
    params["final"] = (
        0.05 * jax.random.normal(next(keys), (4, 4, features[-1], 1),
                                 jnp.float32),
        0.05 * jax.random.normal(next(keys), (1,), jnp.float32),
    )
    return params


def patch_discriminator_forward(xy_nchw, params):
    # NCHW at the boundary (PyTorch convention), NHWC inside.
    x = jnp.transpose(xy_nchw, (0, 2, 3, 1)).astype(jnp.float32)

    # initial: Conv(s2) + bias; its LeakyReLU is fused into the next conv.
    w, b = params["initial"]
    y, _ = fused_conv_layer(x, w, 2, out_shift=b)
    pend_scale, pend_shift = None, None   # pending BN affine for the next conv

    # CNNBlocks: conv (no bias).  This layer's BN scale/shift + LeakyReLU are
    # applied inside the *next* conv's fused input transform; BN batch stats
    # come from the kernel's masked per-tile partial sums.
    # TODO(synk): eval-mode BatchNorm (running stats) is not modeled; this uses
    # train-mode batch statistics, matching the reference semantics.
    for (w, gamma, beta, stride) in params["blocks"]:
        y, (s1, s2) = fused_conv_layer(
            y, w, stride, in_scale=pend_scale, in_shift=pend_shift,
            in_act=True, with_stats=True)
        n, ho, wo, _ = y.shape
        count = float(n * ho * wo)
        mean = s1 / count
        var = s2 / count - mean * mean           # biased var (train-mode norm)
        pend_scale = gamma / jnp.sqrt(var + BN_EPS)
        pend_shift = beta - mean * pend_scale

    # final: Conv(s1, Cout=1) + bias, consuming the last block's BN + LReLU.
    w, b = params["final"]
    y, _ = fused_conv_layer(y, w, 1, in_scale=pend_scale, in_shift=pend_shift,
                            in_act=True, out_shift=b)
    return jnp.transpose(y, (0, 3, 1, 2))        # back to NCHW


# ---------------------------------------------------------------------------
# Pure-JAX reference (lax.conv) for correctness checking
# ---------------------------------------------------------------------------
def reference_forward(xy_nchw, params):
    x = jnp.transpose(xy_nchw, (0, 2, 3, 1)).astype(jnp.float32)

    def conv(x, w, s):
        xp = jnp.pad(x, ((0, 0), (1, 1), (1, 1), (0, 0)), mode="reflect")
        return jax.lax.conv_general_dilated(
            xp, w, (s, s), "VALID",
            dimension_numbers=("NHWC", "HWIO", "NHWC"))

    w, b = params["initial"]
    x = conv(x, w, 2) + b
    x = jnp.where(x >= 0, x, LRELU_SLOPE * x)
    for (w, gamma, beta, stride) in params["blocks"]:
        y = conv(x, w, stride)
        mean = jnp.mean(y, axis=(0, 1, 2))
        var = jnp.var(y, axis=(0, 1, 2))
        y = (y - mean) / jnp.sqrt(var + BN_EPS) * gamma + beta
        x = jnp.where(y >= 0, y, LRELU_SLOPE * y)
    w, b = params["final"]
    x = conv(x, w, 1) + b
    return jnp.transpose(x, (0, 3, 1, 2))


# ---------------------------------------------------------------------------
if __name__ == "__main__":
    key = jax.random.PRNGKey(0)
    k_in, k_par = jax.random.split(key)

    # Small-but-valid config: x/y images with 2 channels each, 64x64 spatial,
    # reduced feature widths (constructor argument of PatchDiscriminator).
    x_channels, y_channels = 2, 2
    features = [16, 32, 64, 128]
    N, H, W = 2, 64, 64

    xy = jax.random.normal(k_in, (N, x_channels + y_channels, H, W),
                           jnp.float32)
    params = init_params(k_par, x_channels, y_channels, features)

    out = patch_discriminator_forward(xy, params)
    out = jax.block_until_ready(out)

    ref = jax.block_until_ready(reference_forward(xy, params))
    assert out.shape == ref.shape, (out.shape, ref.shape)
    max_err = float(jnp.max(jnp.abs(out - ref)))
    assert max_err < 1e-3, f"max abs error too large: {max_err}"

    print("KERNEL_OK")
</pallas_src>

<mosaic_0001>
module attributes {stable_mosaic.version = 11 : i64} {
  func.func @_fused_conv_kernel(%arg0: i32, %arg1: memref<2600x16xf32, #tpu.memory_space<vmem>>, %arg2: memref<4x16x16xf32, #tpu.memory_space<vmem>>, %arg3: memref<1x16xf32, #tpu.memory_space<vmem>>, %arg4: memref<1x16xf32, #tpu.memory_space<vmem>>, %arg5: memref<1x16xf32, #tpu.memory_space<vmem>>, %arg6: memref<1x16xf32, #tpu.memory_space<vmem>>, %arg7: memref<512x16xf32, #tpu.memory_space<vmem>>, %arg8: memref<552x16xf32, #tpu.memory_space<vmem>>, %arg9: memref<512x16xf32, #tpu.memory_space<vmem>>) attributes {dimension_semantics = [#tpu.dimension_semantics<parallel>], iteration_bounds = array<i64: 5>, scalar_prefetch = 0 : i64, scratch_operands = 2 : i64, tpu.core_type = #tpu.core_type<tc>, window_params = [{pipeline_mode = #tpu.pipeline_mode<synchronous>, transform_indices = @transform_0, window_bounds = array<i64: 2600, 16>}, {pipeline_mode = #tpu.pipeline_mode<synchronous>, transform_indices = @transform_1, window_bounds = array<i64: 4, 16, 16>}, {pipeline_mode = #tpu.pipeline_mode<synchronous>, transform_indices = @transform_2, window_bounds = array<i64: 1, 16>}, {pipeline_mode = #tpu.pipeline_mode<synchronous>, transform_indices = @transform_3, window_bounds = array<i64: 1, 16>}, {pipeline_mode = #tpu.pipeline_mode<synchronous>, transform_indices = @transform_4, window_bounds = array<i64: 1, 16>}, {pipeline_mode = #tpu.pipeline_mode<synchronous>, transform_indices = @transform_5, window_bounds = array<i64: 1, 16>}, {transform_indices = @transform_6, window_bounds = array<i64: 512, 16>}]} {
    %c512_i32 = arith.constant 512 : i32
    %0 = arith.muli %arg0, %c512_i32 : i32
    %1 = tpu.assume_multiple %0, 512 : i32
    %2 = arith.index_cast %1 : i32 to index
    %c0 = arith.constant 0 : index
    %3 = vector.load %arg1[%2, %c0] : memref<2600x16xf32, #tpu.memory_space<vmem>>, vector<552x16xf32>
    %c0_0 = arith.constant 0 : index
    %c0_1 = arith.constant 0 : index
    %4 = vector.load %arg8[%c0_0, %c0_1] : memref<552x16xf32, #tpu.memory_space<vmem>>, vector<552x16xf32>
    tpu.vector_store %arg8[%c0_0, %c0_1], %3 {strides = array<i32>} : memref<552x16xf32, #tpu.memory_space<vmem>>, vector<552x16xf32>,
    %cst = arith.constant 0.000000e+00 : f32
    %5 = vector.broadcast %cst : f32 to vector<512x16xf32>
    %c0_2 = arith.constant 0 : index
    %c0_3 = arith.constant 0 : index
    %6 = vector.load %arg9[%c0_2, %c0_3] : memref<512x16xf32, #tpu.memory_space<vmem>>, vector<512x16xf32>
    tpu.vector_store %arg9[%c0_2, %c0_3], %5 {strides = array<i32>} : memref<512x16xf32, #tpu.memory_space<vmem>>, vector<512x16xf32>,
    %c0_4 = arith.constant 0 : index
    %c0_5 = arith.constant 0 : index
    %7 = vector.load %arg8[%c0_4, %c0_5] : memref<552x16xf32, #tpu.memory_space<vmem>>, vector<512x16xf32>
    %c0_6 = arith.constant 0 : index
    %c0_7 = arith.constant 0 : index
    %8 = vector.load %arg9[%c0_6, %c0_7] : memref<512x16xf32, #tpu.memory_space<vmem>>, vector<512x16xf32>
    %c0_8 = arith.constant 0 : index
    %c0_9 = arith.constant 0 : index
    %c0_10 = arith.constant 0 : index
    %9 = vector.load %arg2[%c0_8, %c0_9, %c0_10] : memref<4x16x16xf32, #tpu.memory_space<vmem>>, vector<1x16x16xf32>
    %10 = vector.shape_cast %9 : vector<1x16x16xf32> to vector<16x16xf32>
    %cst_11 = arith.constant dense<0.000000e+00> : vector<512x16xf32>
    %11 = tpu.matmul %7, %10, %cst_11 {dimension_numbers = #tpu.dot_dimension_numbers<[1], [0], [0], [1], [0, 0, 1, 1], [], []>} : vector<512x16xf32>, vector<16x16xf32>, vector<512x16xf32> -> vector<512x16xf32>
    %12 = arith.addf %8, %11 : vector<512x16xf32>
    %c0_12 = arith.constant 0 : index
    %c0_13 = arith.constant 0 : index
    %13 = vector.load %arg9[%c0_12, %c0_13] : memref<512x16xf32, #tpu.memory_space<vmem>>, vector<512x16xf32>
    tpu.vector_store %arg9[%c0_12, %c0_13], %12 {strides = array<i32>} : memref<512x16xf32, #tpu.memory_space<vmem>>, vector<512x16xf32>,
    %c1 = arith.constant 1 : index
    %c0_14 = arith.constant 0 : index
    %14 = vector.load %arg8[%c1, %c0_14] : memref<552x16xf32, #tpu.memory_space<vmem>>, vector<512x16xf32>
    %c0_15 = arith.constant 0 : index
    %c0_16 = arith.constant 0 : index
    %15 = vector.load %arg9[%c0_15, %c0_16] : memref<512x16xf32, #tpu.memory_space<vmem>>, vector<512x16xf32>
    %c1_17 = arith.constant 1 : index
    %c0_18 = arith.constant 0 : index
    %c0_19 = arith.constant 0 : index
    %16 = vector.load %arg2[%c1_17, %c0_18, %c0_19] : memref<4x16x16xf32, #tpu.memory_space<vmem>>, vector<1x16x16xf32>
    %17 = vector.shape_cast %16 : vector<1x16x16xf32> to vector<16x16xf32>
    %cst_20 = arith.constant dense<0.000000e+00> : vector<512x16xf32>
    %18 = tpu.matmul %14, %17, %cst_20 {dimension_numbers = #tpu.dot_dimension_numbers<[1], [0], [0], [1], [0, 0, 1, 1], [], []>} : vector<512x16xf32>, vector<16x16xf32>, vector<512x16xf32> -> vector<512x16xf32>
    %19 = arith.addf %15, %18 : vector<512x16xf32>
    %c0_21 = arith.constant 0 : index
    %c0_22 = arith.constant 0 : index
    %20 = vector.load %arg9[%c0_21, %c0_22] : memref<512x16xf32, #tpu.memory_space<vmem>>, vector<512x16xf32>
    tpu.vector_store %arg9[%c0_21, %c0_22], %19 {strides = array<i32>} : memref<512x16xf32, #tpu.memory_space<vmem>>, vector<512x16xf32>,
    %c33 = arith.constant 33 : index
    %c0_23 = arith.constant 0 : index
    %21 = vector.load %arg8[%c33, %c0_23] : memref<552x16xf32, #tpu.memory_space<vmem>>, vector<512x16xf32>
    %c0_24 = arith.constant 0 : index
    %c0_25 = arith.constant 0 : index
    %22 = vector.load %arg9[%c0_24, %c0_25] : memref<512x16xf32, #tpu.memory_space<vmem>>, vector<512x16xf32>
    %c2 = arith.constant 2 : index
    %c0_26 = arith.constant 0 : index
    %c0_27 = arith.constant 0 : index
    %23 = vector.load %arg2[%c2, %c0_26, %c0_27] : memref<4x16x16xf32, #tpu.memory_space<vmem>>, vector<1x16x16xf32>
    %24 = vector.shape_cast %23 : vector<1x16x16xf32> to vector<16x16xf32>
    %cst_28 = arith.constant dense<0.000000e+00> : vector<512x16xf32>
    %25 = tpu.matmul %21, %24, %cst_28 {dimension_numbers = #tpu.dot_dimension_numbers<[1], [0], [0], [1], [0, 0, 1, 1], [], []>} : vector<512x16xf32>, vector<16x16xf32>, vector<512x16xf32> -> vector<512x16xf32>
    %26 = arith.addf %22, %25 : vector<512x16xf32>
    %c0_29 = arith.constant 0 : index
    %c0_30 = arith.constant 0 : index
    %27 = vector.load %arg9[%c0_29, %c0_30] : memref<512x16xf32, #tpu.memory_space<vmem>>, vector<512x16xf32>
    tpu.vector_store %arg9[%c0_29, %c0_30], %26 {strides = array<i32>} : memref<512x16xf32, #tpu.memory_space<vmem>>, vector<512x16xf32>,
    %c34 = arith.constant 34 : index
    %c0_31 = arith.constant 0 : index
    %28 = vector.load %arg8[%c34, %c0_31] : memref<552x16xf32, #tpu.memory_space<vmem>>, vector<512x16xf32>
    %c0_32 = arith.constant 0 : index
    %c0_33 = arith.constant 0 : index
    %29 = vector.load %arg9[%c0_32, %c0_33] : memref<512x16xf32, #tpu.memory_space<vmem>>, vector<512x16xf32>
    %c3 = arith.constant 3 : index
    %c0_34 = arith.constant 0 : index
    %c0_35 = arith.constant 0 : index
    %30 = vector.load %arg2[%c3, %c0_34, %c0_35] : memref<4x16x16xf32, #tpu.memory_space<vmem>>, vector<1x16x16xf32>
    %31 = vector.shape_cast %30 : vector<1x16x16xf32> to vector<16x16xf32>
    %cst_36 = arith.constant dense<0.000000e+00> : vector<512x16xf32>
    %32 = tpu.matmul %28, %31, %cst_36 {dimension_numbers = #tpu.dot_dimension_numbers<[1], [0], [0], [1], [0, 0, 1, 1], [], []>} : vector<512x16xf32>, vector<16x16xf32>, vector<512x16xf32> -> vector<512x16xf32>
    %33 = arith.addf %29, %32 : vector<512x16xf32>
    %c0_37 = arith.constant 0 : index
    %c0_38 = arith.constant 0 : index
    %34 = vector.load %arg9[%c0_37, %c0_38] : memref<512x16xf32, #tpu.memory_space<vmem>>, vector<512x16xf32>
    tpu.vector_store %arg9[%c0_37, %c0_38], %33 {strides = array<i32>} : memref<512x16xf32, #tpu.memory_space<vmem>>, vector<512x16xf32>,
    %c0_39 = arith.constant 0 : index
    %c0_40 = arith.constant 0 : index
    %35 = vector.load %arg9[%c0_39, %c0_40] : memref<512x16xf32, #tpu.memory_space<vmem>>, vector<512x16xf32>
    %c0_41 = arith.constant 0 : index
    %c0_42 = arith.constant 0 : index
    %36 = vector.load %arg5[%c0_41, %c0_42] : memref<1x16xf32, #tpu.memory_space<vmem>>, vector<1x16xf32>
    %37 = vector.broadcast %36 : vector<1x16xf32> to vector<512x16xf32>
    %38 = arith.mulf %35, %37 : vector<512x16xf32>
    %c0_43 = arith.constant 0 : index
    %c0_44 = arith.constant 0 : index
    %39 = vector.load %arg6[%c0_43, %c0_44] : memref<1x16xf32, #tpu.memory_space<vmem>>, vector<1x16xf32>
    %40 = vector.broadcast %39 : vector<1x16xf32> to vector<512x16xf32>
    %41 = arith.addf %38, %40 : vector<512x16xf32>
    %c0_45 = arith.constant 0 : index
    %c0_46 = arith.constant 0 : index
    %42 = vector.load %arg7[%c0_45, %c0_46] : memref<512x16xf32, #tpu.memory_space<vmem>>, vector<512x16xf32>
    tpu.vector_store %arg7[%c0_45, %c0_46], %41 {strides = array<i32>} : memref<512x16xf32, #tpu.memory_space<vmem>>, vector<512x16xf32>,
    return
  }
  func.func @transform_0(%arg0: i32) -> (i32, i32) {
    %c0_i32 = arith.constant 0 : i32
    %c0_i32_0 = arith.constant 0 : i32
    %c0_i32_1 = arith.constant 0 : i32
    return %c0_i32, %c0_i32_0 : i32, i32
  }
  func.func @transform_1(%arg0: i32) -> (i32, i32, i32) {
    %c0_i32 = arith.constant 0 : i32
    %c0_i32_0 = arith.constant 0 : i32
    %c0_i32_1 = arith.constant 0 : i32
    %c0_i32_2 = arith.constant 0 : i32
    return %c0_i32, %c0_i32_0, %c0_i32_1 : i32, i32, i32
  }
  func.func @transform_2(%arg0: i32) -> (i32, i32) {
    %c0_i32 = arith.constant 0 : i32
    %c0_i32_0 = arith.constant 0 : i32
    %c0_i32_1 = arith.constant 0 : i32
    return %c0_i32, %c0_i32_0 : i32, i32
  }
  func.func @transform_3(%arg0: i32) -> (i32, i32) {
    %c0_i32 = arith.constant 0 : i32
    %c0_i32_0 = arith.constant 0 : i32
    %c0_i32_1 = arith.constant 0 : i32
    return %c0_i32, %c0_i32_0 : i32, i32
  }
  func.func @transform_4(%arg0: i32) -> (i32, i32) {
    %c0_i32 = arith.constant 0 : i32
    %c0_i32_0 = arith.constant 0 : i32
    %c0_i32_1 = arith.constant 0 : i32
    return %c0_i32, %c0_i32_0 : i32, i32
  }
  func.func @transform_5(%arg0: i32) -> (i32, i32) {
    %c0_i32 = arith.constant 0 : i32
    %c0_i32_0 = arith.constant 0 : i32
    %c0_i32_1 = arith.constant 0 : i32
    return %c0_i32, %c0_i32_0 : i32, i32
  }
  func.func @transform_6(%arg0: i32) -> (i32, i32) {
    %c0_i32 = arith.constant 0 : i32
    %c0_i32_0 = arith.constant 0 : i32
    return %arg0, %c0_i32 : i32, i32
  }
}

</mosaic_0001>

<bundles_post_ra>
// kernel: tpu_custom_call.1
= control target key start
LH: loop header
LB: loop body
LE: loop exit
PB: predicated region body
PF: predicated region fallthrough
CT: control target
= control target key end

     0   :  { %s5105_s21 = smov 0   ;;  %s6455_s0 = inlined_call_operand.vmem [shape: f32[2600,16], index: 0, kind: input, shape index: {}]   ;;  %s6456_s1 = inlined_call_operand.vmem [shape: f32[4,16,16], index: 1, kind: input, shape index: {}]   ;;  %s6457_s2 = inlined_call_operand.vmem [shape: f32[1,16], index: 2, kind: input, shape index: {}]   ;;  %s6458_s3 = inlined_call_operand.vmem [shape: f32[1,16], index: 3, kind: input, shape index: {}]   ;;  %s6459_s4 = inlined_call_operand.vmem [shape: f32[1,16], index: 4, kind: input, shape index: {}]   ;;  %s6460_s5 = inlined_call_operand.vmem [shape: f32[1,16], index: 5, kind: input, shape index: {}]   ;;  %s6461_s6 = inlined_call_operand.vmem [shape: f32[2560,16], index: 6, kind: output, shape index: {}]  }
   0x1 LB: > { %s4097_s2 = sadd.s32 4294967295, %s5067_s21   ;;  %p4100_p0 = scmp.ge.s32.totalorder %s5067_s21, 1  ;;  %s5067_s21 = sphi %s5105_s21, %s16_s21  }
   0x2   : > { %p202_p1 = scmp.lt.s32.totalorder %s5067_s21, 6 }
   0x4   : > { %p203_p2 = pnand %p4100_p0, %p202_p1 }
   0x5   : > { %v566_v0 = vld [vmem:[%s6456_s1] sm:$0xff] (!%p203_p2)  ;;  %v567_v1 = vld [vmem:[%s6456_s1 + $0x8] sm:$0xff] (!%p203_p2)  ;;  %s4103_s25 = sshll.u32 (!%p203_p2), %s4097_s2, 9  ;;  %vm304_vm0 = vcmask (!%p203_p2), 130048   ;;  %v4168_v5 = vld [vmem:[%s6456_s1 + $0x10] sm:$0xff] (!%p203_p2)  ;;  %s4101_s17 = sshll.u32 (!%p203_p2), %s4097_s2, 6 }
   0x6   : > { %206 = sbr.rel (%p203_p2) target bundleno = 510 (0x1fe), region = 44  ;;  %v4234_v2 = vld [vmem:[%s6456_s1 + $0x20] sm:$0xff] (!%p203_p2)  ;;  %v5034_v3 = vpack.c.bf16 (!%p203_p2), %v567_v1, %v566_v0  ;;  %s5127_s30 = scalar_lea.vmem (!%p203_p2), %s6455_s0, %s4103_s25  ;;  %v4235_v4 = vld [vmem:[%s6456_s1 + $0x28] sm:$0xff] (!%p203_p2)  ;;  %v4169_v6 = vld [vmem:[%s6456_s1 + $0x18] sm:$0xff] (!%p203_p2) }
   0x7   : > { %v235_v7 = vld [vmem:[%s5127_s30] sm:$0xff] (!%p203_p2)  ;;  %v5042_v8 = vpack.c.bf16 (!%p203_p2), %v4235_v4, %v4234_v2  ;;  %v236_v9 = vld [vmem:[%s5127_s30 + $0x8] sm:$0xff] (!%p203_p2)  ;;  %v237_v10 = vld [vmem:[%s5127_s30 + $0x10] sm:$0xff] (!%p203_p2)  ;;  %v5038_v11 = vpack.c.bf16 (!%p203_p2), %v4169_v6, %v4168_v5  ;;  %p228_p3 = scmp.lt.s32.totalorder (!%p203_p2), %s4101_s17, 319 }
   0x8   : > { %5035 = vmatprep.subr.bf16.mxu0 (!%p203_p2), %v5034_v3  ;;  %305 = vst.msk [vmem:[#allocation2] sm:$0xff] (!%p203_p2), %vm304_vm0, %v235_v7  ;;  %306 = vst.msk [vmem:[#allocation2 + $0x8] sm:$0xff] (!%p203_p2), %vm304_vm0, %v236_v9  ;;  %v238_v12 = vld [vmem:[%s5127_s30 + $0x18] sm:$0xff] (!%p203_p2)  ;;  %v239_v13 = vld [vmem:[%s5127_s30 + $0x20] sm:$0xff] (!%p203_p2) }
   0x9   : > { %307 = vst.msk [vmem:[#allocation2 + $0x10] sm:$0xff] (!%p203_p2), %vm304_vm0, %v237_v10  ;;  %v240_v14 = vld [vmem:[%s5127_s30 + $0x28] sm:$0xff] (!%p203_p2)  ;;  %5037 = vmatpush3.bf16.msra.mxu0 (!%p203_p2), %v5034_v3  ;;  %308 = vst.msk [vmem:[#allocation2 + $0x18] sm:$0xff] (!%p203_p2), %vm304_vm0, %v238_v12  ;;  %5039 = vmatprep.subr.bf16.mxu1 (!%p203_p2), %v5038_v11  ;;  %v4300_v15 = vld [vmem:[%s6456_s1 + $0x30] sm:$0xff] (!%p203_p2) }
   0xa   : > { %309 = vst.msk [vmem:[#allocation2 + $0x20] sm:$0xff] (!%p203_p2), %vm304_vm0, %v239_v13  ;;  %310 = vst.msk [vmem:[#allocation2 + $0x28] sm:$0xff] (!%p203_p2), %vm304_vm0, %v240_v14  ;;  %v4301_v16 = vld [vmem:[%s6456_s1 + $0x38] sm:$0xff] (!%p203_p2)  ;;  %v241_v17 = vld [vmem:[%s5127_s30 + $0x30] sm:$0xff] (!%p203_p2)  ;;  %5043 = vmatprep.subr.bf16.mxu0 (!%p203_p2), %v5042_v8  ;;  %5041 = vmatpush3.bf16.msra.mxu1 (!%p203_p2), %v5038_v11 }
   0xb   : > { %v5046_v18 = vpack.c.bf16 (!%p203_p2), %v4301_v16, %v4300_v15  ;;  %311 = vst.msk [vmem:[#allocation2 + $0x30] sm:$0xff] (!%p203_p2), %vm304_vm0, %v241_v17  ;;  %v242_v19 = vld [vmem:[%s5127_s30 + $0x38] sm:$0xff] (!%p203_p2)  ;;  %v243_v20 = vld [vmem:[%s5127_s30 + $0x40] sm:$0xff] (!%p203_p2)  ;;  %v244_v21 = vld [vmem:[%s5127_s30 + $0x48] sm:$0xff] (!%p203_p2) }
   0xc   : > { %312 = vst.msk [vmem:[#allocation2 + $0x38] sm:$0xff] (!%p203_p2), %vm304_vm0, %v242_v19  ;;  %313 = vst.msk [vmem:[#allocation2 + $0x40] sm:$0xff] (!%p203_p2), %vm304_vm0, %v243_v20  ;;  %v245_v22 = vld [vmem:[%s5127_s30 + $0x50] sm:$0xff] (!%p203_p2)  ;;  %v246_v23 = vld [vmem:[%s5127_s30 + $0x58] sm:$0xff] (!%p203_p2) }
   0xd   : > { %314 = vst.msk [vmem:[#allocation2 + $0x48] sm:$0xff] %vm304_vm0, %v244_v21  ;;  %v247_v24 = vld [vmem:[%s5127_s30 + $0x60] sm:$0xff]  ;;  %5047 = vmatprep.subr.bf16.mxu1 %v5046_v18  ;;  %315 = vst.msk [vmem:[#allocation2 + $0x50] sm:$0xff] %vm304_vm0, %v245_v22  ;;  %v248_v25 = vld [vmem:[%s5127_s30 + $0x68] sm:$0xff]  ;;  %s6463_s17 = smov (!%p228_p3, %s4101_s17), 319 }
   0xe   : > { %316 = vst.msk [vmem:[#allocation2 + $0x58] sm:$0xff] %vm304_vm0, %v246_v23  ;;  %317 = vst.msk [vmem:[#allocation2 + $0x60] sm:$0xff] %vm304_vm0, %v247_v24  ;;  %v249_v26 = vld [vmem:[%s5127_s30 + $0x70] sm:$0xff]  ;;  %v250_v27 = vld [vmem:[%s5127_s30 + $0x78] sm:$0xff]  ;;  %s4102_s20 = sshll.u32 %s6463_s17, 3 }
   0xf   : > { %318 = vst.msk [vmem:[#allocation2 + $0x68] sm:$0xff] %vm304_vm0, %v248_v25  ;;  %319 = vst.msk [vmem:[#allocation2 + $0x70] sm:$0xff] %vm304_vm0, %v249_v26  ;;  %v251_v28 = vld [vmem:[%s5127_s30 + $0x80] sm:$0xff]  ;;  %v252_v29 = vld [vmem:[%s5127_s30 + $0x88] sm:$0xff]  ;;  %s6072_s24 = scalar_lea.vmem %s6461_s6, %s4102_s20 }
  0x10   : > { %320 = vst.msk [vmem:[#allocation2 + $0x78] sm:$0xff] %vm304_vm0, %v250_v27  ;;  %v253_v30 = vld [vmem:[%s5127_s30 + $0x90] sm:$0xff]  ;;  %321 = vst.msk [vmem:[#allocation2 + $0x80] sm:$0xff] %vm304_vm0, %v251_v28  ;;  %v254_v31 = vld [vmem:[%s5127_s30 + $0x98] sm:$0xff] }
  0x11   : > { %322 = vst.msk [vmem:[#allocation2 + $0x88] sm:$0xff] %vm304_vm0, %v252_v29  ;;  %323 = vst.msk [vmem:[#allocation2 + $0x90] sm:$0xff] %vm304_vm0, %v253_v30  ;;  %v255_v32 = vld [vmem:[%s5127_s30 + $0xa0] sm:$0xff]  ;;  %v256_v33 = vld [vmem:[%s5127_s30 + $0xa8] sm:$0xff] }
  0x12   : > { %v438_v34 = vld [vmem:[#allocation2] sm:$0xff]  ;;  %v439_v35 = vld [vmem:[#allocation2 + $0x8] sm:$0xff]  ;;  %v440_v36 = vld [vmem:[#allocation2 + $0x10] sm:$0xff]  ;;  %324 = vst.msk [vmem:[#allocation2 + $0x98] sm:$0xff] %vm304_vm0, %v254_v31 }
  0x13   : > { %325 = vst.msk [vmem:[#allocation2 + $0xa0] sm:$0xff] %vm304_vm0, %v255_v32  ;;  %326 = vst.msk [vmem:[#allocation2 + $0xa8] sm:$0xff] %vm304_vm0, %v256_v33  ;;  %4638 = vmatprep.mubr.msk.f32.mxu0 %vm304_vm0, %v438_v34  ;;  %v1273_v37 = vld [vmem:[#allocation2 + $0x1] sm:$0xff]  ;;  %v1274_v38 = vld [vmem:[#allocation2 + $0x9] sm:$0xff] }
  0x14   : > { %4639 = vmatmul.mubr.msk.f32.vlgmr.msra.gmra.mrb[0].mxu0 %vm304_vm0, %v439_v35  ;;  %v441_v39 = vld [vmem:[#allocation2 + $0x18] sm:$0xff]  ;;  %v442_v40 = vld [vmem:[#allocation2 + $0x20] sm:$0xff]  ;;  %4738 = vmatprep.mubr.msk.f32.mxu1 %vm304_vm0, %v1273_v37  ;;  %v443_v43 = vld [vmem:[#allocation2 + $0x28] sm:$0xff] }
  0x15   : > { %5045 = vmatpush3.bf16.msra.mxu0 %v5042_v8  ;;  %4641 = vmatprep.mubr.msk.f32.mxu0 %vm304_vm0, %v440_v36  ;;  %v1275_v41 = vld [vmem:[#allocation2 + $0x11] sm:$0xff]  ;;  %v1276_v42 = vld [vmem:[#allocation2 + $0x19] sm:$0xff]  ;;  %v5196_v44 = vld [vmem:[#allocation2 + $0x21] sm:$0xff] }
  0x16   : > { %4739 = vmatmul.mubr.msk.f32.vlgmr.msra.gmra.mrb[0].mxu1 %vm304_vm0, %v1274_v38  ;;  %v444_v45 = vld [vmem:[#allocation2 + $0x30] sm:$0xff]  ;;  %v445_v47 = vld [vmem:[#allocation2 + $0x38] sm:$0xff]  ;;  %v446_v49 = vld [vmem:[#allocation2 + $0x40] sm:$0xff] }
  0x17   : > { %5049 = vmatpush3.bf16.msra.mxu1 %v5046_v18  ;;  %4741 = vmatprep.mubr.msk.f32.mxu1 %vm304_vm0, %v1275_v41  ;;  %v5202_v46 = vld [vmem:[#allocation2 + $0x29] sm:$0xff]  ;;  %v5205_v48 = vld [vmem:[#allocation2 + $0x31] sm:$0xff]  ;;  %v5214_v54 = vld [vmem:[#allocation2 + $0x39] sm:$0xff] }
  0x18   : > { %4642 = vmatmul.mubr.msk.f32.gmra.mrb[2].mxu0 %vm304_vm0, %v441_v39  ;;  %v447_v50 = vld [vmem:[#allocation2 + $0x48] sm:$0xff]  ;;  %v257_v51 = vld [vmem:[%s5127_s30 + $0xb0] sm:$0xff]  ;;  %v258_v52 = vld [vmem:[%s5127_s30 + $0xb8] sm:$0xff] }
  0x19   : > { %4644 = vmatprep.mubr.msk.f32.mxu0 %vm304_vm0, %v442_v40  ;;  %v448_v53 = vld [vmem:[#allocation2 + $0x50] sm:$0xff]  ;;  %327 = vst.msk [vmem:[#allocation2 + $0xb0] sm:$0xff] %vm304_vm0, %v257_v51  ;;  %328 = vst.msk [vmem:[#allocation2 + $0xb8] sm:$0xff] %vm304_vm0, %v258_v52  ;;  %v259_v55 = vld [vmem:[%s5127_s30 + $0xc0] sm:$0xff] }
  0x1a   : > { %4742 = vmatmul.mubr.msk.f32.gmra.mrb[2].mxu1 %vm304_vm0, %v1276_v42  ;;  %v5220_v56 = vld [vmem:[#allocation2 + $0x41] sm:$0xff]  ;;  %329 = vst.msk [vmem:[#allocation2 + $0xc0] sm:$0xff] %vm304_vm0, %v259_v55  ;;  %v261_v58 = vld [vmem:[%s5127_s30 + $0xd0] sm:$0xff]  ;;  %v262_v60 = vld [vmem:[%s5127_s30 + $0xd8] sm:$0xff] }
  0x1b   : > { %4744 = vmatprep.mubr.msk.f32.mxu1 %vm304_vm0, %v5196_v44  ;;  %v260_v57 = vld [vmem:[%s5127_s30 + $0xc8] sm:$0xff]  ;;  %331 = vst.msk [vmem:[#allocation2 + $0xd0] sm:$0xff] %vm304_vm0, %v261_v58  ;;  %v263_v61 = vld [vmem:[%s5127_s30 + $0xe0] sm:$0xff]  ;;  %v449_v63 = vld [vmem:[#allocation2 + $0x58] sm:$0xff] }
  0x1c   : > { %4645 = vmatmul.mubr.msk.f32.gmra.mrb[4].mxu0 %vm304_vm0, %v443_v43  ;;  %v5225_v59 = vld [vmem:[#allocation2 + $0x49] sm:$0xff]  ;;  %330 = vst.msk [vmem:[#allocation2 + $0xc8] sm:$0xff] %vm304_vm0, %v260_v57  ;;  %v5234_v0 = vld [vmem:[#allocation2 + $0x51] sm:$0xff]  ;;  %332 = vst.msk [vmem:[#allocation2 + $0xd8] sm:$0xff] %vm304_vm0, %v262_v60 }
  0x1d   : > { %4647 = vmatprep.mubr.msk.f32.mxu0 %vm304_vm0, %v444_v45  ;;  %v264_v62 = vld [vmem:[%s5127_s30 + $0xe8] sm:$0xff]  ;;  %333 = vst.msk [vmem:[#allocation2 + $0xe0] sm:$0xff] %vm304_vm0, %v263_v61  ;;  %v265_v1 = vld [vmem:[%s5127_s30 + $0xf0] sm:$0xff]  ;;  %v266_v2 = vld [vmem:[%s5127_s30 + $0xf8] sm:$0xff] }
  0x1e   : > { %4745 = vmatmul.mubr.msk.f32.gmra.mrb[4].mxu1 %vm304_vm0, %v5202_v46  ;;  %334 = vst.msk [vmem:[#allocation2 + $0xe8] sm:$0xff] %vm304_vm0, %v264_v62  ;;  %v267_v3 = vld [vmem:[%s5127_s30 + $0x100] sm:$0xff]  ;;  %335 = vst.msk [vmem:[#allocation2 + $0xf0] sm:$0xff] %vm304_vm0, %v265_v1  ;;  %v268_v5 = vld [vmem:[%s5127_s30 + $0x108] sm:$0xff] }
  0x1f   : > { %4747 = vmatprep.mubr.msk.f32.mxu1 %vm304_vm0, %v5205_v48  ;;  %v450_v4 = vld [vmem:[#allocation2 + $0x60] sm:$0xff]  ;;  %336 = vst.msk [vmem:[#allocation2 + $0xf8] sm:$0xff] %vm304_vm0, %v266_v2  ;;  %337 = vst.msk [vmem:[#allocation2 + $0x100] sm:$0xff] %vm304_vm0, %v267_v3  ;;  %v269_v6 = vld [vmem:[%s5127_s30 + $0x110] sm:$0xff] }
  0x20   : > { %4648 = vmatmul.mubr.msk.f32.gmra.mrb[6].mxu0 %vm304_vm0, %v445_v47  ;;  %v270_v7 = vld [vmem:[%s5127_s30 + $0x118] sm:$0xff]  ;;  %338 = vst.msk [vmem:[#allocation2 + $0x108] sm:$0xff] %vm304_vm0, %v268_v5  ;;  %339 = vst.msk [vmem:[#allocation2 + $0x110] sm:$0xff] %vm304_vm0, %v269_v6  ;;  %v271_v8 = vld [vmem:[%s5127_s30 + $0x120] sm:$0xff] }
  0x21   : > { %4650 = vmatprep.mubr.msk.f32.mxu0 %vm304_vm0, %v446_v49  ;;  %340 = vst.msk [vmem:[#allocation2 + $0x118] sm:$0xff] %vm304_vm0, %v270_v7  ;;  %v272_v9 = vld [vmem:[%s5127_s30 + $0x128] sm:$0xff]  ;;  %v273_v10 = vld [vmem:[%s5127_s30 + $0x130] sm:$0xff]  ;;  %341 = vst.msk [vmem:[#allocation2 + $0x120] sm:$0xff] %vm304_vm0, %v271_v8 }
  0x22   : > { %4748 = vmatmul.mubr.msk.f32.gmra.mrb[6].mxu1 %vm304_vm0, %v5214_v54  ;;  %342 = vst.msk [vmem:[#allocation2 + $0x128] sm:$0xff] %vm304_vm0, %v272_v9  ;;  %343 = vst.msk [vmem:[#allocation2 + $0x130] sm:$0xff] %vm304_vm0, %v273_v10  ;;  %v274_v11 = vld [vmem:[%s5127_s30 + $0x138] sm:$0xff]  ;;  %v275_v12 = vld [vmem:[%s5127_s30 + $0x140] sm:$0xff] }
  0x23   : > { %4750 = vmatprep.mubr.msk.f32.mxu1 %vm304_vm0, %v5220_v56  ;;  %v276_v13 = vld [vmem:[%s5127_s30 + $0x148] sm:$0xff]  ;;  %344 = vst.msk [vmem:[#allocation2 + $0x138] sm:$0xff] %vm304_vm0, %v274_v11  ;;  %345 = vst.msk [vmem:[#allocation2 + $0x140] sm:$0xff] %vm304_vm0, %v275_v12  ;;  %v5272_v14 = vld [vmem:[#allocation2 + $0x59] sm:$0xff] }
  0x24   : > { %4651 = vmatmul.mubr.msk.f32.gmra.mrb[8].mxu0 %vm304_vm0, %v447_v50  ;;  %346 = vst.msk [vmem:[#allocation2 + $0x148] sm:$0xff] %vm304_vm0, %v276_v13  ;;  %v451_v15 = vld [vmem:[#allocation2 + $0x68] sm:$0xff]  ;;  %v452_v17 = vld [vmem:[#allocation2 + $0x70] sm:$0xff]  ;;  %v453_v19 = vld [vmem:[#allocation2 + $0x78] sm:$0xff] }
  0x25   : > { %4653 = vmatprep.mubr.msk.f32.mxu0 %vm304_vm0, %v448_v53  ;;  %v5275_v16 = vld [vmem:[#allocation2 + $0x61] sm:$0xff]  ;;  %v5282_v18 = vld [vmem:[#allocation2 + $0x69] sm:$0xff]  ;;  %v5285_v20 = vld [vmem:[#allocation2 + $0x71] sm:$0xff] }
  0x26   : > { %4751 = vmatmul.mubr.msk.f32.gmra.mrb[8].mxu1 %vm304_vm0, %v5225_v59  ;;  %v454_v21 = vld [vmem:[#allocation2 + $0x80] sm:$0xff]  ;;  %v455_v23 = vld [vmem:[#allocation2 + $0x88] sm:$0xff]  ;;  %v456_v25 = vld [vmem:[#allocation2 + $0x90] sm:$0xff] }
  0x27   : > { %4753 = vmatprep.mubr.msk.f32.mxu1 %vm304_vm0, %v5234_v0  ;;  %v5292_v22 = vld [vmem:[#allocation2 + $0x79] sm:$0xff]  ;;  %v5295_v24 = vld [vmem:[#allocation2 + $0x81] sm:$0xff]  ;;  %v277_v27 = vld [vmem:[%s5127_s30 + $0x150] sm:$0xff] }
  0x28   : > { %4654 = vmatmul.mubr.msk.f32.gmra.mrb[10].mxu0 %vm304_vm0, %v449_v63  ;;  %v457_v26 = vld [vmem:[#allocation2 + $0x98] sm:$0xff]  ;;  %v458_v29 = vld [vmem:[#allocation2 + $0xa0] sm:$0xff]  ;;  %v5304_v30 = vld [vmem:[#allocation2 + $0x89] sm:$0xff]  ;;  %347 = vst.msk [vmem:[#allocation2 + $0x150] sm:$0xff] %vm304_vm0, %v277_v27 }
  0x29   : > { %4656 = vmatprep.mubr.msk.f32.mxu0 %vm304_vm0, %v450_v4  ;;  %v278_v28 = vld [vmem:[%s5127_s30 + $0x158] sm:$0xff]  ;;  %v279_v31 = vld [vmem:[%s5127_s30 + $0x160] sm:$0xff]  ;;  %v280_v33 = vld [vmem:[%s5127_s30 + $0x168] sm:$0xff] }
  0x2a   : > { %4754 = vmatmul.mubr.msk.f32.gmra.mrb[10].mxu1 %vm304_vm0, %v5272_v14  ;;  %348 = vst.msk [vmem:[#allocation2 + $0x158] sm:$0xff] %vm304_vm0, %v278_v28  ;;  %v5310_v32 = vld [vmem:[#allocation2 + $0x91] sm:$0xff]  ;;  %349 = vst.msk [vmem:[#allocation2 + $0x160] sm:$0xff] %vm304_vm0, %v279_v31  ;;  %v5315_v35 = vld [vmem:[#allocation2 + $0x99] sm:$0xff] }
  0x2b   : > { %4756 = vmatprep.mubr.msk.f32.mxu1 %vm304_vm0, %v5275_v16  ;;  %v281_v34 = vld [vmem:[%s5127_s30 + $0x170] sm:$0xff]  ;;  %350 = vst.msk [vmem:[#allocation2 + $0x168] sm:$0xff] %vm304_vm0, %v280_v33  ;;  %v282_v36 = vld [vmem:[%s5127_s30 + $0x178] sm:$0xff]  ;;  %v283_v37 = vld [vmem:[%s5127_s30 + $0x180] sm:$0xff] }
  0x2c   : > { %4657 = vmatmul.mubr.msk.f32.gmra.mrb[12].mxu0 %vm304_vm0, %v451_v15  ;;  %351 = vst.msk [vmem:[#allocation2 + $0x170] sm:$0xff] %vm304_vm0, %v281_v34  ;;  %v284_v38 = vld [vmem:[%s5127_s30 + $0x188] sm:$0xff]  ;;  %352 = vst.msk [vmem:[#allocation2 + $0x178] sm:$0xff] %vm304_vm0, %v282_v36  ;;  %v285_v41 = vld [vmem:[%s5127_s30 + $0x190] sm:$0xff] }
  0x2d   : > { %4659 = vmatprep.mubr.msk.f32.mxu0 %vm304_vm0, %v452_v17  ;;  %v459_v39 = vld [vmem:[#allocation2 + $0xa8] sm:$0xff]  ;;  %353 = vst.msk [vmem:[#allocation2 + $0x180] sm:$0xff] %vm304_vm0, %v283_v37  ;;  %354 = vst.msk [vmem:[#allocation2 + $0x188] sm:$0xff] %vm304_vm0, %v284_v38  ;;  %v286_v42 = vld [vmem:[%s5127_s30 + $0x198] sm:$0xff] }
  0x2e   : > { %4757 = vmatmul.mubr.msk.f32.gmra.mrb[12].mxu1 %vm304_vm0, %v5282_v18  ;;  %v5324_v40 = vld [vmem:[#allocation2 + $0xa1] sm:$0xff]  ;;  %v460_v45 = vld [vmem:[#allocation2 + $0xb0] sm:$0xff]  ;;  %355 = vst.msk [vmem:[#allocation2 + $0x190] sm:$0xff] %vm304_vm0, %v285_v41  ;;  %356 = vst.msk [vmem:[#allocation2 + $0x198] sm:$0xff] %vm304_vm0, %v286_v42 }
  0x2f   : > { %4759 = vmatprep.mubr.msk.f32.mxu1 %vm304_vm0, %v5285_v20  ;;  %v287_v43 = vld [vmem:[%s5127_s30 + $0x1a0] sm:$0xff]  ;;  %v288_v47 = vld [vmem:[%s5127_s30 + $0x1a8] sm:$0xff]  ;;  %v289_v49 = vld [vmem:[%s5127_s30 + $0x1b0] sm:$0xff] }
  0x30   : > { %4660 = vmatmul.mubr.msk.f32.gmra.mrb[14].mxu0 %vm304_vm0, %v453_v19  ;;  %357 = vst.msk [vmem:[#allocation2 + $0x1a0] sm:$0xff] %vm304_vm0, %v287_v43  ;;  %v290_v50 = vld [vmem:[%s5127_s30 + $0x1b8] sm:$0xff]  ;;  %358 = vst.msk [vmem:[#allocation2 + $0x1a8] sm:$0xff] %vm304_vm0, %v288_v47  ;;  %v291_v51 = vld [vmem:[%s5127_s30 + $0x1c0] sm:$0xff] }
  0x31   : > { %4662 = vmatprep.mubr.msk.f32.mxu0 %vm304_vm0, %v454_v21  ;;  %359 = vst.msk [vmem:[#allocation2 + $0x1b0] sm:$0xff] %vm304_vm0, %v289_v49  ;;  %360 = vst.msk [vmem:[#allocation2 + $0x1b8] sm:$0xff] %vm304_vm0, %v290_v50  ;;  %v292_v52 = vld [vmem:[%s5127_s30 + $0x1c8] sm:$0xff]  ;;  %v293_v53 = vld [vmem:[%s5127_s30 + $0x1d0] sm:$0xff]  ;;  %v5069_v50 = vmov 0.0  }
  0x32   : > { %4760 = vmatmul.mubr.msk.f32.gmra.mrb[14].mxu1 %vm304_vm0, %v5292_v22  ;;  %361 = vst.msk [vmem:[#allocation2 + $0x1c0] sm:$0xff] %vm304_vm0, %v291_v51  ;;  %362 = vst.msk [vmem:[#allocation2 + $0x1c8] sm:$0xff] %vm304_vm0, %v292_v52  ;;  %v294_v55 = vld [vmem:[%s5127_s30 + $0x1d8] sm:$0xff]  ;;  %v295_v57 = vld [vmem:[%s5127_s30 + $0x1e0] sm:$0xff] }
  0x33   : > { %4762 = vmatprep.mubr.msk.f32.mxu1 %vm304_vm0, %v5295_v24  ;;  %363 = vst.msk [vmem:[#allocation2 + $0x1d0] sm:$0xff] %vm304_vm0, %v293_v53  ;;  %v296_v58 = vld [vmem:[%s5127_s30 + $0x1e8] sm:$0xff]  ;;  %364 = vst.msk [vmem:[#allocation2 + $0x1d8] sm:$0xff] %vm304_vm0, %v294_v55  ;;  %v461_v61 = vld [vmem:[#allocation2 + $0xb8] sm:$0xff] }
  0x34   : > { %4663 = vmatmul.mubr.msk.f32.gmra.mrb[16].mxu0 %vm304_vm0, %v455_v23  ;;  %365 = vst.msk [vmem:[#allocation2 + $0x1e0] sm:$0xff] %vm304_vm0, %v295_v57  ;;  %366 = vst.msk [vmem:[#allocation2 + $0x1e8] sm:$0xff] %vm304_vm0, %v296_v58  ;;  %v5362_v60 = vld [vmem:[#allocation2 + $0xa9] sm:$0xff]  ;;  %v5365_v62 = vld [vmem:[#allocation2 + $0xb1] sm:$0xff] }
  0x35   : > { %4665 = vmatprep.mubr.msk.f32.mxu0 %vm304_vm0, %v456_v25  ;;  %v462_v63 = vld [vmem:[#allocation2 + $0xc0] sm:$0xff]  ;;  %v463_v2 = vld [vmem:[#allocation2 + $0xc8] sm:$0xff]  ;;  %v464_v4 = vld [vmem:[#allocation2 + $0xd0] sm:$0xff]  ;;  %375 = vst.msk [vmem:[#allocation3 + $0x8] sm:$0xff] %vm304_vm0, %v5069_v50 }
  0x36   : > { %4763 = vmatmul.mubr.msk.f32.gmra.mrb[16].mxu1 %vm304_vm0, %v5304_v30  ;;  %v5372_v1 = vld [vmem:[#allocation2 + $0xb9] sm:$0xff]  ;;  %v5375_v3 = vld [vmem:[#allocation2 + $0xc1] sm:$0xff]  ;;  %v5382_v5 = vld [vmem:[#allocation2 + $0xc9] sm:$0xff]  ;;  %374 = vst.msk [vmem:[#allocation3] sm:$0xff] %vm304_vm0, %v5069_v50 }
  0x37   : > { %4765 = vmatprep.mubr.msk.f32.mxu1 %vm304_vm0, %v5310_v32  ;;  %v465_v6 = vld [vmem:[#allocation2 + $0xd8] sm:$0xff]  ;;  %v466_v8 = vld [vmem:[#allocation2 + $0xe0] sm:$0xff]  ;;  %v297_v9 = vld [vmem:[%s5127_s30 + $0x1f0] sm:$0xff]  ;;  %376 = vst.msk [vmem:[#allocation3 + $0x10] sm:$0xff] %vm304_vm0, %v5069_v50 }
  0x38   : > { %4666 = vmatmul.mubr.msk.f32.gmra.mrb[18].mxu0 %vm304_vm0, %v457_v26  ;;  %v5385_v7 = vld [vmem:[#allocation2 + $0xd1] sm:$0xff]  ;;  %v5394_v11 = vld [vmem:[#allocation2 + $0xd9] sm:$0xff]  ;;  %367 = vst.msk [vmem:[#allocation2 + $0x1f0] sm:$0xff] %vm304_vm0, %v297_v9  ;;  %v467_v12 = vld [vmem:[#allocation2 + $0xe8] sm:$0xff] }
  0x39   : > { %4668 = vmatprep.mubr.msk.f32.mxu0 %vm304_vm0, %v458_v29  ;;  %v298_v10 = vld [vmem:[%s5127_s30 + $0x1f8] sm:$0xff]  ;;  %v5399_v13 = vld [vmem:[#allocation2 + $0xe1] sm:$0xff]  ;;  %v468_v17 = vld [vmem:[#allocation2 + $0xf0] sm:$0xff]  ;;  %377 = vst.msk [vmem:[#allocation3 + $0x18] sm:$0xff] %vm304_vm0, %v5069_v50 }
  0x3a   : > { %4766 = vmatmul.mubr.msk.f32.gmra.mrb[18].mxu1 %vm304_vm0, %v5315_v35  ;;  %368 = vst.msk [vmem:[#allocation2 + $0x1f8] sm:$0xff] %vm304_vm0, %v298_v10  ;;  %v299_v15 = vld [vmem:[%s5127_s30 + $0x200] sm:$0xff]  ;;  %v5408_v19 = vld [vmem:[#allocation2 + $0xe9] sm:$0xff]  ;;  %v469_v21 = vld [vmem:[#allocation2 + $0xf8] sm:$0xff] }
  0x3b   : > { %4768 = vmatprep.mubr.msk.f32.mxu1 %vm304_vm0, %v5324_v40  ;;  %369 = vst.msk [vmem:[#allocation2 + $0x200] sm:$0xff] %vm304_vm0, %v299_v15  ;;  %v5411_v23 = vld [vmem:[#allocation2 + $0xf1] sm:$0xff]  ;;  %v470_v25 = vld [vmem:[#allocation2 + $0x100] sm:$0xff]  ;;  %v471_v27 = vld [vmem:[#allocation2 + $0x108] sm:$0xff] }
  0x3c   : > { %4669 = vmatmul.mubr.msk.f32.gmra.mrb[20].mxu0 %vm304_vm0, %v459_v39  ;;  %v5418_v26 = vld [vmem:[#allocation2 + $0xf9] sm:$0xff]  ;;  %v5421_v28 = vld [vmem:[#allocation2 + $0x101] sm:$0xff]  ;;  %v472_v29 = vld [vmem:[#allocation2 + $0x110] sm:$0xff]  ;;  %378 = vst.msk [vmem:[#allocation3 + $0x20] sm:$0xff] %vm304_vm0, %v5069_v50 }
  0x3d   : > { %4671 = vmatprep.mubr.msk.f32.mxu0 %vm304_vm0, %v460_v45  ;;  %v5428_v31 = vld [vmem:[#allocation2 + $0x109] sm:$0xff]  ;;  %v473_v33 = vld [vmem:[#allocation2 + $0x118] sm:$0xff]  ;;  %v474_v36 = vld [vmem:[#allocation2 + $0x120] sm:$0xff]  ;;  %379 = vst.msk [vmem:[#allocation3 + $0x28] sm:$0xff] %vm304_vm0, %v5069_v50 }
  0x3e   : > { %4769 = vmatmul.mubr.msk.f32.gmra.mrb[20].mxu1 %vm304_vm0, %v5362_v60  ;;  %v5431_v34 = vld [vmem:[#allocation2 + $0x111] sm:$0xff]  ;;  %v5438_v37 = vld [vmem:[#allocation2 + $0x119] sm:$0xff]  ;;  %v475_v38 = vld [vmem:[#allocation2 + $0x128] sm:$0xff]  ;;  %380 = vst.msk [vmem:[#allocation3 + $0x30] sm:$0xff] %vm304_vm0, %v5069_v50 }
  0x3f   : > { %4771 = vmatprep.mubr.msk.f32.mxu1 %vm304_vm0, %v5365_v62  ;;  %v5441_v39 = vld [vmem:[#allocation2 + $0x121] sm:$0xff]  ;;  %v476_v41 = vld [vmem:[#allocation2 + $0x130] sm:$0xff]  ;;  %v477_v43 = vld [vmem:[#allocation2 + $0x138] sm:$0xff]  ;;  %381 = vst.msk [vmem:[#allocation3 + $0x38] sm:$0xff] %vm304_vm0, %v5069_v50 }
  0x40   : > { %4672 = vmatmul.mubr.msk.f32.gmra.mrb[22].mxu0 %vm304_vm0, %v461_v61  ;;  %v5448_v42 = vld [vmem:[#allocation2 + $0x129] sm:$0xff]  ;;  %v5451_v45 = vld [vmem:[#allocation2 + $0x131] sm:$0xff]  ;;  %v5453_v47 = vld [vmem:[#allocation2 + $0x140] sm:$0xff]  ;;  %382 = vst.msk [vmem:[#allocation3 + $0x40] sm:$0xff] %vm304_vm0, %v5069_v50 }
  0x41   : > { %4674 = vmatprep.mubr.msk.f32.mxu0 %vm304_vm0, %v462_v63  ;;  %v5460_v49 = vld [vmem:[#allocation2 + $0x139] sm:$0xff]  ;;  %383 = vst.msk [vmem:[#allocation3 + $0x48] sm:$0xff] %vm304_vm0, %v5069_v50  ;;  %384 = vst.msk [vmem:[#allocation3 + $0x50] sm:$0xff] %vm304_vm0, %v5069_v50  ;;  %v479_v51 = vld [vmem:[#allocation2 + $0x148] sm:$0xff] }
  0x42   : > { %4772 = vmatmul.mubr.msk.f32.gmra.mrb[22].mxu1 %vm304_vm0, %v5372_v1  ;;  %385 = vst.msk [vmem:[#allocation3 + $0x58] sm:$0xff] %vm304_vm0, %v5069_v50  ;;  %386 = vst.msk [vmem:[#allocation3 + $0x60] sm:$0xff] %vm304_vm0, %v5069_v50  ;;  %v5592_v52 = vld [vmem:[#allocation2 + $0x141] sm:$0xff]  ;;  %v480_v53 = vld [vmem:[#allocation2 + $0x150] sm:$0xff] }
  0x43   : > { %4774 = vmatprep.mubr.msk.f32.mxu1 %vm304_vm0, %v5375_v3  ;;  %387 = vst.msk [vmem:[#allocation3 + $0x68] sm:$0xff] %vm304_vm0, %v5069_v50  ;;  %388 = vst.msk [vmem:[#allocation3 + $0x70] sm:$0xff] %vm304_vm0, %v5069_v50  ;;  %v5599_v55 = vld [vmem:[#allocation2 + $0x149] sm:$0xff]  ;;  %v481_v57 = vld [vmem:[#allocation2 + $0x158] sm:$0xff] }
  0x44   : > { %4675 = vmatmul.mubr.msk.f32.gmra.mrb[24].mxu0 %vm304_vm0, %v463_v2  ;;  %389 = vst.msk [vmem:[#allocation3 + $0x78] sm:$0xff] %vm304_vm0, %v5069_v50  ;;  %390 = vst.msk [vmem:[#allocation3 + $0x80] sm:$0xff] %vm304_vm0, %v5069_v50  ;;  %v5602_v58 = vld [vmem:[#allocation2 + $0x151] sm:$0xff]  ;;  %v482_v61 = vld [vmem:[#allocation2 + $0x160] sm:$0xff] }
  0x45   : > { %4677 = vmatprep.mubr.msk.f32.mxu0 %vm304_vm0, %v464_v4  ;;  %391 = vst.msk [vmem:[#allocation3 + $0x88] sm:$0xff] %vm304_vm0, %v5069_v50  ;;  %392 = vst.msk [vmem:[#allocation3 + $0x90] sm:$0xff] %vm304_vm0, %v5069_v50  ;;  %v5609_v63 = vld [vmem:[#allocation2 + $0x159] sm:$0xff]  ;;  %v483_v2 = vld [vmem:[#allocation2 + $0x168] sm:$0xff] }
  0x46   : > { %4775 = vmatmul.mubr.msk.f32.gmra.mrb[24].mxu1 %vm304_vm0, %v5382_v5  ;;  %393 = vst.msk [vmem:[#allocation3 + $0x98] sm:$0xff] %vm304_vm0, %v5069_v50  ;;  %394 = vst.msk [vmem:[#allocation3 + $0xa0] sm:$0xff] %vm304_vm0, %v5069_v50  ;;  %v5612_v4 = vld [vmem:[#allocation2 + $0x161] sm:$0xff]  ;;  %v485_v9 = vld [vmem:[#allocation2 + $0x178] sm:$0xff] }
  0x47   : > { %4777 = vmatprep.mubr.msk.f32.mxu1 %vm304_vm0, %v5385_v7  ;;  %395 = vst.msk [vmem:[#allocation3 + $0xa8] sm:$0xff] %vm304_vm0, %v5069_v50  ;;  %396 = vst.msk [vmem:[#allocation3 + $0xb0] sm:$0xff] %vm304_vm0, %v5069_v50  ;;  %v5622_v10 = vld [vmem:[#allocation2 + $0x171] sm:$0xff]  ;;  %v5629_v15 = vld [vmem:[#allocation2 + $0x179] sm:$0xff] }
  0x48   : > { %4678 = vmatmul.mubr.msk.f32.gmra.mrb[26].mxu0 %vm304_vm0, %v465_v6  ;;  %397 = vst.msk [vmem:[#allocation3 + $0xb8] sm:$0xff] %vm304_vm0, %v5069_v50  ;;  %398 = vst.msk [vmem:[#allocation3 + $0xc0] sm:$0xff] %vm304_vm0, %v5069_v50  ;;  %v484_v6 = vld [vmem:[#allocation2 + $0x170] sm:$0xff] }
  0x49   : > { %4680 = vmatprep.mubr.msk.f32.mxu0 %vm304_vm0, %v466_v8  ;;  %399 = vst.msk [vmem:[#allocation3 + $0xc8] sm:$0xff] %vm304_vm0, %v5069_v50  ;;  %400 = vst.msk [vmem:[#allocation3 + $0xd0] sm:$0xff] %vm304_vm0, %v5069_v50  ;;  %v5619_v8 = vld [vmem:[#allocation2 + $0x169] sm:$0xff] }
  0x4a   : > { %4778 = vmatmul.mubr.msk.f32.gmra.mrb[26].mxu1 %vm304_vm0, %v5394_v11  ;;  %401 = vst.msk [vmem:[#allocation3 + $0xd8] sm:$0xff] %vm304_vm0, %v5069_v50  ;;  %402 = vst.msk [vmem:[#allocation3 + $0xe0] sm:$0xff] %vm304_vm0, %v5069_v50 }
  0x4b   : > { %4780 = vmatprep.mubr.msk.f32.mxu1 %vm304_vm0, %v5399_v13  ;;  %403 = vst.msk [vmem:[#allocation3 + $0xe8] sm:$0xff] %vm304_vm0, %v5069_v50  ;;  %404 = vst.msk [vmem:[#allocation3 + $0xf0] sm:$0xff] %vm304_vm0, %v5069_v50 }
  0x4c   : > { %4681 = vmatmul.mubr.msk.f32.gmra.mrb[28].mxu0 %vm304_vm0, %v467_v12  ;;  %405 = vst.msk [vmem:[#allocation3 + $0xf8] sm:$0xff] %vm304_vm0, %v5069_v50  ;;  %406 = vst.msk [vmem:[#allocation3 + $0x100] sm:$0xff] %vm304_vm0, %v5069_v50  ;;  %v486_v12 = vld [vmem:[#allocation2 + $0x180] sm:$0xff] }
  0x4d   : > { %4683 = vmatprep.mubr.msk.f32.mxu0 %vm304_vm0, %v468_v17  ;;  %407 = vst.msk [vmem:[#allocation3 + $0x108] sm:$0xff] %vm304_vm0, %v5069_v50  ;;  %408 = vst.msk [vmem:[#allocation3 + $0x110] sm:$0xff] %vm304_vm0, %v5069_v50  ;;  %v487_v17 = vld [vmem:[#allocation2 + $0x188] sm:$0xff] }
  0x4e   : > { %4781 = vmatmul.mubr.msk.f32.gmra.mrb[28].mxu1 %vm304_vm0, %v5408_v19  ;;  %409 = vst.msk [vmem:[#allocation3 + $0x118] sm:$0xff] %vm304_vm0, %v5069_v50  ;;  %410 = vst.msk [vmem:[#allocation3 + $0x120] sm:$0xff] %vm304_vm0, %v5069_v50 }
  0x4f   : > { %4783 = vmatprep.mubr.msk.f32.mxu1 %vm304_vm0, %v5411_v23  ;;  %411 = vst.msk [vmem:[#allocation3 + $0x128] sm:$0xff] %vm304_vm0, %v5069_v50  ;;  %412 = vst.msk [vmem:[#allocation3 + $0x130] sm:$0xff] %vm304_vm0, %v5069_v50 }
  0x50   : > { %4684 = vmatmul.mubr.msk.f32.gmra.mrb[30].mxu0 %vm304_vm0, %v469_v21  ;;  %413 = vst.msk [vmem:[#allocation3 + $0x138] sm:$0xff] %vm304_vm0, %v5069_v50  ;;  %414 = vst.msk [vmem:[#allocation3 + $0x140] sm:$0xff] %vm304_vm0, %v5069_v50  ;;  %v5632_v21 = vld [vmem:[#allocation2 + $0x181] sm:$0xff] }
  0x51   : > { %4686 = vmatprep.mubr.msk.f32.mxu0 %vm304_vm0, %v470_v25  ;;  %415 = vst.msk [vmem:[#allocation3 + $0x148] sm:$0xff] %vm304_vm0, %v5069_v50  ;;  %416 = vst.msk [vmem:[#allocation3 + $0x150] sm:$0xff] %vm304_vm0, %v5069_v50  ;;  %v488_v25 = vld [vmem:[#allocation2 + $0x190] sm:$0xff] }
  0x52   : > { %4784 = vmatmul.mubr.msk.f32.gmra.mrb[30].mxu1 %vm304_vm0, %v5418_v26  ;;  %417 = vst.msk [vmem:[#allocation3 + $0x158] sm:$0xff] %vm304_vm0, %v5069_v50  ;;  %418 = vst.msk [vmem:[#allocation3 + $0x160] sm:$0xff] %vm304_vm0, %v5069_v50 }
  0x53   : > { %4786 = vmatprep.mubr.msk.f32.mxu1 %vm304_vm0, %v5421_v28  ;;  %419 = vst.msk [vmem:[#allocation3 + $0x168] sm:$0xff] %vm304_vm0, %v5069_v50  ;;  %420 = vst.msk [vmem:[#allocation3 + $0x170] sm:$0xff] %vm304_vm0, %v5069_v50 }
  0x54   : > { %4687 = vmatmul.mubr.msk.f32.gmra.mrb[32].mxu0 %vm304_vm0, %v471_v27  ;;  %421 = vst.msk [vmem:[#allocation3 + $0x178] sm:$0xff] %vm304_vm0, %v5069_v50  ;;  %422 = vst.msk [vmem:[#allocation3 + $0x180] sm:$0xff] %vm304_vm0, %v5069_v50  ;;  %v5639_v27 = vld [vmem:[#allocation2 + $0x189] sm:$0xff] }
  0x55   : > { %4689 = vmatprep.mubr.msk.f32.mxu0 %vm304_vm0, %v472_v29  ;;  %423 = vst.msk [vmem:[#allocation3 + $0x188] sm:$0xff] %vm304_vm0, %v5069_v50  ;;  %424 = vst.msk [vmem:[#allocation3 + $0x190] sm:$0xff] %vm304_vm0, %v5069_v50  ;;  %v489_v29 = vld [vmem:[#allocation2 + $0x198] sm:$0xff] }
  0x56   : > { %4787 = vmatmul.mubr.msk.f32.gmra.mrb[32].mxu1 %vm304_vm0, %v5428_v31  ;;  %425 = vst.msk [vmem:[#allocation3 + $0x198] sm:$0xff] %vm304_vm0, %v5069_v50  ;;  %426 = vst.msk [vmem:[#allocation3 + $0x1a0] sm:$0xff] %vm304_vm0, %v5069_v50 }
  0x57   : > { %4789 = vmatprep.mubr.msk.f32.mxu1 %vm304_vm0, %v5431_v34  ;;  %427 = vst.msk [vmem:[#allocation3 + $0x1a8] sm:$0xff] %vm304_vm0, %v5069_v50  ;;  %428 = vst.msk [vmem:[#allocation3 + $0x1b0] sm:$0xff] %vm304_vm0, %v5069_v50 }
  0x58   : > { %4690 = vmatmul.mubr.msk.f32.gmra.mrb[34].mxu0 %vm304_vm0, %v473_v33  ;;  %429 = vst.msk [vmem:[#allocation3 + $0x1b8] sm:$0xff] %vm304_vm0, %v5069_v50  ;;  %430 = vst.msk [vmem:[#allocation3 + $0x1c0] sm:$0xff] %vm304_vm0, %v5069_v50  ;;  %v5642_v33 = vld [vmem:[#allocation2 + $0x191] sm:$0xff] }
  0x59   : > { %4692 = vmatprep.mubr.msk.f32.mxu0 %vm304_vm0, %v474_v36  ;;  %431 = vst.msk [vmem:[#allocation3 + $0x1c8] sm:$0xff] %vm304_vm0, %v5069_v50  ;;  %432 = vst.msk [vmem:[#allocation3 + $0x1d0] sm:$0xff] %vm304_vm0, %v5069_v50  ;;  %v490_v36 = vld [vmem:[#allocation2 + $0x1a0] sm:$0xff] }
  0x5a   : > { %4790 = vmatmul.mubr.msk.f32.gmra.mrb[34].mxu1 %vm304_vm0, %v5438_v37  ;;  %433 = vst.msk [vmem:[#allocation3 + $0x1d8] sm:$0xff] %vm304_vm0, %v5069_v50  ;;  %434 = vst.msk [vmem:[#allocation3 + $0x1e0] sm:$0xff] %vm304_vm0, %v5069_v50 }
  0x5b   : > { %4792 = vmatprep.mubr.msk.f32.mxu1 %vm304_vm0, %v5441_v39  ;;  %435 = vst.msk [vmem:[#allocation3 + $0x1e8] sm:$0xff] %vm304_vm0, %v5069_v50  ;;  %436 = vst.msk [vmem:[#allocation3 + $0x1f0] sm:$0xff] %vm304_vm0, %v5069_v50 }
  0x5c   : > { %4693 = vmatmul.mubr.msk.f32.gmra.mrb[36].mxu0 %vm304_vm0, %v475_v38  ;;  %437 = vst.msk [vmem:[#allocation3 + $0x1f8] sm:$0xff] %vm304_vm0, %v5069_v50  ;;  %v5649_v38 = vld [vmem:[#allocation2 + $0x199] sm:$0xff]  ;;  %v5659_v50 = vld [vmem:[#allocation2 + $0x1a9] sm:$0xff] }
  0x5d   : > { %4695 = vmatprep.mubr.msk.f32.mxu0 %vm304_vm0, %v476_v41  ;;  %v491_v41 = vld [vmem:[#allocation2 + $0x1a8] sm:$0xff] }
  0x5e   : > { %4793 = vmatmul.mubr.msk.f32.gmra.mrb[36].mxu1 %vm304_vm0, %v5448_v42 }
  0x5f   : > { %4795 = vmatprep.mubr.msk.f32.mxu1 %vm304_vm0, %v5451_v45 }
  0x60   : > { %4696 = vmatmul.mubr.msk.f32.gmra.mrb[38].mxu0 %vm304_vm0, %v477_v43  ;;  %v5652_v43 = vld [vmem:[#allocation2 + $0x1a1] sm:$0xff] }
  0x61   : > { %4698 = vmatprep.mubr.msk.f32.mxu0 %vm304_vm0, %v5453_v47  ;;  %v492_v47 = vld [vmem:[#allocation2 + $0x1b0] sm:$0xff] }
  0x62   : > { %4796 = vmatmul.mubr.msk.f32.gmra.mrb[38].mxu1 %vm304_vm0, %v5460_v49 }
  0x63   : > { %4798 = vmatprep.mubr.msk.f32.mxu1 %vm304_vm0, %v5592_v52 }
  0x64   : > { %4699 = vmatmul.mubr.msk.f32.gmra.mrb[40].mxu0 %vm304_vm0, %v479_v51  ;;  %v493_v51 = vld [vmem:[#allocation2 + $0x1b8] sm:$0xff] }
  0x65   : > { %4701 = vmatprep.mubr.msk.f32.mxu0 %vm304_vm0, %v480_v53  ;;  %v5662_v53 = vld [vmem:[#allocation2 + $0x1b1] sm:$0xff] }
  0x66   : > { %4799 = vmatmul.mubr.msk.f32.gmra.mrb[40].mxu1 %vm304_vm0, %v5599_v55 }
  0x67   : > { %4801 = vmatprep.mubr.msk.f32.mxu1 %vm304_vm0, %v5602_v58 }
  0x68   : > { %4702 = vmatmul.mubr.msk.f32.gmra.mrb[42].mxu0 %vm304_vm0, %v481_v57  ;;  %v494_v57 = vld [vmem:[#allocation2 + $0x1c0] sm:$0xff] }
  0x69   : > { %4704 = vmatprep.mubr.msk.f32.mxu0 %vm304_vm0, %v482_v61  ;;  %v5669_v61 = vld [vmem:[#allocation2 + $0x1b9] sm:$0xff] }
  0x6a   : > { %4802 = vmatmul.mubr.msk.f32.gmra.mrb[42].mxu1 %vm304_vm0, %v5609_v63 }
  0x6b   : > { %4804 = vmatprep.mubr.msk.f32.mxu1 %vm304_vm0, %v5612_v4 }
  0x6c   : > { %4705 = vmatmul.mubr.msk.f32.gmra.mrb[44].mxu0 %vm304_vm0, %v483_v2  ;;  %v495_v2 = vld [vmem:[#allocation2 + $0x1c8] sm:$0xff] }
  0x6d   : > { %4707 = vmatprep.mubr.msk.f32.mxu0 %vm304_vm0, %v484_v6  ;;  %v5672_v6 = vld [vmem:[#allocation2 + $0x1c1] sm:$0xff] }
  0x6e   : > { %4805 = vmatmul.mubr.msk.f32.gmra.mrb[44].mxu1 %vm304_vm0, %v5619_v8 }
  0x6f   : > { %4807 = vmatprep.mubr.msk.f32.mxu1 %vm304_vm0, %v5622_v10 }
  0x70   : > { %4708 = vmatmul.mubr.msk.f32.gmra.mrb[46].mxu0 %vm304_vm0, %v485_v9  ;;  %v496_v9 = vld [vmem:[#allocation2 + $0x1d0] sm:$0xff] }
  0x71   : > { %4710 = vmatprep.mubr.msk.f32.mxu0 %vm304_vm0, %v486_v12  ;;  %v300_v12 = vld [vmem:[%s5127_s30 + $0x208] sm:$0xff] }
  0x72   : > { %4808 = vmatmul.mubr.msk.f32.gmra.mrb[46].mxu1 %vm304_vm0, %v5629_v15  ;;  %370 = vst.msk [vmem:[#allocation2 + $0x208] sm:$0xff] %vm304_vm0, %v300_v12  ;;  %v500_v12 = vld [vmem:[#allocation2 + $0x1f0] sm:$0xff] }
  0x73   : > { %4810 = vmatprep.mubr.msk.f32.mxu1 %vm304_vm0, %v5632_v21 }
  0x74   : > { %4711 = vmatmul.mubr.msk.f32.gmra.mrb[48].mxu0 %vm304_vm0, %v487_v17  ;;  %v301_v17 = vld [vmem:[%s5127_s30 + $0x210] sm:$0xff] }
  0x75   : > { %4713 = vmatprep.mubr.msk.f32.mxu0 %vm304_vm0, %v488_v25  ;;  %v5682_v25 = vld [vmem:[#allocation2 + $0x1c9] sm:$0xff]  ;;  %371 = vst.msk [vmem:[#allocation2 + $0x210] sm:$0xff] %vm304_vm0, %v301_v17 }
  0x76   : > { %4811 = vmatmul.mubr.msk.f32.gmra.mrb[48].mxu1 %vm304_vm0, %v5639_v27  ;;  %v5707_v17 = vld [vmem:[#allocation2 + $0x1e9] sm:$0xff] }
  0x77   : > { %4813 = vmatprep.mubr.msk.f32.mxu1 %vm304_vm0, %v5642_v33 }
  0x78   : > { %4714 = vmatmul.mubr.msk.f32.gmra.mrb[50].mxu0 %vm304_vm0, %v489_v29  ;;  %v497_v29 = vld [vmem:[#allocation2 + $0x1d8] sm:$0xff] }
  0x79   : > { %4716 = vmatprep.mubr.msk.f32.mxu0 %vm304_vm0, %v490_v36  ;;  %v5686_v36 = vld [vmem:[#allocation2 + $0x1d1] sm:$0xff] }
  0x7a   : > { %4814 = vmatmul.mubr.msk.f32.gmra.mrb[50].mxu1 %vm304_vm0, %v5649_v38 }
  0x7b   : > { %4816 = vmatprep.mubr.msk.f32.mxu1 %vm304_vm0, %v5652_v43 }
  0x7c   : > { %4717 = vmatmul.mubr.msk.f32.gmra.mrb[52].mxu0 %vm304_vm0, %v491_v41  ;;  %v498_v41 = vld [vmem:[#allocation2 + $0x1e0] sm:$0xff] }
  0x7d   : > { %4719 = vmatprep.mubr.msk.f32.mxu0 %vm304_vm0, %v492_v47  ;;  %v302_v47 = vld [vmem:[%s5127_s30 + $0x218] sm:$0xff] }
  0x7e   : > { %4817 = vmatmul.mubr.msk.f32.gmra.mrb[52].mxu1 %vm304_vm0, %v5659_v50  ;;  %372 = vst.msk [vmem:[#allocation2 + $0x218] sm:$0xff] %vm304_vm0, %v302_v47  ;;  %v5710_v47 = vld [vmem:[#allocation2 + $0x1f1] sm:$0xff] }
  0x7f   : > { %4819 = vmatprep.mubr.msk.f32.mxu1 %vm304_vm0, %v5662_v53 }
  0x80   : > { %4720 = vmatmul.mubr.msk.f32.gmra.mrb[54].mxu0 %vm304_vm0, %v493_v51  ;;  %v303_v51 = vld [vmem:[%s5127_s30 + $0x220] sm:$0xff] }
  0x81   : > { %4722 = vmatprep.mubr.msk.f32.mxu0 %vm304_vm0, %v494_v57  ;;  %v5696_v57 = vld [vmem:[#allocation2 + $0x1d9] sm:$0xff]  ;;  %373 = vst.msk [vmem:[#allocation2 + $0x220] sm:$0xff] %vm304_vm0, %v303_v51  ;;  %v2945_v51 = vld [vmem:[#allocation2 + $0x22] sm:$0xff] }
  0x82   : > { %4820 = vmatmul.mubr.msk.f32.gmra.mrb[54].mxu1 %vm304_vm0, %v5669_v61 }
  0x83   : > { %4822 = vmatprep.mubr.msk.f32.mxu1 %vm304_vm0, %v5672_v6 }
  0x84   : > { %4723 = vmatmul.mubr.msk.f32.gmra.mrb[56].mxu0 %vm304_vm0, %v495_v2  ;;  %v499_v2 = vld [vmem:[#allocation2 + $0x1e8] sm:$0xff] }
  0x85   : > { %4725 = vmatprep.mubr.msk.f32.mxu0 %vm304_vm0, %v496_v9  ;;  %v5700_v9 = vld [vmem:[#allocation2 + $0x1e1] sm:$0xff] }
  0x86   : > { %4823 = vmatmul.mubr.msk.f32.gmra.mrb[56].mxu1 %vm304_vm0, %v5682_v25 }
  0x87   : > { %4825 = vmatprep.mubr.msk.f32.mxu1 %vm304_vm0, %v5686_v36 }
  0x88   : > { %4726 = vmatmul.mubr.msk.f32.gmra.mrb[58].mxu0 %vm304_vm0, %v497_v29  ;;  %v501_v29 = vld [vmem:[#allocation2 + $0x1f8] sm:$0xff] }
  0x89   : > { %4728 = vmatprep.mubr.msk.f32.mxu0 %vm304_vm0, %v498_v41  ;;  %v5717_v41 = vld [vmem:[#allocation2 + $0x1f9] sm:$0xff] }
  0x8a   : > { %4826 = vmatmul.mubr.msk.f32.gmra.mrb[58].mxu1 %vm304_vm0, %v5696_v57 }
  0x8b   : > { %4828 = vmatprep.mubr.msk.f32.mxu1 %vm304_vm0, %v5700_v9 }
  0x8c   : > { %4729 = vmatmul.mubr.msk.f32.gmra.mrb[60].mxu0 %vm304_vm0, %v499_v2  ;;  %v2946_v2 = vld [vmem:[#allocation2 + $0x2a] sm:$0xff] }
  0x8d   : > { %4731 = vmatprep.mubr.msk.f32.mxu0 %vm304_vm0, %v500_v12  ;;  %v2947_v12 = vld [vmem:[#allocation2 + $0x32] sm:$0xff] }
  0x8e   : > { %4829 = vmatmul.mubr.msk.f32.gmra.mrb[60].mxu1 %vm304_vm0, %v5707_v17 }
  0x8f   : > { %4831 = vmatprep.mubr.msk.f32.mxu1 %vm304_vm0, %v5710_v47 }
  0x90   : > { %4732 = vmatmul.mubr.msk.f32.gmra.mrb[62].mxu0 %vm304_vm0, %v501_v29  ;;  %v2949_v29 = vld [vmem:[#allocation2 + $0x42] sm:$0xff] }
  0x91   : > { %4838 = vmatprep.mubr.msk.f32.mxu0 %vm304_vm0, %v5196_v44  ;;  %v2948_v44 = vld [vmem:[#allocation2 + $0x3a] sm:$0xff] }
  0x92   : > { %4832 = vmatmul.mubr.msk.f32.gmra.mrb[62].mxu1 %vm304_vm0, %v5717_v41 }
  0x93   : > { %4938 = vmatprep.mubr.msk.f32.mxu1 %vm304_vm0, %v2945_v51  ;;  %v502_v51 = vld [vmem:[#allocation3] sm:$0xff] }
  0x94   : > { %4839 = vmatmul.mubr.msk.f32.vlgmr.msra.gmra.mrb[64].mxu0 %vm304_vm0, %v5202_v46  ;;  %v2950_v46 = vld [vmem:[#allocation2 + $0x4a] sm:$0xff] }
  0x95   : > { %4841 = vmatprep.mubr.msk.f32.mxu0 %vm304_vm0, %v5205_v48  ;;  %v2951_v48 = vld [vmem:[#allocation2 + $0x52] sm:$0xff] }
  0x96   : > { %4939 = vmatmul.mubr.msk.f32.vlgmr.msra.gmra.mrb[64].mxu1 %vm304_vm0, %v2946_v2 }
  0x97   : > { %4941 = vmatprep.mubr.msk.f32.mxu1 %vm304_vm0, %v2947_v12 }
  0x98   : > { %4842 = vmatmul.mubr.msk.f32.gmra.mrb[66].mxu0 %vm304_vm0, %v5214_v54  ;;  %v2952_v54 = vld [vmem:[#allocation2 + $0x5a] sm:$0xff] }
  0x99   : > { %4844 = vmatprep.mubr.msk.f32.mxu0 %vm304_vm0, %v5220_v56  ;;  %v2953_v56 = vld [vmem:[#allocation2 + $0x62] sm:$0xff] }
  0x9a   : > { %4942 = vmatmul.mubr.msk.f32.gmra.mrb[66].mxu1 %vm304_vm0, %v2948_v44 }
  0x9b   : > { %4944 = vmatprep.mubr.msk.f32.mxu1 %vm304_vm0, %v2949_v29  ;;  %v505_v29 = vld [vmem:[#allocation3 + $0x18] sm:$0xff] }
  0x9c   : > { %4845 = vmatmul.mubr.msk.f32.gmra.mrb[68].mxu0 %vm304_vm0, %v5225_v59  ;;  %v2954_v59 = vld [vmem:[#allocation2 + $0x6a] sm:$0xff] }
  0x9d   : > { %4847 = vmatprep.mubr.msk.f32.mxu0 %vm304_vm0, %v5234_v0  ;;  %v2955_v0 = vld [vmem:[#allocation2 + $0x72] sm:$0xff] }
  0x9e   : > { %4945 = vmatmul.mubr.msk.f32.gmra.mrb[68].mxu1 %vm304_vm0, %v2950_v46  ;;  %v2989_v46 = vld [vmem:[#allocation2 + $0x182] sm:$0xff] }
  0x9f   : > { %4947 = vmatprep.mubr.msk.f32.mxu1 %vm304_vm0, %v2951_v48 }
  0xa0   : > { %4848 = vmatmul.mubr.msk.f32.gmra.mrb[70].mxu0 %vm304_vm0, %v5272_v14  ;;  %v2956_v14 = vld [vmem:[#allocation2 + $0x7a] sm:$0xff] }
  0xa1   : > { %4850 = vmatprep.mubr.msk.f32.mxu0 %vm304_vm0, %v5275_v16  ;;  %v2957_v16 = vld [vmem:[#allocation2 + $0x82] sm:$0xff] }
  0xa2   : > { %4948 = vmatmul.mubr.msk.f32.gmra.mrb[70].mxu1 %vm304_vm0, %v2952_v54 }
  0xa3   : > { %4950 = vmatprep.mubr.msk.f32.mxu1 %vm304_vm0, %v2953_v56 }
  0xa4   : > { %4851 = vmatmul.mubr.msk.f32.gmra.mrb[72].mxu0 %vm304_vm0, %v5282_v18  ;;  %v2958_v18 = vld [vmem:[#allocation2 + $0x8a] sm:$0xff] }
  0xa5   : > { %4853 = vmatprep.mubr.msk.f32.mxu0 %vm304_vm0, %v5285_v20  ;;  %v2959_v20 = vld [vmem:[#allocation2 + $0x92] sm:$0xff] }
  0xa6   : > { %4951 = vmatmul.mubr.msk.f32.gmra.mrb[72].mxu1 %vm304_vm0, %v2954_v59 }
  0xa7   : > { %4953 = vmatprep.mubr.msk.f32.mxu1 %vm304_vm0, %v2955_v0  ;;  %v2990_v0 = vld [vmem:[#allocation2 + $0x18a] sm:$0xff] }
  0xa8   : > { %4854 = vmatmul.mubr.msk.f32.gmra.mrb[74].mxu0 %vm304_vm0, %v5292_v22  ;;  %v2960_v22 = vld [vmem:[#allocation2 + $0x9a] sm:$0xff] }
  0xa9   : > { %4856 = vmatprep.mubr.msk.f32.mxu0 %vm304_vm0, %v5295_v24  ;;  %v2961_v24 = vld [vmem:[#allocation2 + $0xa2] sm:$0xff] }
  0xaa   : > { %4954 = vmatmul.mubr.msk.f32.gmra.mrb[74].mxu1 %vm304_vm0, %v2956_v14  ;;  %v507_v14 = vld [vmem:[#allocation3 + $0x28] sm:$0xff] }
  0xab   : > { %4956 = vmatprep.mubr.msk.f32.mxu1 %vm304_vm0, %v2957_v16  ;;  %v2991_v16 = vld [vmem:[#allocation2 + $0x192] sm:$0xff] }
  0xac   : > { %4857 = vmatmul.mubr.msk.f32.gmra.mrb[76].mxu0 %vm304_vm0, %v5304_v30  ;;  %v2962_v30 = vld [vmem:[#allocation2 + $0xaa] sm:$0xff] }
  0xad   : > { %4859 = vmatprep.mubr.msk.f32.mxu0 %vm304_vm0, %v5310_v32  ;;  %v2963_v32 = vld [vmem:[#allocation2 + $0xb2] sm:$0xff] }
  0xae   : > { %4957 = vmatmul.mubr.msk.f32.gmra.mrb[76].mxu1 %vm304_vm0, %v2958_v18  ;;  %v506_v18 = vld [vmem:[#allocation3 + $0x20] sm:$0xff] }
  0xaf   : > { %4959 = vmatprep.mubr.msk.f32.mxu1 %vm304_vm0, %v2959_v20 }
  0xb0   : > { %4860 = vmatmul.mubr.msk.f32.gmra.mrb[78].mxu0 %vm304_vm0, %v5315_v35  ;;  %v2964_v35 = vld [vmem:[#allocation2 + $0xba] sm:$0xff] }
  0xb1   : > { %4862 = vmatprep.mubr.msk.f32.mxu0 %vm304_vm0, %v5324_v40  ;;  %v2965_v40 = vld [vmem:[#allocation2 + $0xc2] sm:$0xff] }
  0xb2   : > { %4960 = vmatmul.mubr.msk.f32.gmra.mrb[78].mxu1 %vm304_vm0, %v2960_v22 }
  0xb3   : > { %4962 = vmatprep.mubr.msk.f32.mxu1 %vm304_vm0, %v2961_v24 }
  0xb4   : > { %4863 = vmatmul.mubr.msk.f32.gmra.mrb[80].mxu0 %vm304_vm0, %v5362_v60  ;;  %v2966_v60 = vld [vmem:[#allocation2 + $0xca] sm:$0xff] }
  0xb5   : > { %4865 = vmatprep.mubr.msk.f32.mxu0 %vm304_vm0, %v5365_v62  ;;  %v2967_v62 = vld [vmem:[#allocation2 + $0xd2] sm:$0xff] }
  0xb6   : > { %4963 = vmatmul.mubr.msk.f32.gmra.mrb[80].mxu1 %vm304_vm0, %v2962_v30 }
  0xb7   : > { %4965 = vmatprep.mubr.msk.f32.mxu1 %vm304_vm0, %v2963_v32  ;;  %v2992_v32 = vld [vmem:[#allocation2 + $0x19a] sm:$0xff] }
  0xb8   : > { %4866 = vmatmul.mubr.msk.f32.gmra.mrb[82].mxu0 %vm304_vm0, %v5372_v1  ;;  %v2968_v1 = vld [vmem:[#allocation2 + $0xda] sm:$0xff] }
  0xb9   : > { %4868 = vmatprep.mubr.msk.f32.mxu0 %vm304_vm0, %v5375_v3  ;;  %v2969_v3 = vld [vmem:[#allocation2 + $0xe2] sm:$0xff] }
  0xba   : > { %4966 = vmatmul.mubr.msk.f32.gmra.mrb[82].mxu1 %vm304_vm0, %v2964_v35 }
  0xbb   : > { %4968 = vmatprep.mubr.msk.f32.mxu1 %vm304_vm0, %v2965_v40  ;;  %v509_v40 = vld [vmem:[#allocation3 + $0x38] sm:$0xff] }
  0xbc   : > { %4869 = vmatmul.mubr.msk.f32.gmra.mrb[84].mxu0 %vm304_vm0, %v5382_v5  ;;  %v2970_v5 = vld [vmem:[#allocation2 + $0xea] sm:$0xff] }
  0xbd   : > { %4871 = vmatprep.mubr.msk.f32.mxu0 %vm304_vm0, %v5385_v7  ;;  %v2971_v7 = vld [vmem:[#allocation2 + $0xf2] sm:$0xff] }
  0xbe   : > { %4969 = vmatmul.mubr.msk.f32.gmra.mrb[84].mxu1 %vm304_vm0, %v2966_v60  ;;  %v2993_v60 = vld [vmem:[#allocation2 + $0x1a2] sm:$0xff] }
  0xbf   : > { %4971 = vmatprep.mubr.msk.f32.mxu1 %vm304_vm0, %v2967_v62 }
  0xc0   : > { %4872 = vmatmul.mubr.msk.f32.gmra.mrb[86].mxu0 %vm304_vm0, %v5394_v11  ;;  %v2972_v11 = vld [vmem:[#allocation2 + $0xfa] sm:$0xff] }
  0xc1   : > { %4874 = vmatprep.mubr.msk.f32.mxu0 %vm304_vm0, %v5399_v13  ;;  %v2973_v13 = vld [vmem:[#allocation2 + $0x102] sm:$0xff] }
  0xc2   : > { %4972 = vmatmul.mubr.msk.f32.gmra.mrb[86].mxu1 %vm304_vm0, %v2968_v1 }
  0xc3   : > { %4974 = vmatprep.mubr.msk.f32.mxu1 %vm304_vm0, %v2969_v3  ;;  %v508_v3 = vld [vmem:[#allocation3 + $0x30] sm:$0xff] }
  0xc4   : > { %4875 = vmatmul.mubr.msk.f32.gmra.mrb[88].mxu0 %vm304_vm0, %v5408_v19  ;;  %v2974_v19 = vld [vmem:[#allocation2 + $0x10a] sm:$0xff] }
  0xc5   : > { %4877 = vmatprep.mubr.msk.f32.mxu0 %vm304_vm0, %v5411_v23  ;;  %v2975_v23 = vld [vmem:[#allocation2 + $0x112] sm:$0xff] }
  0xc6   : > { %4975 = vmatmul.mubr.msk.f32.gmra.mrb[88].mxu1 %vm304_vm0, %v2970_v5 }
  0xc7   : > { %4977 = vmatprep.mubr.msk.f32.mxu1 %vm304_vm0, %v2971_v7 }
  0xc8   : > { %4878 = vmatmul.mubr.msk.f32.gmra.mrb[90].mxu0 %vm304_vm0, %v5418_v26  ;;  %v2976_v26 = vld [vmem:[#allocation2 + $0x11a] sm:$0xff] }
  0xc9   : > { %4880 = vmatprep.mubr.msk.f32.mxu0 %vm304_vm0, %v5421_v28  ;;  %v2977_v28 = vld [vmem:[#allocation2 + $0x122] sm:$0xff] }
  0xca   : > { %4978 = vmatmul.mubr.msk.f32.gmra.mrb[90].mxu1 %vm304_vm0, %v2972_v11 }
  0xcb   : > { %4980 = vmatprep.mubr.msk.f32.mxu1 %vm304_vm0, %v2973_v13 }
  0xcc   : > { %4881 = vmatmul.mubr.msk.f32.gmra.mrb[92].mxu0 %vm304_vm0, %v5428_v31  ;;  %v2978_v31 = vld [vmem:[#allocation2 + $0x12a] sm:$0xff] }
  0xcd   : > { %4883 = vmatprep.mubr.msk.f32.mxu0 %vm304_vm0, %v5431_v34  ;;  %v2979_v34 = vld [vmem:[#allocation2 + $0x132] sm:$0xff] }
  0xce   : > { %4981 = vmatmul.mubr.msk.f32.gmra.mrb[92].mxu1 %vm304_vm0, %v2974_v19 }
  0xcf   : > { %4983 = vmatprep.mubr.msk.f32.mxu1 %vm304_vm0, %v2975_v23 }
  0xd0   : > { %4884 = vmatmul.mubr.msk.f32.gmra.mrb[94].mxu0 %vm304_vm0, %v5438_v37  ;;  %v2980_v37 = vld [vmem:[#allocation2 + $0x13a] sm:$0xff] }
  0xd1   : > { %4886 = vmatprep.mubr.msk.f32.mxu0 %vm304_vm0, %v5441_v39  ;;  %v2981_v39 = vld [vmem:[#allocation2 + $0x142] sm:$0xff] }
  0xd2   : > { %4984 = vmatmul.mubr.msk.f32.gmra.mrb[94].mxu1 %vm304_vm0, %v2976_v26 }
  0xd3   : > { %4986 = vmatprep.mubr.msk.f32.mxu1 %vm304_vm0, %v2977_v28  ;;  %v511_v28 = vld [vmem:[#allocation3 + $0x48] sm:$0xff] }
  0xd4   : > { %4887 = vmatmul.mubr.msk.f32.gmra.mrb[96].mxu0 %vm304_vm0, %v5448_v42  ;;  %v2982_v42 = vld [vmem:[#allocation2 + $0x14a] sm:$0xff] }
  0xd5   : > { %4889 = vmatprep.mubr.msk.f32.mxu0 %vm304_vm0, %v5451_v45  ;;  %v2983_v45 = vld [vmem:[#allocation2 + $0x152] sm:$0xff] }
  0xd6   : > { %4987 = vmatmul.mubr.msk.f32.gmra.mrb[96].mxu1 %vm304_vm0, %v2978_v31  ;;  %v2995_v31 = vld [vmem:[#allocation2 + $0x1b2] sm:$0xff] }
  0xd7   : > { %4989 = vmatprep.mubr.msk.f32.mxu1 %vm304_vm0, %v2979_v34 }
  0xd8   : > { %4890 = vmatmul.mubr.msk.f32.gmra.mrb[98].mxu0 %vm304_vm0, %v5460_v49  ;;  %v2984_v49 = vld [vmem:[#allocation2 + $0x15a] sm:$0xff] }
  0xd9   : > { %4892 = vmatprep.mubr.msk.f32.mxu0 %vm304_vm0, %v5592_v52  ;;  %v2985_v52 = vld [vmem:[#allocation2 + $0x162] sm:$0xff] }
  0xda   : > { %4990 = vmatmul.mubr.msk.f32.gmra.mrb[98].mxu1 %vm304_vm0, %v2980_v37 }
  0xdb   : > { %4992 = vmatprep.mubr.msk.f32.mxu1 %vm304_vm0, %v2981_v39  ;;  %v510_v39 = vld [vmem:[#allocation3 + $0x40] sm:$0xff] }
  0xdc   : > { %4893 = vmatmul.mubr.msk.f32.gmra.mrb[100].mxu0 %vm304_vm0, %v5599_v55  ;;  %v2986_v55 = vld [vmem:[#allocation2 + $0x16a] sm:$0xff] }
  0xdd   : > { %4895 = vmatprep.mubr.msk.f32.mxu0 %vm304_vm0, %v5602_v58  ;;  %v503_v58 = vld [vmem:[#allocation3 + $0x8] sm:$0xff] }
  0xde   : > { %4993 = vmatmul.mubr.msk.f32.gmra.mrb[100].mxu1 %vm304_vm0, %v2982_v42 }
  0xdf   : > { %4995 = vmatprep.mubr.msk.f32.mxu1 %vm304_vm0, %v2983_v45 }
  0xe0   : > { %4896 = vmatmul.mubr.msk.f32.gmra.mrb[102].mxu0 %vm304_vm0, %v5609_v63  ;;  %v2987_v63 = vld [vmem:[#allocation2 + $0x172] sm:$0xff] }
  0xe1   : > { %4898 = vmatprep.mubr.msk.f32.mxu0 %vm304_vm0, %v5612_v4 }
  0xe2   : > { %4996 = vmatmul.mubr.msk.f32.gmra.mrb[102].mxu1 %vm304_vm0, %v2984_v49 }
  0xe3   : > { %4998 = vmatprep.mubr.msk.f32.mxu1 %vm304_vm0, %v2985_v52 }
  0xe4   : > { %4899 = vmatmul.mubr.msk.f32.gmra.mrb[104].mxu0 %vm304_vm0, %v5619_v8  ;;  %v2988_v8 = vld [vmem:[#allocation2 + $0x17a] sm:$0xff] }
  0xe5   : > { %4901 = vmatprep.mubr.msk.f32.mxu0 %vm304_vm0, %v5622_v10  ;;  %v504_v10 = vld [vmem:[#allocation3 + $0x10] sm:$0xff] }
  0xe6   : > { %4999 = vmatmul.mubr.msk.f32.gmra.mrb[104].mxu1 %vm304_vm0, %v2986_v55 }
  0xe7   : > { %v4640_v2 = vpop.f32.mrb[0].mxu0  ;;  %5001 = vmatprep.mubr.msk.f32.mxu1 %vm304_vm0, %v2987_v63 }
  0xe8   : > { %v1146_v12 = vadd.f32 %v4640_v2, %v503_v58  ;;  %v826_v4 = vpop.f32.mrb[1].mxu0  ;;  %4902 = vmatmul.mubr.msk.f32.gmra.mrb[106].mxu0 %vm304_vm0, %v5629_v15  ;;  %v2997_v2 = vld [vmem:[#allocation2 + $0x1c2] sm:$0xff] }
  0xe9   : > { %v1145_v44 = vadd.f32 %v826_v4, %v502_v51  ;;  %4904 = vmatprep.mubr.msk.f32.mxu0 %vm304_vm0, %v5632_v21  ;;  %v4740_v48 = vpop.f32.mrb[0].mxu1  ;;  %v513_v51 = vld [vmem:[#allocation3 + $0x58] sm:$0xff] }
  0xea   : > { %1210 = vst.msk [vmem:[#allocation3 + $0x8] sm:$0xff] %vm304_vm0, %v1146_v12  ;;  %v1662_v56 = vpop.f32.mrb[1].mxu1  ;;  %5002 = vmatmul.mubr.msk.f32.gmra.mrb[106].mxu1 %vm304_vm0, %v2988_v8  ;;  %v512_v8 = vld [vmem:[#allocation3 + $0x50] sm:$0xff] }
  0xeb   : > { %1209 = vst.msk [vmem:[#allocation3] sm:$0xff] %vm304_vm0, %v1145_v44  ;;  %v4643_v54 = vpop.f32.mrb[2].mxu0  ;;  %5004 = vmatprep.mubr.msk.f32.mxu1 %vm304_vm0, %v2989_v46 }
  0xec   : > { %v1148_v15 = vadd.f32 %v4643_v54, %v505_v29  ;;  %v836_v59 = vpop.f32.mrb[3].mxu0  ;;  %4905 = vmatmul.mubr.msk.f32.gmra.mrb[108].mxu0 %vm304_vm0, %v5639_v27 }
  0xed   : > { %v1147_v21 = vadd.f32 %v836_v59, %v504_v10  ;;  %4907 = vmatprep.mubr.msk.f32.mxu0 %vm304_vm0, %v5642_v33  ;;  %v4743_v20 = vpop.f32.mrb[2].mxu1  ;;  %v2999_v59 = vld [vmem:[#allocation2 + $0x1d2] sm:$0xff] }
  0xee   : > { %1212 = vst.msk [vmem:[#allocation3 + $0x18] sm:$0xff] %vm304_vm0, %v1148_v15  ;;  %v1672_v24 = vpop.f32.mrb[3].mxu1  ;;  %5005 = vmatmul.mubr.msk.f32.gmra.mrb[108].mxu1 %vm304_vm0, %v2990_v0  ;;  %v515_v15 = vld [vmem:[#allocation3 + $0x68] sm:$0xff] }
  0xef   : > { %1211 = vst.msk [vmem:[#allocation3 + $0x10] sm:$0xff] %vm304_vm0, %v1147_v21  ;;  %v4646_v22 = vpop.f32.mrb[4].mxu0  ;;  %5007 = vmatprep.mubr.msk.f32.mxu1 %vm304_vm0, %v2991_v16 }
  0xf0   : > { %v1150_v27 = vadd.f32 %v4646_v22, %v507_v14  ;;  %v846_v30 = vpop.f32.mrb[5].mxu0  ;;  %4908 = vmatmul.mubr.msk.f32.gmra.mrb[110].mxu0 %vm304_vm0, %v5649_v38  ;;  %v514_v14 = vld [vmem:[#allocation3 + $0x60] sm:$0xff] }
  0xf1   : > { %v1149_v33 = vadd.f32 %v846_v30, %v506_v18  ;;  %v1338_v35 = vld [vmem:[#allocation3 + $0x8] sm:$0xff]  ;;  %4910 = vmatprep.mubr.msk.f32.mxu0 %vm304_vm0, %v5652_v43  ;;  %v4746_v5 = vpop.f32.mrb[4].mxu1 }
  0xf2   : > { %1214 = vst.msk [vmem:[#allocation3 + $0x28] sm:$0xff] %vm304_vm0, %v1150_v27  ;;  %v1982_v62 = vadd.f32 %v4740_v48, %v1338_v35  ;;  %v1337_v1 = vld [vmem:[#allocation3] sm:$0xff]  ;;  %v1682_v11 = vpop.f32.mrb[5].mxu1  ;;  %5008 = vmatmul.mubr.msk.f32.gmra.mrb[110].mxu1 %vm304_vm0, %v2992_v32  ;;  %v517_v32 = vld [vmem:[#allocation3 + $0x78] sm:$0xff] }
  0xf3   : > { %1213 = vst.msk [vmem:[#allocation3 + $0x20] sm:$0xff] %vm304_vm0, %v1149_v33  ;;  %v1981_v7 = vadd.f32 %v1662_v56, %v1337_v1  ;;  %v4649_v38 = vpop.f32.mrb[6].mxu0  ;;  %5010 = vmatprep.mubr.msk.f32.mxu1 %vm304_vm0, %v2993_v60  ;;  %v2994_v43 = vld [vmem:[#allocation2 + $0x1aa] sm:$0xff]  ;;  %v3001_v33 = vld [vmem:[#allocation2 + $0x1e2] sm:$0xff]  ;;  %v516_v60 = vld [vmem:[#allocation3 + $0x70] sm:$0xff] }
  0xf4   : > { %2046 = vst.msk [vmem:[#allocation3 + $0x8] sm:$0xff] %vm304_vm0, %v1982_v62  ;;  %v1152_v13 = vadd.f32 %v4649_v38, %v509_v40  ;;  %v856_v19 = vpop.f32.mrb[7].mxu0  ;;  %4911 = vmatmul.mubr.msk.f32.gmra.mrb[112].mxu0 %vm304_vm0, %v5659_v50 }
  0xf5   : > { %2045 = vst.msk [vmem:[#allocation3] sm:$0xff] %vm304_vm0, %v1981_v7  ;;  %v1151_v23 = vadd.f32 %v856_v19, %v508_v3  ;;  %v1340_v26 = vld [vmem:[#allocation3 + $0x18] sm:$0xff]  ;;  %4913 = vmatprep.mubr.msk.f32.mxu0 %vm304_vm0, %v5662_v53  ;;  %v4749_v42 = vpop.f32.mrb[6].mxu1  ;;  %v3003_v19 = vld [vmem:[#allocation2 + $0x1f2] sm:$0xff] }
  0xf6   : > { %1216 = vst.msk [vmem:[#allocation3 + $0x38] sm:$0xff] %vm304_vm0, %v1152_v13  ;;  %v1984_v34 = vadd.f32 %v4743_v20, %v1340_v26  ;;  %v1339_v37 = vld [vmem:[#allocation3 + $0x10] sm:$0xff]  ;;  %v1692_v49 = vpop.f32.mrb[7].mxu1  ;;  %5011 = vmatmul.mubr.msk.f32.gmra.mrb[112].mxu1 %vm304_vm0, %v2994_v43  ;;  %v519_v13 = vld [vmem:[#allocation3 + $0x88] sm:$0xff]  ;;  %v518_v26 = vld [vmem:[#allocation3 + $0x80] sm:$0xff] }
  0xf7   : > { %1215 = vst.msk [vmem:[#allocation3 + $0x30] sm:$0xff] %vm304_vm0, %v1151_v23  ;;  %v1983_v50 = vadd.f32 %v1672_v24, %v1339_v37  ;;  %v4652_v45 = vpop.f32.mrb[8].mxu0  ;;  %5013 = vmatprep.mubr.msk.f32.mxu1 %vm304_vm0, %v2995_v31  ;;  %v2996_v53 = vld [vmem:[#allocation2 + $0x1ba] sm:$0xff] }
  0xf8   : > { %2048 = vst.msk [vmem:[#allocation3 + $0x18] sm:$0xff] %vm304_vm0, %v1984_v34  ;;  %v1154_v52 = vadd.f32 %v4652_v45, %v511_v28  ;;  %v866_v55 = vpop.f32.mrb[9].mxu0  ;;  %4914 = vmatmul.mubr.msk.f32.gmra.mrb[114].mxu0 %vm304_vm0, %v5669_v61  ;;  %v2169_v28 = vld [vmem:[#allocation2 + $0x201] sm:$0xff] }
  0xf9   : > { %2047 = vst.msk [vmem:[#allocation3 + $0x10] sm:$0xff] %vm304_vm0, %v1983_v50  ;;  %v1153_v58 = vadd.f32 %v866_v55, %v510_v39  ;;  %v1342_v63 = vld [vmem:[#allocation3 + $0x28] sm:$0xff]  ;;  %4916 = vmatprep.mubr.msk.f32.mxu0 %vm304_vm0, %v5672_v6  ;;  %v4752_v44 = vpop.f32.mrb[8].mxu1  ;;  %v3004_v50 = vld [vmem:[#allocation2 + $0x1fa] sm:$0xff]  ;;  %v3005_v55 = vld [vmem:[#allocation2 + $0x202] sm:$0xff] }
  0xfa   : > { %1218 = vst.msk [vmem:[#allocation3 + $0x48] sm:$0xff] %vm304_vm0, %v1154_v52  ;;  %v1986_v12 = vadd.f32 %v4746_v5, %v1342_v63  ;;  %v1341_v4 = vld [vmem:[#allocation3 + $0x20] sm:$0xff]  ;;  %v1702_v46 = vpop.f32.mrb[9].mxu1  ;;  %5014 = vmatmul.mubr.msk.f32.gmra.mrb[114].mxu1 %vm304_vm0, %v2996_v53  ;;  %v520_v63 = vld [vmem:[#allocation3 + $0x90] sm:$0xff] }
  0xfb   : > { %1217 = vst.msk [vmem:[#allocation3 + $0x40] sm:$0xff] %vm304_vm0, %v1153_v58  ;;  %v1985_v61 = vadd.f32 %v1682_v11, %v1341_v4  ;;  %v4655_v29 = vpop.f32.mrb[10].mxu0  ;;  %5016 = vmatprep.mubr.msk.f32.mxu1 %vm304_vm0, %v2997_v2  ;;  %v2998_v6 = vld [vmem:[#allocation2 + $0x1ca] sm:$0xff] }
  0xfc   : > { %2050 = vst.msk [vmem:[#allocation3 + $0x28] sm:$0xff] %vm304_vm0, %v1986_v12  ;;  %v1156_v10 = vadd.f32 %v4655_v29, %v513_v51  ;;  %v876_v48 = vpop.f32.mrb[11].mxu0  ;;  %4917 = vmatmul.mubr.msk.f32.gmra.mrb[116].mxu0 %vm304_vm0, %v5682_v25  ;;  %v2170_v52 = vld [vmem:[#allocation2 + $0x209] sm:$0xff]  ;;  %v2171_v51 = vld [vmem:[#allocation2 + $0x211] sm:$0xff] }
  0xfd   : > { %2049 = vst.msk [vmem:[#allocation3 + $0x20] sm:$0xff] %vm304_vm0, %v1985_v61  ;;  %v1155_v54 = vadd.f32 %v876_v48, %v512_v8  ;;  %v1344_v56 = vld [vmem:[#allocation3 + $0x38] sm:$0xff]  ;;  %4919 = vmatprep.mubr.msk.f32.mxu0 %vm304_vm0, %v5686_v36  ;;  %v4755_v16 = vpop.f32.mrb[10].mxu1  ;;  %v523_v61 = vld [vmem:[#allocation3 + $0xa8] sm:$0xff] }
  0xfe   : > { %1220 = vst.msk [vmem:[#allocation3 + $0x58] sm:$0xff] %vm304_vm0, %v1156_v10  ;;  %v1988_v0 = vadd.f32 %v4749_v42, %v1344_v56  ;;  %v1343_v21 = vld [vmem:[#allocation3 + $0x30] sm:$0xff]  ;;  %v1712_v20 = vpop.f32.mrb[11].mxu1  ;;  %5017 = vmatmul.mubr.msk.f32.gmra.mrb[116].mxu1 %vm304_vm0, %v2998_v6  ;;  %v3006_v29 = vld [vmem:[#allocation2 + $0x20a] sm:$0xff] }
  0xff   : > { %1219 = vst.msk [vmem:[#allocation3 + $0x50] sm:$0xff] %vm304_vm0, %v1155_v54  ;;  %v1987_v25 = vadd.f32 %v1692_v49, %v1343_v21  ;;  %v4658_v18 = vpop.f32.mrb[12].mxu0  ;;  %5019 = vmatprep.mubr.msk.f32.mxu1 %vm304_vm0, %v2999_v59  ;;  %v3000_v36 = vld [vmem:[#allocation2 + $0x1da] sm:$0xff]  ;;  %v3007_v6 = vld [vmem:[#allocation2 + $0x212] sm:$0xff] }
 0x100   : > { %2052 = vst.msk [vmem:[#allocation3 + $0x38] sm:$0xff] %vm304_vm0, %v1988_v0  ;;  %v1158_v22 = vadd.f32 %v4658_v18, %v515_v15  ;;  %v886_v24 = vpop.f32.mrb[13].mxu0  ;;  %4920 = vmatmul.mubr.msk.f32.gmra.mrb[118].mxu0 %vm304_vm0, %v5696_v57  ;;  %v2172_v48 = vld [vmem:[#allocation2 + $0x219] sm:$0xff]  ;;  %v522_v15 = vld [vmem:[#allocation3 + $0xa0] sm:$0xff] }
 0x101   : > { %2051 = vst.msk [vmem:[#allocation3 + $0x30] sm:$0xff] %vm304_vm0, %v1987_v25  ;;  %v1157_v27 = vadd.f32 %v886_v24, %v514_v14  ;;  %v1346_v30 = vld [vmem:[#allocation3 + $0x48] sm:$0xff]  ;;  %4922 = vmatprep.mubr.msk.f32.mxu0 %vm304_vm0, %v5700_v9  ;;  %v4758_v62 = vpop.f32.mrb[12].mxu1  ;;  %v3008_v18 = vld [vmem:[#allocation2 + $0x21a] sm:$0xff] }
 0x102   : > { %1222 = vst.msk [vmem:[#allocation3 + $0x68] sm:$0xff] %vm304_vm0, %v1158_v22  ;;  %v1990_v35 = vadd.f32 %v4752_v44, %v1346_v30  ;;  %v1345_v40 = vld [vmem:[#allocation3 + $0x40] sm:$0xff]  ;;  %v1722_v3 = vpop.f32.mrb[13].mxu1  ;;  %5020 = vmatmul.mubr.msk.f32.gmra.mrb[118].mxu1 %vm304_vm0, %v3000_v36  ;;  %v525_v24 = vld [vmem:[#allocation3 + $0xb8] sm:$0xff]  ;;  %v524_v30 = vld [vmem:[#allocation3 + $0xb0] sm:$0xff] }
 0x103   : > { %1221 = vst.msk [vmem:[#allocation3 + $0x60] sm:$0xff] %vm304_vm0, %v1157_v27  ;;  %v1989_v57 = vadd.f32 %v1702_v46, %v1345_v40  ;;  %v4661_v1 = vpop.f32.mrb[14].mxu0  ;;  %5022 = vmatprep.mubr.msk.f32.mxu1 %vm304_vm0, %v3001_v33  ;;  %v3002_v9 = vld [vmem:[#allocation2 + $0x1ea] sm:$0xff] }
 0x104   : > { %2054 = vst.msk [vmem:[#allocation3 + $0x48] sm:$0xff] %vm304_vm0, %v1990_v35  ;;  %v1160_v5 = vadd.f32 %v4661_v1, %v517_v32  ;;  %v896_v7 = vpop.f32.mrb[15].mxu0  ;;  %4923 = vmatmul.mubr.msk.f32.gmra.mrb[120].mxu0 %vm304_vm0, %v5707_v17 }
 0x105   : > { %2053 = vst.msk [vmem:[#allocation3 + $0x40] sm:$0xff] %vm304_vm0, %v1989_v57  ;;  %v1159_v38 = vadd.f32 %v896_v7, %v516_v60  ;;  %v1348_v11 = vld [vmem:[#allocation3 + $0x58] sm:$0xff]  ;;  %4925 = vmatprep.mubr.msk.f32.mxu0 %vm304_vm0, %v5710_v47  ;;  %v4761_v31 = vpop.f32.mrb[14].mxu1 }
 0x106   : > { %1224 = vst.msk [vmem:[#allocation3 + $0x78] sm:$0xff] %vm304_vm0, %v1160_v5  ;;  %v1992_v43 = vadd.f32 %v4755_v16, %v1348_v11  ;;  %v1347_v23 = vld [vmem:[#allocation3 + $0x50] sm:$0xff]  ;;  %v1732_v37 = vpop.f32.mrb[15].mxu1  ;;  %5023 = vmatmul.mubr.msk.f32.gmra.mrb[120].mxu1 %vm304_vm0, %v3002_v9  ;;  %v521_v47 = vld [vmem:[#allocation3 + $0x98] sm:$0xff]  ;;  %v526_v9 = vld [vmem:[#allocation3 + $0xc0] sm:$0xff] }
 0x107   : > { %1223 = vst.msk [vmem:[#allocation3 + $0x70] sm:$0xff] %vm304_vm0, %v1159_v38  ;;  %v1991_v17 = vadd.f32 %v1712_v20, %v1347_v23  ;;  %v4664_v34 = vpop.f32.mrb[16].mxu0  ;;  %5025 = vmatprep.mubr.msk.f32.mxu1 %vm304_vm0, %v3003_v19 }
 0x108   : > { %2056 = vst.msk [vmem:[#allocation3 + $0x58] sm:$0xff] %vm304_vm0, %v1992_v43  ;;  %v1162_v39 = vadd.f32 %v4664_v34, %v519_v13  ;;  %v906_v42 = vpop.f32.mrb[17].mxu0  ;;  %4926 = vmatmul.mubr.msk.f32.gmra.mrb[122].mxu0 %vm304_vm0, %v5717_v41 }
 0x109   : > { %2055 = vst.msk [vmem:[#allocation3 + $0x50] sm:$0xff] %vm304_vm0, %v1991_v17  ;;  %v1161_v45 = vadd.f32 %v906_v42, %v518_v26  ;;  %v1350_v49 = vld [vmem:[#allocation3 + $0x68] sm:$0xff]  ;;  %4928 = vmatprep.mubr.msk.f32.mxu0 %vm304_vm0, %v2169_v28  ;;  %v4764_v2 = vpop.f32.mrb[16].mxu1 }
 0x10a   : > { %1226 = vst.msk [vmem:[#allocation3 + $0x88] sm:$0xff] %vm304_vm0, %v1162_v39  ;;  %v1994_v53 = vadd.f32 %v4758_v62, %v1350_v49  ;;  %v1349_v58 = vld [vmem:[#allocation3 + $0x60] sm:$0xff]  ;;  %v1742_v4 = vpop.f32.mrb[17].mxu1  ;;  %5026 = vmatmul.mubr.msk.f32.gmra.mrb[122].mxu1 %vm304_vm0, %v3004_v50 }
 0x10b   : > { %1225 = vst.msk [vmem:[#allocation3 + $0x80] sm:$0xff] %vm304_vm0, %v1161_v45  ;;  %v1993_v41 = vadd.f32 %v1722_v3, %v1349_v58  ;;  %v4667_v12 = vpop.f32.mrb[18].mxu0  ;;  %5028 = vmatprep.mubr.msk.f32.mxu1 %vm304_vm0, %v3005_v55  ;;  %v527_v3 = vld [vmem:[#allocation3 + $0xc8] sm:$0xff] }
 0x10c   : > { %2058 = vst.msk [vmem:[#allocation3 + $0x68] sm:$0xff] %vm304_vm0, %v1994_v53  ;;  %v1164_v8 = vadd.f32 %v4667_v12, %v521_v47  ;;  %v916_v44 = vpop.f32.mrb[19].mxu0  ;;  %4929 = vmatmul.mubr.msk.f32.gmra.mrb[124].mxu0 %vm304_vm0, %v2170_v52  ;;  %v531_v53 = vld [vmem:[#allocation3 + $0xe8] sm:$0xff] }
 0x10d   : > { %2057 = vst.msk [vmem:[#allocation3 + $0x60] sm:$0xff] %vm304_vm0, %v1993_v41  ;;  %v1163_v46 = vadd.f32 %v916_v44, %v520_v63  ;;  %v1352_v10 = vld [vmem:[#allocation3 + $0x78] sm:$0xff]  ;;  %4931 = vmatprep.mubr.msk.f32.mxu0 %vm304_vm0, %v2171_v51  ;;  %v4767_v59 = vpop.f32.mrb[18].mxu1  ;;  %v530_v51 = vld [vmem:[#allocation3 + $0xe0] sm:$0xff] }
 0x10e   : > { %1228 = vst.msk [vmem:[#allocation3 + $0x98] sm:$0xff] %vm304_vm0, %v1164_v8  ;;  %v1996_v54 = vadd.f32 %v4761_v31, %v1352_v10  ;;  %v1351_v56 = vld [vmem:[#allocation3 + $0x70] sm:$0xff]  ;;  %v1752_v14 = vpop.f32.mrb[19].mxu1  ;;  %5029 = vmatmul.mubr.msk.f32.gmra.mrb[124].mxu1 %vm304_vm0, %v3006_v29  ;;  %v529_v31 = vld [vmem:[#allocation3 + $0xd8] sm:$0xff] }
 0x10f   : > { %1227 = vst.msk [vmem:[#allocation3 + $0x90] sm:$0xff] %vm304_vm0, %v1163_v46  ;;  %v1995_v0 = vadd.f32 %v1732_v37, %v1351_v56  ;;  %v4670_v21 = vpop.f32.mrb[20].mxu0  ;;  %5031 = vmatprep.mubr.msk.f32.mxu1 %vm304_vm0, %v3007_v6  ;;  %v528_v37 = vld [vmem:[#allocation3 + $0xd0] sm:$0xff]  ;;  %v533_v46 = vld [vmem:[#allocation3 + $0xf8] sm:$0xff] }
 0x110   : > { %2060 = vst.msk [vmem:[#allocation3 + $0x78] sm:$0xff] %vm304_vm0, %v1996_v54  ;;  %v1166_v16 = vadd.f32 %v4670_v21, %v523_v61  ;;  %v926_v25 = vpop.f32.mrb[21].mxu0  ;;  %4932 = vmatmul.mubr.msk.f32.gmra.mrb[126].mxu0 %vm304_vm0, %v2172_v48  ;;  %v532_v6 = vld [vmem:[#allocation3 + $0xf0] sm:$0xff] }
 0x111   : > { %2059 = vst.msk [vmem:[#allocation3 + $0x70] sm:$0xff] %vm304_vm0, %v1995_v0  ;;  %v1165_v20 = vadd.f32 %v926_v25, %v522_v15  ;;  %v1354_v22 = vld [vmem:[#allocation3 + $0x88] sm:$0xff]  ;;  %v4770_v32 = vpop.f32.mrb[20].mxu1 }
 0x112   : > { %1230 = vst.msk [vmem:[#allocation3 + $0xa8] sm:$0xff] %vm304_vm0, %v1166_v16  ;;  %v1998_v36 = vadd.f32 %v4764_v2, %v1354_v22  ;;  %v1353_v27 = vld [vmem:[#allocation3 + $0x80] sm:$0xff]  ;;  %v1762_v40 = vpop.f32.mrb[21].mxu1  ;;  %5032 = vmatmul.mubr.msk.f32.gmra.mrb[126].mxu1 %vm304_vm0, %v3008_v18  ;;  %v535_v25 = vld [vmem:[#allocation3 + $0x108] sm:$0xff] }
 0x113   : > { %1229 = vst.msk [vmem:[#allocation3 + $0xa0] sm:$0xff] %vm304_vm0, %v1165_v20  ;;  %v1997_v33 = vadd.f32 %v1742_v4, %v1353_v27  ;;  %v4673_v35 = vpop.f32.mrb[22].mxu0  ;;  %v534_v22 = vld [vmem:[#allocation3 + $0x100] sm:$0xff] }
 0x114   : > { %2062 = vst.msk [vmem:[#allocation3 + $0x88] sm:$0xff] %vm304_vm0, %v1998_v36  ;;  %v1168_v60 = vadd.f32 %v4673_v35, %v525_v24  ;;  %v936_v62 = vpop.f32.mrb[23].mxu0 }
 0x115   : > { %2061 = vst.msk [vmem:[#allocation3 + $0x80] sm:$0xff] %vm304_vm0, %v1997_v33  ;;  %v1167_v57 = vadd.f32 %v936_v62, %v524_v30  ;;  %v1356_v1 = vld [vmem:[#allocation3 + $0x98] sm:$0xff]  ;;  %v4773_v38 = vpop.f32.mrb[22].mxu1 }
 0x116   : > { %1232 = vst.msk [vmem:[#allocation3 + $0xb8] sm:$0xff] %vm304_vm0, %v1168_v60  ;;  %v2000_v5 = vadd.f32 %v4767_v59, %v1356_v1  ;;  %v1355_v7 = vld [vmem:[#allocation3 + $0x90] sm:$0xff]  ;;  %v1772_v19 = vpop.f32.mrb[23].mxu1  ;;  %v537_v60 = vld [vmem:[#allocation3 + $0x118] sm:$0xff] }
 0x117   : > { %1231 = vst.msk [vmem:[#allocation3 + $0xb0] sm:$0xff] %vm304_vm0, %v1167_v57  ;;  %v1999_v11 = vadd.f32 %v1752_v14, %v1355_v7  ;;  %v4676_v13 = vpop.f32.mrb[24].mxu0  ;;  %v536_v1 = vld [vmem:[#allocation3 + $0x110] sm:$0xff] }
 0x118   : > { %2064 = vst.msk [vmem:[#allocation3 + $0x98] sm:$0xff] %vm304_vm0, %v2000_v5  ;;  %v1170_v43 = vadd.f32 %v4676_v13, %v527_v3  ;;  %v946_v23 = vpop.f32.mrb[25].mxu0 }
 0x119   : > { %2063 = vst.msk [vmem:[#allocation3 + $0x90] sm:$0xff] %vm304_vm0, %v1999_v11  ;;  %v1169_v26 = vadd.f32 %v946_v23, %v526_v9  ;;  %v1358_v28 = vld [vmem:[#allocation3 + $0xa8] sm:$0xff]  ;;  %v4776_v39 = vpop.f32.mrb[24].mxu1 }
 0x11a   : > { %1234 = vst.msk [vmem:[#allocation3 + $0xc8] sm:$0xff] %vm304_vm0, %v1170_v43  ;;  %v2002_v17 = vadd.f32 %v4770_v32, %v1358_v28  ;;  %v1357_v34 = vld [vmem:[#allocation3 + $0xa0] sm:$0xff]  ;;  %v1782_v50 = vpop.f32.mrb[25].mxu1  ;;  %v539_v43 = vld [vmem:[#allocation3 + $0x128] sm:$0xff] }
 0x11b   : > { %1233 = vst.msk [vmem:[#allocation3 + $0xc0] sm:$0xff] %vm304_vm0, %v1169_v26  ;;  %v2001_v42 = vadd.f32 %v1762_v40, %v1357_v34  ;;  %v4679_v47 = vpop.f32.mrb[26].mxu0  ;;  %v538_v28 = vld [vmem:[#allocation3 + $0x120] sm:$0xff] }
 0x11c   : > { %2066 = vst.msk [vmem:[#allocation3 + $0xa8] sm:$0xff] %vm304_vm0, %v2002_v17  ;;  %v1172_v45 = vadd.f32 %v4679_v47, %v529_v31  ;;  %v956_v49 = vpop.f32.mrb[27].mxu0 }
 0x11d   : > { %2065 = vst.msk [vmem:[#allocation3 + $0xa0] sm:$0xff] %vm304_vm0, %v2001_v42  ;;  %v1171_v52 = vadd.f32 %v956_v49, %v528_v37  ;;  %v1360_v55 = vld [vmem:[#allocation3 + $0xb8] sm:$0xff]  ;;  %v4779_v2 = vpop.f32.mrb[26].mxu1 }
 0x11e   : > { %1236 = vst.msk [vmem:[#allocation3 + $0xd8] sm:$0xff] %vm304_vm0, %v1172_v45  ;;  %v2004_v58 = vadd.f32 %v4773_v38, %v1360_v55  ;;  %v1359_v63 = vld [vmem:[#allocation3 + $0xb0] sm:$0xff]  ;;  %v1792_v4 = vpop.f32.mrb[27].mxu1  ;;  %v541_v45 = vld [vmem:[#allocation3 + $0x138] sm:$0xff] }
 0x11f   : > { %1235 = vst.msk [vmem:[#allocation3 + $0xd0] sm:$0xff] %vm304_vm0, %v1171_v52  ;;  %v2003_v41 = vadd.f32 %v1772_v19, %v1359_v63  ;;  %v4682_v12 = vpop.f32.mrb[28].mxu0  ;;  %v540_v55 = vld [vmem:[#allocation3 + $0x130] sm:$0xff] }
 0x120   : > { %2068 = vst.msk [vmem:[#allocation3 + $0xb8] sm:$0xff] %vm304_vm0, %v2004_v58  ;;  %v1174_v8 = vadd.f32 %v4682_v12, %v531_v53  ;;  %v966_v44 = vpop.f32.mrb[29].mxu0 }
 0x121   : > { %2067 = vst.msk [vmem:[#allocation3 + $0xb0] sm:$0xff] %vm304_vm0, %v2003_v41  ;;  %v1173_v61 = vadd.f32 %v966_v44, %v530_v51  ;;  %v1362_v29 = vld [vmem:[#allocation3 + $0xc8] sm:$0xff]  ;;  %v4782_v54 = vpop.f32.mrb[28].mxu1 }
 0x122   : > { %1238 = vst.msk [vmem:[#allocation3 + $0xe8] sm:$0xff] %vm304_vm0, %v1174_v8  ;;  %v2006_v10 = vadd.f32 %v4776_v39, %v1362_v29  ;;  %v1361_v48 = vld [vmem:[#allocation3 + $0xc0] sm:$0xff]  ;;  %v1802_v59 = vpop.f32.mrb[29].mxu1  ;;  %v543_v8 = vld [vmem:[#allocation3 + $0x148] sm:$0xff] }
 0x123   : > { %1237 = vst.msk [vmem:[#allocation3 + $0xe0] sm:$0xff] %vm304_vm0, %v1173_v61  ;;  %v2005_v56 = vadd.f32 %v1782_v50, %v1361_v48  ;;  %v4685_v15 = vpop.f32.mrb[30].mxu0  ;;  %v542_v29 = vld [vmem:[#allocation3 + $0x140] sm:$0xff] }
 0x124   : > { %2070 = vst.msk [vmem:[#allocation3 + $0xc8] sm:$0xff] %vm304_vm0, %v2006_v10  ;;  %v1176_v0 = vadd.f32 %v4685_v15, %v533_v46  ;;  %v976_v21 = vpop.f32.mrb[31].mxu0 }
 0x125   : > { %2069 = vst.msk [vmem:[#allocation3 + $0xc0] sm:$0xff] %vm304_vm0, %v2005_v56  ;;  %v1175_v14 = vadd.f32 %v976_v21, %v532_v6  ;;  %v1364_v16 = vld [vmem:[#allocation3 + $0xd8] sm:$0xff]  ;;  %v4785_v24 = vpop.f32.mrb[30].mxu1 }
 0x126   : > { %1240 = vst.msk [vmem:[#allocation3 + $0xf8] sm:$0xff] %vm304_vm0, %v1176_v0  ;;  %v2008_v18 = vadd.f32 %v4779_v2, %v1364_v16  ;;  %v1363_v20 = vld [vmem:[#allocation3 + $0xd0] sm:$0xff]  ;;  %v1812_v30 = vpop.f32.mrb[31].mxu1  ;;  %v545_v0 = vld [vmem:[#allocation3 + $0x158] sm:$0xff] }
 0x127   : > { %1239 = vst.msk [vmem:[#allocation3 + $0xf0] sm:$0xff] %vm304_vm0, %v1175_v14  ;;  %v2007_v36 = vadd.f32 %v1792_v4, %v1363_v20  ;;  %v4688_v27 = vpop.f32.mrb[32].mxu0  ;;  %v544_v16 = vld [vmem:[#allocation3 + $0x150] sm:$0xff] }
 0x128   : > { %2072 = vst.msk [vmem:[#allocation3 + $0xd8] sm:$0xff] %vm304_vm0, %v2008_v18  ;;  %v1178_v32 = vadd.f32 %v4688_v27, %v535_v25  ;;  %v986_v33 = vpop.f32.mrb[33].mxu0 }
 0x129   : > { %2071 = vst.msk [vmem:[#allocation3 + $0xd0] sm:$0xff] %vm304_vm0, %v2007_v36  ;;  %v1177_v35 = vadd.f32 %v986_v33, %v534_v22  ;;  %v1366_v40 = vld [vmem:[#allocation3 + $0xe8] sm:$0xff]  ;;  %v4788_v3 = vpop.f32.mrb[32].mxu1 }
 0x12a   : > { %1242 = vst.msk [vmem:[#allocation3 + $0x108] sm:$0xff] %vm304_vm0, %v1178_v32  ;;  %v2010_v62 = vadd.f32 %v4782_v54, %v1366_v40  ;;  %v1365_v57 = vld [vmem:[#allocation3 + $0xe0] sm:$0xff]  ;;  %v1822_v9 = vpop.f32.mrb[33].mxu1  ;;  %v547_v32 = vld [vmem:[#allocation3 + $0x168] sm:$0xff] }
 0x12b   : > { %1241 = vst.msk [vmem:[#allocation3 + $0x100] sm:$0xff] %vm304_vm0, %v1177_v35  ;;  %v2009_v5 = vadd.f32 %v1802_v59, %v1365_v57  ;;  %v4691_v7 = vpop.f32.mrb[34].mxu0  ;;  %v546_v40 = vld [vmem:[#allocation3 + $0x160] sm:$0xff] }
 0x12c   : > { %2074 = vst.msk [vmem:[#allocation3 + $0xe8] sm:$0xff] %vm304_vm0, %v2010_v62  ;;  %v1180_v38 = vadd.f32 %v4691_v7, %v537_v60  ;;  %v996_v11 = vpop.f32.mrb[35].mxu0 }
 0x12d   : > { %2073 = vst.msk [vmem:[#allocation3 + $0xe0] sm:$0xff] %vm304_vm0, %v2009_v5  ;;  %v1179_v13 = vadd.f32 %v996_v11, %v536_v1  ;;  %v1368_v19 = vld [vmem:[#allocation3 + $0xf8] sm:$0xff]  ;;  %v4791_v31 = vpop.f32.mrb[34].mxu1 }
 0x12e   : > { %1244 = vst.msk [vmem:[#allocation3 + $0x118] sm:$0xff] %vm304_vm0, %v1180_v38  ;;  %v2012_v23 = vadd.f32 %v4785_v24, %v1368_v19  ;;  %v1367_v26 = vld [vmem:[#allocation3 + $0xf0] sm:$0xff]  ;;  %v1832_v37 = vpop.f32.mrb[35].mxu1  ;;  %v549_v38 = vld [vmem:[#allocation3 + $0x178] sm:$0xff] }
 0x12f   : > { %1243 = vst.msk [vmem:[#allocation3 + $0x110] sm:$0xff] %vm304_vm0, %v1179_v13  ;;  %v2011_v17 = vadd.f32 %v1812_v30, %v1367_v26  ;;  %v4694_v34 = vpop.f32.mrb[36].mxu0  ;;  %v548_v19 = vld [vmem:[#allocation3 + $0x170] sm:$0xff] }
 0x130   : > { %2076 = vst.msk [vmem:[#allocation3 + $0xf8] sm:$0xff] %vm304_vm0, %v2012_v23  ;;  %v1182_v39 = vadd.f32 %v4694_v34, %v539_v43  ;;  %v1006_v42 = vpop.f32.mrb[37].mxu0 }
 0x131   : > { %2075 = vst.msk [vmem:[#allocation3 + $0xf0] sm:$0xff] %vm304_vm0, %v2011_v17  ;;  %v1181_v47 = vadd.f32 %v1006_v42, %v538_v28  ;;  %v1370_v50 = vld [vmem:[#allocation3 + $0x108] sm:$0xff]  ;;  %v4794_v53 = vpop.f32.mrb[36].mxu1 }
 0x132   : > { %1246 = vst.msk [vmem:[#allocation3 + $0x128] sm:$0xff] %vm304_vm0, %v1182_v39  ;;  %v2014_v49 = vadd.f32 %v4788_v3, %v1370_v50  ;;  %v1369_v52 = vld [vmem:[#allocation3 + $0x100] sm:$0xff]  ;;  %v1842_v51 = vpop.f32.mrb[37].mxu1  ;;  %v551_v39 = vld [vmem:[#allocation3 + $0x188] sm:$0xff] }
 0x133   : > { %1245 = vst.msk [vmem:[#allocation3 + $0x120] sm:$0xff] %vm304_vm0, %v1181_v47  ;;  %v2013_v58 = vadd.f32 %v1822_v9, %v1369_v52  ;;  %v4697_v63 = vpop.f32.mrb[38].mxu0  ;;  %v550_v50 = vld [vmem:[#allocation3 + $0x180] sm:$0xff] }
 0x134   : > { %2078 = vst.msk [vmem:[#allocation3 + $0x108] sm:$0xff] %vm304_vm0, %v2014_v49  ;;  %v1184_v2 = vadd.f32 %v4697_v63, %v541_v45  ;;  %v1016_v41 = vpop.f32.mrb[39].mxu0 }
 0x135   : > { %2077 = vst.msk [vmem:[#allocation3 + $0x100] sm:$0xff] %vm304_vm0, %v2013_v58  ;;  %v1183_v12 = vadd.f32 %v1016_v41, %v540_v55  ;;  %v1372_v4 = vld [vmem:[#allocation3 + $0x118] sm:$0xff]  ;;  %v4797_v46 = vpop.f32.mrb[38].mxu1 }
 0x136   : > { %1248 = vst.msk [vmem:[#allocation3 + $0x138] sm:$0xff] %vm304_vm0, %v1184_v2  ;;  %v2016_v44 = vadd.f32 %v4791_v31, %v1372_v4  ;;  %v1371_v61 = vld [vmem:[#allocation3 + $0x110] sm:$0xff]  ;;  %v1852_v6 = vpop.f32.mrb[39].mxu1  ;;  %v553_v2 = vld [vmem:[#allocation3 + $0x198] sm:$0xff] }
 0x137   : > { %1247 = vst.msk [vmem:[#allocation3 + $0x130] sm:$0xff] %vm304_vm0, %v1183_v12  ;;  %v2015_v10 = vadd.f32 %v1832_v37, %v1371_v61  ;;  %v4700_v48 = vpop.f32.mrb[40].mxu0  ;;  %v552_v4 = vld [vmem:[#allocation3 + $0x190] sm:$0xff] }
 0x138   : > { %2080 = vst.msk [vmem:[#allocation3 + $0x118] sm:$0xff] %vm304_vm0, %v2016_v44  ;;  %v1186_v54 = vadd.f32 %v4700_v48, %v543_v8  ;;  %v1026_v56 = vpop.f32.mrb[41].mxu0 }
 0x139   : > { %2079 = vst.msk [vmem:[#allocation3 + $0x110] sm:$0xff] %vm304_vm0, %v2015_v10  ;;  %v1185_v15 = vadd.f32 %v1026_v56, %v542_v29  ;;  %v1374_v59 = vld [vmem:[#allocation3 + $0x128] sm:$0xff]  ;;  %v4800_v25 = vpop.f32.mrb[40].mxu1 }
 0x13a   : > { %1250 = vst.msk [vmem:[#allocation3 + $0x148] sm:$0xff] %vm304_vm0, %v1186_v54  ;;  %v2018_v21 = vadd.f32 %v4794_v53, %v1374_v59  ;;  %v1373_v14 = vld [vmem:[#allocation3 + $0x120] sm:$0xff]  ;;  %v1862_v22 = vpop.f32.mrb[41].mxu1  ;;  %v555_v54 = vld [vmem:[#allocation3 + $0x1a8] sm:$0xff] }
 0x13b   : > { %1249 = vst.msk [vmem:[#allocation3 + $0x140] sm:$0xff] %vm304_vm0, %v1185_v15  ;;  %v2017_v18 = vadd.f32 %v1842_v51, %v1373_v14  ;;  %v4703_v20 = vpop.f32.mrb[42].mxu0  ;;  %v554_v59 = vld [vmem:[#allocation3 + $0x1a0] sm:$0xff] }
 0x13c   : > { %2082 = vst.msk [vmem:[#allocation3 + $0x128] sm:$0xff] %vm304_vm0, %v2018_v21  ;;  %v1188_v24 = vadd.f32 %v4703_v20, %v545_v0  ;;  %v1036_v36 = vpop.f32.mrb[43].mxu0 }
 0x13d   : > { %2081 = vst.msk [vmem:[#allocation3 + $0x120] sm:$0xff] %vm304_vm0, %v2017_v18  ;;  %v1187_v27 = vadd.f32 %v1036_v36, %v544_v16  ;;  %v1376_v30 = vld [vmem:[#allocation3 + $0x138] sm:$0xff]  ;;  %v4803_v60 = vpop.f32.mrb[42].mxu1 }
 0x13e   : > { %1252 = vst.msk [vmem:[#allocation3 + $0x158] sm:$0xff] %vm304_vm0, %v1188_v24  ;;  %v2020_v33 = vadd.f32 %v4797_v46, %v1376_v30  ;;  %v1375_v35 = vld [vmem:[#allocation3 + $0x130] sm:$0xff]  ;;  %v1872_v1 = vpop.f32.mrb[43].mxu1  ;;  %v557_v24 = vld [vmem:[#allocation3 + $0x1b8] sm:$0xff] }
 0x13f   : > { %1251 = vst.msk [vmem:[#allocation3 + $0x150] sm:$0xff] %vm304_vm0, %v1187_v27  ;;  %v2019_v62 = vadd.f32 %v1852_v6, %v1375_v35  ;;  %v4706_v57 = vpop.f32.mrb[44].mxu0  ;;  %v556_v30 = vld [vmem:[#allocation3 + $0x1b0] sm:$0xff] }
 0x140   : > { %2084 = vst.msk [vmem:[#allocation3 + $0x138] sm:$0xff] %vm304_vm0, %v2020_v33  ;;  %v1190_v3 = vadd.f32 %v4706_v57, %v547_v32  ;;  %v1046_v5 = vpop.f32.mrb[45].mxu0 }
 0x141   : > { %2083 = vst.msk [vmem:[#allocation3 + $0x130] sm:$0xff] %vm304_vm0, %v2019_v62  ;;  %v1189_v7 = vadd.f32 %v1046_v5, %v546_v40  ;;  %v1378_v9 = vld [vmem:[#allocation3 + $0x148] sm:$0xff]  ;;  %v4806_v43 = vpop.f32.mrb[44].mxu1 }
 0x142   : > { %1254 = vst.msk [vmem:[#allocation3 + $0x168] sm:$0xff] %vm304_vm0, %v1190_v3  ;;  %v2022_v11 = vadd.f32 %v4800_v25, %v1378_v9  ;;  %v1377_v13 = vld [vmem:[#allocation3 + $0x140] sm:$0xff]  ;;  %v1882_v28 = vpop.f32.mrb[45].mxu1  ;;  %v559_v3 = vld [vmem:[#allocation3 + $0x1c8] sm:$0xff] }
 0x143   : > { %1253 = vst.msk [vmem:[#allocation3 + $0x160] sm:$0xff] %vm304_vm0, %v1189_v7  ;;  %v2021_v23 = vadd.f32 %v1862_v22, %v1377_v13  ;;  %v4709_v26 = vpop.f32.mrb[46].mxu0  ;;  %v558_v9 = vld [vmem:[#allocation3 + $0x1c0] sm:$0xff] }
 0x144   : > { %2086 = vst.msk [vmem:[#allocation3 + $0x148] sm:$0xff] %vm304_vm0, %v2022_v11  ;;  %v1192_v31 = vadd.f32 %v4709_v26, %v549_v38  ;;  %v1056_v17 = vpop.f32.mrb[47].mxu0 }
 0x145   : > { %2085 = vst.msk [vmem:[#allocation3 + $0x140] sm:$0xff] %vm304_vm0, %v2021_v23  ;;  %v1191_v34 = vadd.f32 %v1056_v17, %v548_v19  ;;  %v1380_v37 = vld [vmem:[#allocation3 + $0x158] sm:$0xff]  ;;  %v4809_v45 = vpop.f32.mrb[46].mxu1 }
 0x146   : > { %1256 = vst.msk [vmem:[#allocation3 + $0x178] sm:$0xff] %vm304_vm0, %v1192_v31  ;;  %v2024_v42 = vadd.f32 %v4803_v60, %v1380_v37  ;;  %v1379_v47 = vld [vmem:[#allocation3 + $0x150] sm:$0xff]  ;;  %v1892_v55 = vpop.f32.mrb[47].mxu1  ;;  %v561_v31 = vld [vmem:[#allocation3 + $0x1d8] sm:$0xff] }
 0x147   : > { %1255 = vst.msk [vmem:[#allocation3 + $0x170] sm:$0xff] %vm304_vm0, %v1191_v34  ;;  %v2023_v49 = vadd.f32 %v1872_v1, %v1379_v47  ;;  %v4712_v52 = vpop.f32.mrb[48].mxu0  ;;  %v560_v37 = vld [vmem:[#allocation3 + $0x1d0] sm:$0xff] }
 0x148   : > { %2088 = vst.msk [vmem:[#allocation3 + $0x158] sm:$0xff] %vm304_vm0, %v2024_v42  ;;  %v1194_v53 = vadd.f32 %v4712_v52, %v551_v39  ;;  %v1066_v58 = vpop.f32.mrb[49].mxu0 }
 0x149   : > { %2087 = vst.msk [vmem:[#allocation3 + $0x150] sm:$0xff] %vm304_vm0, %v2023_v49  ;;  %v1193_v63 = vadd.f32 %v1066_v58, %v550_v50  ;;  %v1382_v51 = vld [vmem:[#allocation3 + $0x168] sm:$0xff]  ;;  %v4812_v8 = vpop.f32.mrb[48].mxu1 }
 0x14a   : > { %1258 = vst.msk [vmem:[#allocation3 + $0x188] sm:$0xff] %vm304_vm0, %v1194_v53  ;;  %v2026_v41 = vadd.f32 %v4806_v43, %v1382_v51  ;;  %v1381_v12 = vld [vmem:[#allocation3 + $0x160] sm:$0xff]  ;;  %v1902_v29 = vpop.f32.mrb[49].mxu1  ;;  %v563_v53 = vld [vmem:[#allocation3 + $0x1e8] sm:$0xff] }
 0x14b   : > { %1257 = vst.msk [vmem:[#allocation3 + $0x180] sm:$0xff] %vm304_vm0, %v1193_v63  ;;  %v2025_v44 = vadd.f32 %v1882_v28, %v1381_v12  ;;  %v4715_v61 = vpop.f32.mrb[50].mxu0  ;;  %v562_v51 = vld [vmem:[#allocation3 + $0x1e0] sm:$0xff] }
 0x14c   : > { %2090 = vst.msk [vmem:[#allocation3 + $0x168] sm:$0xff] %vm304_vm0, %v2026_v41  ;;  %v1196_v46 = vadd.f32 %v4715_v61, %v553_v2  ;;  %v1076_v10 = vpop.f32.mrb[51].mxu0 }
 0x14d   : > { %2089 = vst.msk [vmem:[#allocation3 + $0x160] sm:$0xff] %vm304_vm0, %v2025_v44  ;;  %v1195_v48 = vadd.f32 %v1076_v10, %v552_v4  ;;  %v1384_v6 = vld [vmem:[#allocation3 + $0x178] sm:$0xff]  ;;  %v4815_v0 = vpop.f32.mrb[50].mxu1 }
 0x14e   : > { %1260 = vst.msk [vmem:[#allocation3 + $0x198] sm:$0xff] %vm304_vm0, %v1196_v46  ;;  %v2028_v56 = vadd.f32 %v4809_v45, %v1384_v6  ;;  %v1383_v15 = vld [vmem:[#allocation3 + $0x170] sm:$0xff]  ;;  %v1912_v16 = vpop.f32.mrb[51].mxu1  ;;  %v565_v46 = vld [vmem:[#allocation3 + $0x1f8] sm:$0xff] }
 0x14f   : > { %1259 = vst.msk [vmem:[#allocation3 + $0x190] sm:$0xff] %vm304_vm0, %v1195_v48  ;;  %v2027_v21 = vadd.f32 %v1892_v55, %v1383_v15  ;;  %v4718_v14 = vpop.f32.mrb[52].mxu0  ;;  %v564_v6 = vld [vmem:[#allocation3 + $0x1f0] sm:$0xff] }
 0x150   : > { %2092 = vst.msk [vmem:[#allocation3 + $0x178] sm:$0xff] %vm304_vm0, %v2028_v56  ;;  %v1198_v25 = vadd.f32 %v4718_v14, %v555_v54  ;;  %v1086_v18 = vpop.f32.mrb[53].mxu0 }
 0x151   : > { %2091 = vst.msk [vmem:[#allocation3 + $0x170] sm:$0xff] %vm304_vm0, %v2027_v21  ;;  %v1197_v20 = vadd.f32 %v1086_v18, %v554_v59  ;;  %v1386_v22 = vld [vmem:[#allocation3 + $0x188] sm:$0xff]  ;;  %v4818_v32 = vpop.f32.mrb[52].mxu1 }
 0x152   : > { %1262 = vst.msk [vmem:[#allocation3 + $0x1a8] sm:$0xff] %vm304_vm0, %v1198_v25  ;;  %v2030_v36 = vadd.f32 %v4812_v8, %v1386_v22  ;;  %v1385_v27 = vld [vmem:[#allocation3 + $0x180] sm:$0xff]  ;;  %v1922_v40 = vpop.f32.mrb[53].mxu1 }
 0x153   : > { %1261 = vst.msk [vmem:[#allocation3 + $0x1a0] sm:$0xff] %vm304_vm0, %v1197_v20  ;;  %v2029_v33 = vadd.f32 %v1902_v29, %v1385_v27  ;;  %v4721_v35 = vpop.f32.mrb[54].mxu0 }
 0x154   : > { %2094 = vst.msk [vmem:[#allocation3 + $0x188] sm:$0xff] %vm304_vm0, %v2030_v36  ;;  %v1200_v60 = vadd.f32 %v4721_v35, %v557_v24  ;;  %v1096_v62 = vpop.f32.mrb[55].mxu0  ;;  %v2174_v24 = vld [vmem:[#allocation3 + $0x8] sm:$0xff] }
 0x155   : > { %2093 = vst.msk [vmem:[#allocation3 + $0x180] sm:$0xff] %vm304_vm0, %v2029_v33  ;;  %v1199_v57 = vadd.f32 %v1096_v62, %v556_v30  ;;  %v1388_v1 = vld [vmem:[#allocation3 + $0x198] sm:$0xff]  ;;  %v4821_v38 = vpop.f32.mrb[54].mxu1 }
 0x156   : > { %1264 = vst.msk [vmem:[#allocation3 + $0x1b8] sm:$0xff] %vm304_vm0, %v1200_v60  ;;  %v2032_v5 = vadd.f32 %v4815_v0, %v1388_v1  ;;  %v1387_v7 = vld [vmem:[#allocation3 + $0x190] sm:$0xff]  ;;  %v1932_v19 = vpop.f32.mrb[55].mxu1 }
 0x157   : > { %1263 = vst.msk [vmem:[#allocation3 + $0x1b0] sm:$0xff] %vm304_vm0, %v1199_v57  ;;  %v2031_v11 = vadd.f32 %v1912_v16, %v1387_v7  ;;  %v4724_v13 = vpop.f32.mrb[56].mxu0 }
 0x158   : > { %2096 = vst.msk [vmem:[#allocation3 + $0x198] sm:$0xff] %vm304_vm0, %v2032_v5  ;;  %v1202_v43 = vadd.f32 %v4724_v13, %v559_v3  ;;  %v1106_v23 = vpop.f32.mrb[57].mxu0  ;;  %v2176_v3 = vld [vmem:[#allocation3 + $0x18] sm:$0xff] }
 0x159   : > { %2095 = vst.msk [vmem:[#allocation3 + $0x190] sm:$0xff] %vm304_vm0, %v2031_v11  ;;  %v1201_v26 = vadd.f32 %v1106_v23, %v558_v9  ;;  %v1390_v28 = vld [vmem:[#allocation3 + $0x1a8] sm:$0xff]  ;;  %v4824_v39 = vpop.f32.mrb[56].mxu1 }
 0x15a   : > { %1266 = vst.msk [vmem:[#allocation3 + $0x1c8] sm:$0xff] %vm304_vm0, %v1202_v43  ;;  %v2034_v17 = vadd.f32 %v4818_v32, %v1390_v28  ;;  %v1389_v34 = vld [vmem:[#allocation3 + $0x1a0] sm:$0xff]  ;;  %v1942_v50 = vpop.f32.mrb[57].mxu1 }
 0x15b   : > { %1265 = vst.msk [vmem:[#allocation3 + $0x1c0] sm:$0xff] %vm304_vm0, %v1201_v26  ;;  %v2033_v42 = vadd.f32 %v1922_v40, %v1389_v34  ;;  %v4727_v47 = vpop.f32.mrb[58].mxu0  ;;  %v2173_v32 = vld [vmem:[#allocation3] sm:$0xff] }
 0x15c   : > { %2098 = vst.msk [vmem:[#allocation3 + $0x1a8] sm:$0xff] %vm304_vm0, %v2034_v17  ;;  %v1204_v45 = vadd.f32 %v4727_v47, %v561_v31  ;;  %v1116_v49 = vpop.f32.mrb[59].mxu0  ;;  %v2178_v31 = vld [vmem:[#allocation3 + $0x28] sm:$0xff] }
 0x15d   : > { %2097 = vst.msk [vmem:[#allocation3 + $0x1a0] sm:$0xff] %vm304_vm0, %v2033_v42  ;;  %v1203_v52 = vadd.f32 %v1116_v49, %v560_v37  ;;  %v1392_v55 = vld [vmem:[#allocation3 + $0x1b8] sm:$0xff]  ;;  %v4827_v2 = vpop.f32.mrb[58].mxu1 }
 0x15e   : > { %1268 = vst.msk [vmem:[#allocation3 + $0x1d8] sm:$0xff] %vm304_vm0, %v1204_v45  ;;  %v2036_v58 = vadd.f32 %v4821_v38, %v1392_v55  ;;  %v1391_v63 = vld [vmem:[#allocation3 + $0x1b0] sm:$0xff]  ;;  %v1952_v4 = vpop.f32.mrb[59].mxu1 }
 0x15f   : > { %1267 = vst.msk [vmem:[#allocation3 + $0x1d0] sm:$0xff] %vm304_vm0, %v1203_v52  ;;  %v2035_v41 = vadd.f32 %v1932_v19, %v1391_v63  ;;  %v4730_v12 = vpop.f32.mrb[60].mxu0  ;;  %v2175_v38 = vld [vmem:[#allocation3 + $0x10] sm:$0xff] }
 0x160   : > { %2100 = vst.msk [vmem:[#allocation3 + $0x1b8] sm:$0xff] %vm304_vm0, %v2036_v58  ;;  %v1206_v8 = vadd.f32 %v4730_v12, %v563_v53  ;;  %v1126_v44 = vpop.f32.mrb[61].mxu0  ;;  %v2180_v53 = vld [vmem:[#allocation3 + $0x38] sm:$0xff] }
 0x161   : > { %2099 = vst.msk [vmem:[#allocation3 + $0x1b0] sm:$0xff] %vm304_vm0, %v2035_v41  ;;  %v1205_v61 = vadd.f32 %v1126_v44, %v562_v51  ;;  %v1394_v29 = vld [vmem:[#allocation3 + $0x1c8] sm:$0xff]  ;;  %v4830_v54 = vpop.f32.mrb[60].mxu1 }
 0x162   : > { %1270 = vst.msk [vmem:[#allocation3 + $0x1e8] sm:$0xff] %vm304_vm0, %v1206_v8  ;;  %v2038_v10 = vadd.f32 %v4824_v39, %v1394_v29  ;;  %v1393_v48 = vld [vmem:[#allocation3 + $0x1c0] sm:$0xff]  ;;  %v1962_v59 = vpop.f32.mrb[61].mxu1 }
 0x163   : > { %1269 = vst.msk [vmem:[#allocation3 + $0x1e0] sm:$0xff] %vm304_vm0, %v1205_v61  ;;  %v2037_v56 = vadd.f32 %v1942_v50, %v1393_v48  ;;  %v4733_v15 = vpop.f32.mrb[62].mxu0  ;;  %v2177_v39 = vld [vmem:[#allocation3 + $0x20] sm:$0xff] }
 0x164   : > { %2102 = vst.msk [vmem:[#allocation3 + $0x1c8] sm:$0xff] %vm304_vm0, %v2038_v10  ;;  %v1208_v0 = vadd.f32 %v4733_v15, %v565_v46  ;;  %v1136_v21 = vpop.f32.mrb[63].mxu0  ;;  %v2182_v46 = vld [vmem:[#allocation3 + $0x48] sm:$0xff]  ;;  %v6056_v15 = vld [vmem:[%s6459_s4] ss:$0 sm:$0xff] }
 0x165   : > { %2101 = vst.msk [vmem:[#allocation3 + $0x1c0] sm:$0xff] %vm304_vm0, %v2037_v56  ;;  %v1207_v14 = vadd.f32 %v1136_v21, %v564_v6  ;;  %v1396_v16 = vld [vmem:[#allocation3 + $0x1d8] sm:$0xff]  ;;  %v4833_v20 = vpop.f32.mrb[62].mxu1 }
 0x166   : > { %1272 = vst.msk [vmem:[#allocation3 + $0x1f8] sm:$0xff] %vm304_vm0, %v1208_v0  ;;  %v2040_v25 = vadd.f32 %v4827_v2, %v1396_v16  ;;  %v1395_v18 = vld [vmem:[#allocation3 + $0x1d0] sm:$0xff]  ;;  %v1972_v27 = vpop.f32.mrb[63].mxu1 }
 0x167   : > { %1271 = vst.msk [vmem:[#allocation3 + $0x1f0] sm:$0xff] %vm304_vm0, %v1207_v14  ;;  %v2039_v22 = vadd.f32 %v1952_v4, %v1395_v18  ;;  %v4840_v36 = vpop.f32.mrb[64].mxu0  ;;  %v2179_v2 = vld [vmem:[#allocation3 + $0x30] sm:$0xff]  ;;  %v6064_v18 = vld [vmem:[%s6460_s5] ss:$0 sm:$0xff] }
 0x168   : > { %2104 = vst.msk [vmem:[#allocation3 + $0x1d8] sm:$0xff] %vm304_vm0, %v2040_v25  ;;  %v2818_v30 = vadd.f32 %v4840_v36, %v2174_v24  ;;  %v2498_v33 = vpop.f32.mrb[65].mxu0 }
 0x169   : > { %2103 = vst.msk [vmem:[#allocation3 + $0x1d0] sm:$0xff] %vm304_vm0, %v2039_v22  ;;  %v1398_v35 = vld [vmem:[#allocation3 + $0x1e8] sm:$0xff]  ;;  %v2817_v40 = vadd.f32 %v2498_v33, %v2173_v32  ;;  %v4940_v57 = vpop.f32.mrb[64].mxu1  ;;  %v2184_v22 = vld [vmem:[#allocation3 + $0x58] sm:$0xff]  ;;  %v2183_v33 = vld [vmem:[#allocation3 + $0x50] sm:$0xff] }
 0x16a   : > { %2882 = vst.msk [vmem:[#allocation3 + $0x8] sm:$0xff] %vm304_vm0, %v2818_v30  ;;  %v2042_v60 = vadd.f32 %v4830_v54, %v1398_v35  ;;  %v1397_v62 = vld [vmem:[#allocation3 + $0x1e0] sm:$0xff]  ;;  %v3334_v7 = vpop.f32.mrb[65].mxu1 }
 0x16b   : > { %2881 = vst.msk [vmem:[#allocation3] sm:$0xff] %vm304_vm0, %v2817_v40  ;;  %v2041_v1 = vadd.f32 %v1962_v59, %v1397_v62  ;;  %v4843_v5 = vpop.f32.mrb[66].mxu0  ;;  %v2181_v54 = vld [vmem:[#allocation3 + $0x40] sm:$0xff] }
 0x16c   : > { %2106 = vst.msk [vmem:[#allocation3 + $0x1e8] sm:$0xff] %vm304_vm0, %v2042_v60  ;;  %v2820_v9 = vadd.f32 %v4843_v5, %v2176_v3  ;;  %v2508_v11 = vpop.f32.mrb[67].mxu0 }
 0x16d   : > { %2105 = vst.msk [vmem:[#allocation3 + $0x1e0] sm:$0xff] %vm304_vm0, %v2041_v1  ;;  %v1400_v13 = vld [vmem:[#allocation3 + $0x1f8] sm:$0xff]  ;;  %v2819_v19 = vadd.f32 %v2508_v11, %v2175_v38  ;;  %v4943_v26 = vpop.f32.mrb[66].mxu1  ;;  %v2186_v11 = vld [vmem:[#allocation3 + $0x68] sm:$0xff] }
 0x16e   : > { %2884 = vst.msk [vmem:[#allocation3 + $0x18] sm:$0xff] %vm304_vm0, %v2820_v9  ;;  %v2044_v43 = vadd.f32 %v4833_v20, %v1400_v13  ;;  %v1399_v23 = vld [vmem:[#allocation3 + $0x1f0] sm:$0xff]  ;;  %v3344_v34 = vpop.f32.mrb[67].mxu1 }
 0x16f   : > { %2883 = vst.msk [vmem:[#allocation3 + $0x10] sm:$0xff] %vm304_vm0, %v2819_v19  ;;  %v2043_v28 = vadd.f32 %v1972_v27, %v1399_v23  ;;  %v4846_v17 = vpop.f32.mrb[68].mxu0 }
 0x170   : > { %2108 = vst.msk [vmem:[#allocation3 + $0x1f8] sm:$0xff] %vm304_vm0, %v2044_v43  ;;  %v2822_v37 = vadd.f32 %v4846_v17, %v2178_v31  ;;  %v2518_v42 = vpop.f32.mrb[69].mxu0 }
 0x171   : > { %2107 = vst.msk [vmem:[#allocation3 + $0x1f0] sm:$0xff] %vm304_vm0, %v2043_v28  ;;  %v2821_v47 = vadd.f32 %v2518_v42, %v2177_v39  ;;  %v3010_v50 = vld [vmem:[#allocation3 + $0x8] sm:$0xff]  ;;  %v4946_v52 = vpop.f32.mrb[68].mxu1  ;;  %v2185_v28 = vld [vmem:[#allocation3 + $0x60] sm:$0xff] }
 0x172   : > { %2886 = vst.msk [vmem:[#allocation3 + $0x28] sm:$0xff] %vm304_vm0, %v2822_v37  ;;  %v3654_v45 = vadd.f32 %v4940_v57, %v3010_v50  ;;  %v3009_v49 = vld [vmem:[#allocation3] sm:$0xff]  ;;  %v3354_v63 = vpop.f32.mrb[69].mxu1 }
 0x173   : > { %2885 = vst.msk [vmem:[#allocation3 + $0x20] sm:$0xff] %vm304_vm0, %v2821_v47  ;;  %v3653_v55 = vadd.f32 %v3334_v7, %v3009_v49  ;;  %v4849_v58 = vpop.f32.mrb[70].mxu0 }
 0x174   : > { %3718 = vst.msk [vmem:[#allocation3 + $0x8] sm:$0xff] %vm304_vm0, %v3654_v45  ;;  %v2824_v51 = vadd.f32 %v4849_v58, %v2180_v53  ;;  %v2528_v41 = vpop.f32.mrb[71].mxu0 }
 0x175   : > { %3717 = vst.msk [vmem:[#allocation3] sm:$0xff] %vm304_vm0, %v3653_v55  ;;  %v2823_v12 = vadd.f32 %v2528_v41, %v2179_v2  ;;  %v3012_v4 = vld [vmem:[#allocation3 + $0x18] sm:$0xff]  ;;  %v4949_v61 = vpop.f32.mrb[70].mxu1  ;;  %v2187_v41 = vld [vmem:[#allocation3 + $0x70] sm:$0xff] }
 0x176   : > { %2888 = vst.msk [vmem:[#allocation3 + $0x38] sm:$0xff] %vm304_vm0, %v2824_v51  ;;  %v3656_v8 = vadd.f32 %v4943_v26, %v3012_v4  ;;  %v3011_v44 = vld [vmem:[#allocation3 + $0x10] sm:$0xff]  ;;  %v3364_v48 = vpop.f32.mrb[71].mxu1  ;;  %v2188_v55 = vld [vmem:[#allocation3 + $0x78] sm:$0xff] }
 0x177   : > { %2887 = vst.msk [vmem:[#allocation3 + $0x30] sm:$0xff] %vm304_vm0, %v2823_v12  ;;  %v3655_v29 = vadd.f32 %v3344_v34, %v3011_v44  ;;  %v4852_v10 = vpop.f32.mrb[72].mxu0 }
 0x178   : > { %3720 = vst.msk [vmem:[#allocation3 + $0x18] sm:$0xff] %vm304_vm0, %v3656_v8  ;;  %v2826_v6 = vadd.f32 %v4852_v10, %v2182_v46  ;;  %v2538_v56 = vpop.f32.mrb[73].mxu0 }
 0x179   : > { %3719 = vst.msk [vmem:[#allocation3 + $0x10] sm:$0xff] %vm304_vm0, %v3655_v29  ;;  %v2825_v59 = vadd.f32 %v2538_v56, %v2181_v54  ;;  %v3014_v0 = vld [vmem:[#allocation3 + $0x28] sm:$0xff]  ;;  %v4952_v16 = vpop.f32.mrb[72].mxu1 }
 0x17a   : > { %2890 = vst.msk [vmem:[#allocation3 + $0x48] sm:$0xff] %vm304_vm0, %v2826_v6  ;;  %v3658_v21 = vadd.f32 %v4946_v52, %v3014_v0  ;;  %v3013_v14 = vld [vmem:[#allocation3 + $0x20] sm:$0xff]  ;;  %v3374_v36 = vpop.f32.mrb[73].mxu1  ;;  %v2190_v56 = vld [vmem:[#allocation3 + $0x88] sm:$0xff] }
 0x17b   : > { %v3782_v25 = vld [vmem:[#allocation3 + $0x8] sm:$0xff]  ;;  %2889 = vst.msk [vmem:[#allocation3 + $0x40] sm:$0xff] %vm304_vm0, %v2825_v59  ;;  %v3657_v20 = vadd.f32 %v3354_v63, %v3013_v14  ;;  %v4855_v24 = vpop.f32.mrb[74].mxu0 }
 0x17c   : > { %v3853_v27 = vmul.f32 %v6056_v15, %v3782_v25  ;;  %v3781_v30 = vld [vmem:[#allocation3] sm:$0xff]  ;;  %3722 = vst.msk [vmem:[#allocation3 + $0x28] sm:$0xff] %vm304_vm0, %v3658_v21  ;;  %v2828_v32 = vadd.f32 %v4855_v24, %v2184_v22  ;;  %v2548_v35 = vpop.f32.mrb[75].mxu0 }
 0x17d   : > { %v3852_v40 = vmul.f32 %v6056_v15, %v3781_v30  ;;  %3721 = vst.msk [vmem:[#allocation3 + $0x20] sm:$0xff] %vm304_vm0, %v3657_v20  ;;  %v2827_v60 = vadd.f32 %v2548_v35, %v2183_v33  ;;  %v3016_v62 = vld [vmem:[#allocation3 + $0x38] sm:$0xff]  ;;  %v4955_v5 = vpop.f32.mrb[74].mxu1  ;;  %v2189_v25 = vld [vmem:[#allocation3 + $0x80] sm:$0xff] }
 0x17e   : > { %v3924_v57 = vadd.f32 %v6064_v18, %v3853_v27  ;;  %2892 = vst.msk [vmem:[#allocation3 + $0x58] sm:$0xff] %vm304_vm0, %v2828_v32  ;;  %v3660_v1 = vadd.f32 %v4949_v61, %v3016_v62  ;;  %v3015_v3 = vld [vmem:[#allocation3 + $0x30] sm:$0xff]  ;;  %v3384_v19 = vpop.f32.mrb[75].mxu1  ;;  %v2192_v62 = vld [vmem:[#allocation3 + $0x98] sm:$0xff] }
 0x17f   : > { %v3923_v7 = vadd.f32 %v6064_v18, %v3852_v40  ;;  %v3784_v9 = vld [vmem:[#allocation3 + $0x18] sm:$0xff]  ;;  %2891 = vst.msk [vmem:[#allocation3 + $0x50] sm:$0xff] %vm304_vm0, %v2827_v60  ;;  %v3659_v38 = vadd.f32 %v3364_v48, %v3015_v3  ;;  %v4858_v13 = vpop.f32.mrb[76].mxu0 }
 0x180   : > { %3988 = vst.msk [vmem:[%s6072_s24 + $0x8] sm:$0xff] %vm304_vm0, %v3924_v57  ;;  %v3855_v43 = vmul.f32 %v6056_v15, %v3784_v9  ;;  %v3783_v23 = vld [vmem:[#allocation3 + $0x10] sm:$0xff]  ;;  %3724 = vst.msk [vmem:[#allocation3 + $0x38] sm:$0xff] %vm304_vm0, %v3660_v1  ;;  %v2830_v26 = vadd.f32 %v4858_v13, %v2186_v11  ;;  %v2558_v31 = vpop.f32.mrb[77].mxu0 }
 0x181   : > { %3987 = vst.msk [vmem:[%s6072_s24] sm:$0xff] %vm304_vm0, %v3923_v7  ;;  %v3854_v17 = vmul.f32 %v6056_v15, %v3783_v23  ;;  %3723 = vst.msk [vmem:[#allocation3 + $0x30] sm:$0xff] %vm304_vm0, %v3659_v38  ;;  %v2829_v34 = vadd.f32 %v2558_v31, %v2185_v28  ;;  %v3018_v37 = vld [vmem:[#allocation3 + $0x48] sm:$0xff]  ;;  %v4958_v50 = vpop.f32.mrb[76].mxu1  ;;  %v2191_v9 = vld [vmem:[#allocation3 + $0x90] sm:$0xff] }
 0x182   : > { %v3926_v39 = vadd.f32 %v6064_v18, %v3855_v43  ;;  %2894 = vst.msk [vmem:[#allocation3 + $0x68] sm:$0xff] %vm304_vm0, %v2830_v26  ;;  %v3662_v42 = vadd.f32 %v4952_v16, %v3018_v37  ;;  %v3017_v47 = vld [vmem:[#allocation3 + $0x40] sm:$0xff]  ;;  %v3394_v58 = vpop.f32.mrb[77].mxu1  ;;  %v2194_v37 = vld [vmem:[#allocation3 + $0xa8] sm:$0xff] }
 0x183   : > { %v3925_v45 = vadd.f32 %v6064_v18, %v3854_v17  ;;  %v3786_v49 = vld [vmem:[#allocation3 + $0x28] sm:$0xff]  ;;  %2893 = vst.msk [vmem:[#allocation3 + $0x60] sm:$0xff] %vm304_vm0, %v2829_v34  ;;  %v3661_v52 = vadd.f32 %v3374_v36, %v3017_v47  ;;  %v4861_v53 = vpop.f32.mrb[78].mxu0 }
 0x184   : > { %3990 = vst.msk [vmem:[%s6072_s24 + $0x18] sm:$0xff] %vm304_vm0, %v3926_v39  ;;  %v3857_v63 = vmul.f32 %v6056_v15, %v3786_v49  ;;  %v3785_v51 = vld [vmem:[#allocation3 + $0x20] sm:$0xff]  ;;  %3726 = vst.msk [vmem:[#allocation3 + $0x48] sm:$0xff] %vm304_vm0, %v3662_v42  ;;  %v2832_v2 = vadd.f32 %v4861_v53, %v2188_v55  ;;  %v2568_v12 = vpop.f32.mrb[79].mxu0 }
 0x185   : > { %3989 = vst.msk [vmem:[%s6072_s24 + $0x10] sm:$0xff] %vm304_vm0, %v3925_v45  ;;  %v3856_v4 = vmul.f32 %v6056_v15, %v3785_v51  ;;  %3725 = vst.msk [vmem:[#allocation3 + $0x40] sm:$0xff] %vm304_vm0, %v3661_v52  ;;  %v2831_v8 = vadd.f32 %v2568_v12, %v2187_v41  ;;  %v3020_v44 = vld [vmem:[#allocation3 + $0x58] sm:$0xff]  ;;  %v4961_v10 = vpop.f32.mrb[78].mxu1  ;;  %v2193_v49 = vld [vmem:[#allocation3 + $0xa0] sm:$0xff] }
 0x186   : > { %v3928_v61 = vadd.f32 %v6064_v18, %v3857_v63  ;;  %2896 = vst.msk [vmem:[#allocation3 + $0x78] sm:$0xff] %vm304_vm0, %v2832_v2  ;;  %v3664_v29 = vadd.f32 %v4955_v5, %v3020_v44  ;;  %v3019_v46 = vld [vmem:[#allocation3 + $0x50] sm:$0xff]  ;;  %v3404_v0 = vpop.f32.mrb[79].mxu1  ;;  %v2196_v44 = vld [vmem:[#allocation3 + $0xb8] sm:$0xff] }
 0x187   : > { %v3927_v48 = vadd.f32 %v6064_v18, %v3856_v4  ;;  %v3788_v6 = vld [vmem:[#allocation3 + $0x38] sm:$0xff]  ;;  %2895 = vst.msk [vmem:[#allocation3 + $0x70] sm:$0xff] %vm304_vm0, %v2831_v8  ;;  %v3663_v54 = vadd.f32 %v3384_v19, %v3019_v46  ;;  %v4864_v59 = vpop.f32.mrb[80].mxu0 }
 0x188   : > { %3992 = vst.msk [vmem:[%s6072_s24 + $0x28] sm:$0xff] %vm304_vm0, %v3928_v61  ;;  %v3859_v21 = vmul.f32 %v6056_v15, %v3788_v6  ;;  %v3787_v14 = vld [vmem:[#allocation3 + $0x30] sm:$0xff]  ;;  %3728 = vst.msk [vmem:[#allocation3 + $0x58] sm:$0xff] %vm304_vm0, %v3664_v29  ;;  %v2834_v16 = vadd.f32 %v4864_v59, %v2190_v56  ;;  %v2578_v20 = vpop.f32.mrb[81].mxu0 }
 0x189   : > { %3991 = vst.msk [vmem:[%s6072_s24 + $0x20] sm:$0xff] %vm304_vm0, %v3927_v48  ;;  %v3858_v22 = vmul.f32 %v6056_v15, %v3787_v14  ;;  %3727 = vst.msk [vmem:[#allocation3 + $0x50] sm:$0xff] %vm304_vm0, %v3663_v54  ;;  %v2833_v24 = vadd.f32 %v2578_v20, %v2189_v25  ;;  %v3022_v36 = vld [vmem:[#allocation3 + $0x68] sm:$0xff]  ;;  %v4964_v33 = vpop.f32.mrb[80].mxu1  ;;  %v2195_v6 = vld [vmem:[#allocation3 + $0xb0] sm:$0xff] }
 0x18a   : > { %v3930_v27 = vadd.f32 %v6064_v18, %v3859_v21  ;;  %2898 = vst.msk [vmem:[#allocation3 + $0x88] sm:$0xff] %vm304_vm0, %v2834_v16  ;;  %v3666_v30 = vadd.f32 %v4958_v50, %v3022_v36  ;;  %v3021_v32 = vld [vmem:[#allocation3 + $0x60] sm:$0xff]  ;;  %v3414_v1 = vpop.f32.mrb[81].mxu1  ;;  %v2198_v36 = vld [vmem:[#allocation3 + $0xc8] sm:$0xff] }
 0x18b   : > { %v3929_v35 = vadd.f32 %v6064_v18, %v3858_v22  ;;  %v3790_v40 = vld [vmem:[#allocation3 + $0x48] sm:$0xff]  ;;  %2897 = vst.msk [vmem:[#allocation3 + $0x80] sm:$0xff] %vm304_vm0, %v2833_v24  ;;  %v3665_v60 = vadd.f32 %v3394_v58, %v3021_v32  ;;  %v4867_v57 = vpop.f32.mrb[82].mxu0 }
 0x18c   : > { %3994 = vst.msk [vmem:[%s6072_s24 + $0x38] sm:$0xff] %vm304_vm0, %v3930_v27  ;;  %v3861_v3 = vmul.f32 %v6056_v15, %v3790_v40  ;;  %v3789_v5 = vld [vmem:[#allocation3 + $0x40] sm:$0xff]  ;;  %3730 = vst.msk [vmem:[#allocation3 + $0x68] sm:$0xff] %vm304_vm0, %v3666_v30  ;;  %v2836_v7 = vadd.f32 %v4867_v57, %v2192_v62  ;;  %v2588_v38 = vpop.f32.mrb[83].mxu0 }
 0x18d   : > { %3993 = vst.msk [vmem:[%s6072_s24 + $0x30] sm:$0xff] %vm304_vm0, %v3929_v35  ;;  %v3860_v11 = vmul.f32 %v6056_v15, %v3789_v5  ;;  %3729 = vst.msk [vmem:[#allocation3 + $0x60] sm:$0xff] %vm304_vm0, %v3665_v60  ;;  %v2835_v13 = vadd.f32 %v2588_v38, %v2191_v9  ;;  %v3024_v19 = vld [vmem:[#allocation3 + $0x78] sm:$0xff]  ;;  %v4967_v28 = vpop.f32.mrb[82].mxu1  ;;  %v2197_v40 = vld [vmem:[#allocation3 + $0xc0] sm:$0xff] }
 0x18e   : > { %v3932_v43 = vadd.f32 %v6064_v18, %v3861_v3  ;;  %2900 = vst.msk [vmem:[#allocation3 + $0x98] sm:$0xff] %vm304_vm0, %v2836_v7  ;;  %v3668_v23 = vadd.f32 %v4961_v10, %v3024_v19  ;;  %v3023_v26 = vld [vmem:[#allocation3 + $0x70] sm:$0xff]  ;;  %v3424_v42 = vpop.f32.mrb[83].mxu1  ;;  %v2200_v19 = vld [vmem:[#allocation3 + $0xd8] sm:$0xff] }
 0x18f   : > { %v3931_v31 = vadd.f32 %v6064_v18, %v3860_v11  ;;  %v3792_v17 = vld [vmem:[#allocation3 + $0x58] sm:$0xff]  ;;  %2899 = vst.msk [vmem:[#allocation3 + $0x90] sm:$0xff] %vm304_vm0, %v2835_v13  ;;  %v3667_v34 = vadd.f32 %v3404_v0, %v3023_v26  ;;  %v4870_v39 = vpop.f32.mrb[84].mxu0 }
 0x190   : > { %3996 = vst.msk [vmem:[%s6072_s24 + $0x48] sm:$0xff] %vm304_vm0, %v3932_v43  ;;  %v3863_v47 = vmul.f32 %v6056_v15, %v3792_v17  ;;  %v3791_v50 = vld [vmem:[#allocation3 + $0x50] sm:$0xff]  ;;  %3732 = vst.msk [vmem:[#allocation3 + $0x78] sm:$0xff] %vm304_vm0, %v3668_v23  ;;  %v2838_v45 = vadd.f32 %v4870_v39, %v2194_v37  ;;  %v2598_v52 = vpop.f32.mrb[85].mxu0 }
 0x191   : > { %3995 = vst.msk [vmem:[%s6072_s24 + $0x40] sm:$0xff] %vm304_vm0, %v3931_v31  ;;  %v3862_v55 = vmul.f32 %v6056_v15, %v3791_v50  ;;  %3731 = vst.msk [vmem:[#allocation3 + $0x70] sm:$0xff] %vm304_vm0, %v3667_v34  ;;  %v2837_v53 = vadd.f32 %v2598_v52, %v2193_v49  ;;  %v3026_v58 = vld [vmem:[#allocation3 + $0x88] sm:$0xff]  ;;  %v4970_v41 = vpop.f32.mrb[84].mxu1  ;;  %v2199_v17 = vld [vmem:[#allocation3 + $0xd0] sm:$0xff] }
 0x192   : > { %v3934_v63 = vadd.f32 %v6064_v18, %v3863_v47  ;;  %2902 = vst.msk [vmem:[#allocation3 + $0xa8] sm:$0xff] %vm304_vm0, %v2838_v45  ;;  %v3670_v51 = vadd.f32 %v4964_v33, %v3026_v58  ;;  %v3025_v2 = vld [vmem:[#allocation3 + $0x80] sm:$0xff]  ;;  %v3434_v29 = vpop.f32.mrb[85].mxu1  ;;  %v2202_v58 = vld [vmem:[#allocation3 + $0xe8] sm:$0xff] }
 0x193   : > { %v3933_v12 = vadd.f32 %v6064_v18, %v3862_v55  ;;  %v3794_v4 = vld [vmem:[#allocation3 + $0x68] sm:$0xff]  ;;  %2901 = vst.msk [vmem:[#allocation3 + $0xa0] sm:$0xff] %vm304_vm0, %v2837_v53  ;;  %v3669_v8 = vadd.f32 %v3414_v1, %v3025_v2  ;;  %v4873_v61 = vpop.f32.mrb[86].mxu0 }
 0x194   : > { %3998 = vst.msk [vmem:[%s6072_s24 + $0x58] sm:$0xff] %vm304_vm0, %v3934_v63  ;;  %v3865_v46 = vmul.f32 %v6056_v15, %v3794_v4  ;;  %v3793_v10 = vld [vmem:[#allocation3 + $0x60] sm:$0xff]  ;;  %3734 = vst.msk [vmem:[#allocation3 + $0x88] sm:$0xff] %vm304_vm0, %v3670_v51  ;;  %v2840_v48 = vadd.f32 %v4873_v61, %v2196_v44  ;;  %v2608_v54 = vpop.f32.mrb[87].mxu0 }
 0x195   : > { %3997 = vst.msk [vmem:[%s6072_s24 + $0x50] sm:$0xff] %vm304_vm0, %v3933_v12  ;;  %v3864_v56 = vmul.f32 %v6056_v15, %v3793_v10  ;;  %3733 = vst.msk [vmem:[#allocation3 + $0x80] sm:$0xff] %vm304_vm0, %v3669_v8  ;;  %v2839_v59 = vadd.f32 %v2608_v54, %v2195_v6  ;;  %v3028_v0 = vld [vmem:[#allocation3 + $0x98] sm:$0xff]  ;;  %v4973_v25 = vpop.f32.mrb[86].mxu1  ;;  %v2201_v4 = vld [vmem:[#allocation3 + $0xe0] sm:$0xff] }
 0x196   : > { %v3936_v21 = vadd.f32 %v6064_v18, %v3865_v46  ;;  %2904 = vst.msk [vmem:[#allocation3 + $0xb8] sm:$0xff] %vm304_vm0, %v2840_v48  ;;  %v3672_v14 = vadd.f32 %v4967_v28, %v3028_v0  ;;  %v3027_v16 = vld [vmem:[#allocation3 + $0x90] sm:$0xff]  ;;  %v3444_v30 = vpop.f32.mrb[87].mxu1  ;;  %v2204_v0 = vld [vmem:[#allocation3 + $0xf8] sm:$0xff] }
 0x197   : > { %v3935_v20 = vadd.f32 %v6064_v18, %v3864_v56  ;;  %v3796_v22 = vld [vmem:[#allocation3 + $0x78] sm:$0xff]  ;;  %2903 = vst.msk [vmem:[#allocation3 + $0xb0] sm:$0xff] %vm304_vm0, %v2839_v59  ;;  %v3671_v24 = vadd.f32 %v3424_v42, %v3027_v16  ;;  %v4876_v27 = vpop.f32.mrb[88].mxu0 }
 0x198   : > { %4000 = vst.msk [vmem:[%s6072_s24 + $0x68] sm:$0xff] %vm304_vm0, %v3936_v21  ;;  %v3867_v32 = vmul.f32 %v6056_v15, %v3796_v22  ;;  %v3795_v33 = vld [vmem:[#allocation3 + $0x70] sm:$0xff]  ;;  %3736 = vst.msk [vmem:[#allocation3 + $0x98] sm:$0xff] %vm304_vm0, %v3672_v14  ;;  %v2842_v35 = vadd.f32 %v4876_v27, %v2198_v36  ;;  %v2618_v60 = vpop.f32.mrb[89].mxu0 }
 0x199   : > { %3999 = vst.msk [vmem:[%s6072_s24 + $0x60] sm:$0xff] %vm304_vm0, %v3935_v20  ;;  %v3866_v62 = vmul.f32 %v6056_v15, %v3795_v33  ;;  %3735 = vst.msk [vmem:[#allocation3 + $0x90] sm:$0xff] %vm304_vm0, %v3671_v24  ;;  %v2841_v57 = vadd.f32 %v2618_v60, %v2197_v40  ;;  %v3030_v1 = vld [vmem:[#allocation3 + $0xa8] sm:$0xff]  ;;  %v4976_v9 = vpop.f32.mrb[88].mxu1  ;;  %v2203_v22 = vld [vmem:[#allocation3 + $0xf0] sm:$0xff] }
 0x19a   : > { %v3938_v3 = vadd.f32 %v6064_v18, %v3867_v32  ;;  %2906 = vst.msk [vmem:[#allocation3 + $0xc8] sm:$0xff] %vm304_vm0, %v2842_v35  ;;  %v3674_v5 = vadd.f32 %v4970_v41, %v3030_v1  ;;  %v3029_v7 = vld [vmem:[#allocation3 + $0xa0] sm:$0xff]  ;;  %v3454_v23 = vpop.f32.mrb[89].mxu1  ;;  %v2206_v1 = vld [vmem:[#allocation3 + $0x108] sm:$0xff] }
 0x19b   : > { %v3937_v38 = vadd.f32 %v6064_v18, %v3866_v62  ;;  %v3798_v11 = vld [vmem:[#allocation3 + $0x88] sm:$0xff]  ;;  %2905 = vst.msk [vmem:[#allocation3 + $0xc0] sm:$0xff] %vm304_vm0, %v2841_v57  ;;  %v3673_v13 = vadd.f32 %v3434_v29, %v3029_v7  ;;  %v4879_v43 = vpop.f32.mrb[90].mxu0 }
 0x19c   : > { %4002 = vst.msk [vmem:[%s6072_s24 + $0x78] sm:$0xff] %vm304_vm0, %v3938_v3  ;;  %v3869_v26 = vmul.f32 %v6056_v15, %v3798_v11  ;;  %v3797_v28 = vld [vmem:[#allocation3 + $0x80] sm:$0xff]  ;;  %3738 = vst.msk [vmem:[#allocation3 + $0xa8] sm:$0xff] %vm304_vm0, %v3674_v5  ;;  %v2844_v31 = vadd.f32 %v4879_v43, %v2200_v19  ;;  %v2628_v34 = vpop.f32.mrb[91].mxu0 }
 0x19d   : > { %4001 = vst.msk [vmem:[%s6072_s24 + $0x70] sm:$0xff] %vm304_vm0, %v3937_v38  ;;  %v3868_v37 = vmul.f32 %v6056_v15, %v3797_v28  ;;  %3737 = vst.msk [vmem:[#allocation3 + $0xa0] sm:$0xff] %vm304_vm0, %v3673_v13  ;;  %v2843_v39 = vadd.f32 %v2628_v34, %v2199_v17  ;;  %v3032_v42 = vld [vmem:[#allocation3 + $0xb8] sm:$0xff]  ;;  %v4979_v49 = vpop.f32.mrb[90].mxu1  ;;  %v2205_v11 = vld [vmem:[#allocation3 + $0x100] sm:$0xff] }
 0x19e   : > { %v3940_v47 = vadd.f32 %v6064_v18, %v3869_v26  ;;  %2908 = vst.msk [vmem:[#allocation3 + $0xd8] sm:$0xff] %vm304_vm0, %v2844_v31  ;;  %v3676_v50 = vadd.f32 %v4973_v25, %v3032_v42  ;;  %v3031_v45 = vld [vmem:[#allocation3 + $0xb0] sm:$0xff]  ;;  %v3464_v51 = vpop.f32.mrb[91].mxu1  ;;  %v2208_v42 = vld [vmem:[#allocation3 + $0x118] sm:$0xff] }
 0x19f   : > { %v3939_v52 = vadd.f32 %v6064_v18, %v3868_v37  ;;  %v3800_v55 = vld [vmem:[#allocation3 + $0x98] sm:$0xff]  ;;  %2907 = vst.msk [vmem:[#allocation3 + $0xd0] sm:$0xff] %vm304_vm0, %v2843_v39  ;;  %v3675_v53 = vadd.f32 %v3444_v30, %v3031_v45  ;;  %v4882_v63 = vpop.f32.mrb[92].mxu0 }
 0x1a0   : > { %4004 = vst.msk [vmem:[%s6072_s24 + $0x88] sm:$0xff] %vm304_vm0, %v3940_v47  ;;  %v3871_v2 = vmul.f32 %v6056_v15, %v3800_v55  ;;  %v3799_v41 = vld [vmem:[#allocation3 + $0x90] sm:$0xff]  ;;  %3740 = vst.msk [vmem:[#allocation3 + $0xb8] sm:$0xff] %vm304_vm0, %v3676_v50  ;;  %v2846_v12 = vadd.f32 %v4882_v63, %v2202_v58  ;;  %v2638_v8 = vpop.f32.mrb[93].mxu0 }
 0x1a1   : > { %4003 = vst.msk [vmem:[%s6072_s24 + $0x80] sm:$0xff] %vm304_vm0, %v3939_v52  ;;  %v3870_v44 = vmul.f32 %v6056_v15, %v3799_v41  ;;  %3739 = vst.msk [vmem:[#allocation3 + $0xb0] sm:$0xff] %vm304_vm0, %v3675_v53  ;;  %v2845_v61 = vadd.f32 %v2638_v8, %v2201_v4  ;;  %v3034_v29 = vld [vmem:[#allocation3 + $0xc8] sm:$0xff]  ;;  %v4982_v6 = vpop.f32.mrb[92].mxu1  ;;  %v2207_v55 = vld [vmem:[#allocation3 + $0x110] sm:$0xff] }
 0x1a2   : > { %v3942_v46 = vadd.f32 %v6064_v18, %v3871_v2  ;;  %2910 = vst.msk [vmem:[#allocation3 + $0xe8] sm:$0xff] %vm304_vm0, %v2846_v12  ;;  %v3678_v10 = vadd.f32 %v4976_v9, %v3034_v29  ;;  %v3033_v48 = vld [vmem:[#allocation3 + $0xc0] sm:$0xff]  ;;  %v3474_v14 = vpop.f32.mrb[93].mxu1  ;;  %v2210_v29 = vld [vmem:[#allocation3 + $0x128] sm:$0xff] }
 0x1a3   : > { %v3941_v54 = vadd.f32 %v6064_v18, %v3870_v44  ;;  %v3802_v56 = vld [vmem:[#allocation3 + $0xa8] sm:$0xff]  ;;  %2909 = vst.msk [vmem:[#allocation3 + $0xe0] sm:$0xff] %vm304_vm0, %v2845_v61  ;;  %v3677_v59 = vadd.f32 %v3454_v23, %v3033_v48  ;;  %v4885_v21 = vpop.f32.mrb[94].mxu0 }
 0x1a4   : > { %4006 = vst.msk [vmem:[%s6072_s24 + $0x98] sm:$0xff] %vm304_vm0, %v3942_v46  ;;  %v3873_v16 = vmul.f32 %v6056_v15, %v3802_v56  ;;  %v3801_v25 = vld [vmem:[#allocation3 + $0xa0] sm:$0xff]  ;;  %3742 = vst.msk [vmem:[#allocation3 + $0xc8] sm:$0xff] %vm304_vm0, %v3678_v10  ;;  %v2848_v20 = vadd.f32 %v4885_v21, %v2204_v0  ;;  %v2648_v24 = vpop.f32.mrb[95].mxu0 }
 0x1a5   : > { %4005 = vst.msk [vmem:[%s6072_s24 + $0x90] sm:$0xff] %vm304_vm0, %v3941_v54  ;;  %v3872_v36 = vmul.f32 %v6056_v15, %v3801_v25  ;;  %3741 = vst.msk [vmem:[#allocation3 + $0xc0] sm:$0xff] %vm304_vm0, %v3677_v59  ;;  %v2847_v27 = vadd.f32 %v2648_v24, %v2203_v22  ;;  %v3036_v30 = vld [vmem:[#allocation3 + $0xd8] sm:$0xff]  ;;  %v4985_v40 = vpop.f32.mrb[94].mxu1  ;;  %v2209_v56 = vld [vmem:[#allocation3 + $0x120] sm:$0xff] }
 0x1a6   : > { %v3944_v32 = vadd.f32 %v6064_v18, %v3873_v16  ;;  %2912 = vst.msk [vmem:[#allocation3 + $0xf8] sm:$0xff] %vm304_vm0, %v2848_v20  ;;  %v3680_v33 = vadd.f32 %v4979_v49, %v3036_v30  ;;  %v3035_v35 = vld [vmem:[#allocation3 + $0xd0] sm:$0xff]  ;;  %v3484_v5 = vpop.f32.mrb[95].mxu1  ;;  %v2212_v30 = vld [vmem:[#allocation3 + $0x138] sm:$0xff] }
 0x1a7   : > { %v3943_v60 = vadd.f32 %v6064_v18, %v3872_v36  ;;  %v3804_v62 = vld [vmem:[#allocation3 + $0xb8] sm:$0xff]  ;;  %2911 = vst.msk [vmem:[#allocation3 + $0xf0] sm:$0xff] %vm304_vm0, %v2847_v27  ;;  %v3679_v57 = vadd.f32 %v3464_v51, %v3035_v35  ;;  %v4888_v3 = vpop.f32.mrb[96].mxu0 }
 0x1a8   : > { %4008 = vst.msk [vmem:[%s6072_s24 + $0xa8] sm:$0xff] %vm304_vm0, %v3944_v32  ;;  %v3875_v7 = vmul.f32 %v6056_v15, %v3804_v62  ;;  %v3803_v9 = vld [vmem:[#allocation3 + $0xb0] sm:$0xff]  ;;  %3744 = vst.msk [vmem:[#allocation3 + $0xd8] sm:$0xff] %vm304_vm0, %v3680_v33  ;;  %v2850_v38 = vadd.f32 %v4888_v3, %v2206_v1  ;;  %v2658_v13 = vpop.f32.mrb[97].mxu0 }
 0x1a9   : > { %4007 = vst.msk [vmem:[%s6072_s24 + $0xa0] sm:$0xff] %vm304_vm0, %v3943_v60  ;;  %v3874_v19 = vmul.f32 %v6056_v15, %v3803_v9  ;;  %3743 = vst.msk [vmem:[#allocation3 + $0xd0] sm:$0xff] %vm304_vm0, %v3679_v57  ;;  %v2849_v43 = vadd.f32 %v2658_v13, %v2205_v11  ;;  %v3038_v23 = vld [vmem:[#allocation3 + $0xe8] sm:$0xff]  ;;  %v4988_v17 = vpop.f32.mrb[96].mxu1  ;;  %v2211_v62 = vld [vmem:[#allocation3 + $0x130] sm:$0xff] }
 0x1aa   : > { %v3946_v26 = vadd.f32 %v6064_v18, %v3875_v7  ;;  %2914 = vst.msk [vmem:[#allocation3 + $0x108] sm:$0xff] %vm304_vm0, %v2850_v38  ;;  %v3682_v28 = vadd.f32 %v4982_v6, %v3038_v23  ;;  %v3037_v31 = vld [vmem:[#allocation3 + $0xe0] sm:$0xff]  ;;  %v3494_v50 = vpop.f32.mrb[97].mxu1  ;;  %v2214_v23 = vld [vmem:[#allocation3 + $0x148] sm:$0xff] }
 0x1ab   : > { %v3945_v34 = vadd.f32 %v6064_v18, %v3874_v19  ;;  %v3806_v37 = vld [vmem:[#allocation3 + $0xc8] sm:$0xff]  ;;  %2913 = vst.msk [vmem:[#allocation3 + $0x100] sm:$0xff] %vm304_vm0, %v2849_v43  ;;  %v3681_v39 = vadd.f32 %v3474_v14, %v3037_v31  ;;  %v4891_v47 = vpop.f32.mrb[98].mxu0 }
 0x1ac   : > { %4010 = vst.msk [vmem:[%s6072_s24 + $0xb8] sm:$0xff] %vm304_vm0, %v3946_v26  ;;  %v3877_v45 = vmul.f32 %v6056_v15, %v3806_v37  ;;  %v3805_v49 = vld [vmem:[#allocation3 + $0xc0] sm:$0xff]  ;;  %3746 = vst.msk [vmem:[#allocation3 + $0xe8] sm:$0xff] %vm304_vm0, %v3682_v28  ;;  %v2852_v52 = vadd.f32 %v4891_v47, %v2208_v42  ;;  %v2668_v53 = vpop.f32.mrb[99].mxu0 }
 0x1ad   : > { %4009 = vst.msk [vmem:[%s6072_s24 + $0xb0] sm:$0xff] %vm304_vm0, %v3945_v34  ;;  %v3876_v58 = vmul.f32 %v6056_v15, %v3805_v49  ;;  %3745 = vst.msk [vmem:[#allocation3 + $0xe0] sm:$0xff] %vm304_vm0, %v3681_v39  ;;  %v2851_v63 = vadd.f32 %v2668_v53, %v2207_v55  ;;  %v3040_v51 = vld [vmem:[#allocation3 + $0xf8] sm:$0xff]  ;;  %v4991_v4 = vpop.f32.mrb[98].mxu1  ;;  %v2213_v37 = vld [vmem:[#allocation3 + $0x140] sm:$0xff] }
 0x1ae   : > { %v3948_v2 = vadd.f32 %v6064_v18, %v3877_v45  ;;  %2916 = vst.msk [vmem:[#allocation3 + $0x118] sm:$0xff] %vm304_vm0, %v2852_v52  ;;  %v3684_v41 = vadd.f32 %v4985_v40, %v3040_v51  ;;  %v3039_v12 = vld [vmem:[#allocation3 + $0xf0] sm:$0xff]  ;;  %v3504_v10 = vpop.f32.mrb[99].mxu1  ;;  %v2216_v51 = vld [vmem:[#allocation3 + $0x158] sm:$0xff] }
 0x1af   : > { %v3947_v8 = vadd.f32 %v6064_v18, %v3876_v58  ;;  %v3808_v44 = vld [vmem:[#allocation3 + $0xd8] sm:$0xff]  ;;  %2915 = vst.msk [vmem:[#allocation3 + $0x110] sm:$0xff] %vm304_vm0, %v2851_v63  ;;  %v3683_v61 = vadd.f32 %v3484_v5, %v3039_v12  ;;  %v4894_v46 = vpop.f32.mrb[100].mxu0 }
 0x1b0   : > { %4012 = vst.msk [vmem:[%s6072_s24 + $0xc8] sm:$0xff] %vm304_vm0, %v3948_v2  ;;  %v3879_v48 = vmul.f32 %v6056_v15, %v3808_v44  ;;  %v3807_v6 = vld [vmem:[#allocation3 + $0xd0] sm:$0xff]  ;;  %3748 = vst.msk [vmem:[#allocation3 + $0xf8] sm:$0xff] %vm304_vm0, %v3684_v41  ;;  %v2854_v54 = vadd.f32 %v4894_v46, %v2210_v29  ;;  %v2678_v59 = vpop.f32.mrb[101].mxu0 }
 0x1b1   : > { %4011 = vst.msk [vmem:[%s6072_s24 + $0xc0] sm:$0xff] %vm304_vm0, %v3947_v8  ;;  %v3878_v0 = vmul.f32 %v6056_v15, %v3807_v6  ;;  %3747 = vst.msk [vmem:[#allocation3 + $0xf0] sm:$0xff] %vm304_vm0, %v3683_v61  ;;  %v2853_v21 = vadd.f32 %v2678_v59, %v2209_v56  ;;  %v3042_v14 = vld [vmem:[#allocation3 + $0x108] sm:$0xff]  ;;  %v4994_v22 = vpop.f32.mrb[100].mxu1  ;;  %v2215_v44 = vld [vmem:[#allocation3 + $0x150] sm:$0xff] }
 0x1b2   : > { %v3950_v16 = vadd.f32 %v6064_v18, %v3879_v48  ;;  %2918 = vst.msk [vmem:[#allocation3 + $0x128] sm:$0xff] %vm304_vm0, %v2854_v54  ;;  %v3686_v25 = vadd.f32 %v4988_v17, %v3042_v14  ;;  %v3041_v20 = vld [vmem:[#allocation3 + $0x100] sm:$0xff]  ;;  %v3514_v33 = vpop.f32.mrb[101].mxu1  ;;  %v2218_v14 = vld [vmem:[#allocation3 + $0x168] sm:$0xff] }
 0x1b3   : > { %v3949_v24 = vadd.f32 %v6064_v18, %v3878_v0  ;;  %v3810_v36 = vld [vmem:[#allocation3 + $0xe8] sm:$0xff]  ;;  %2917 = vst.msk [vmem:[#allocation3 + $0x120] sm:$0xff] %vm304_vm0, %v2853_v21  ;;  %v3685_v27 = vadd.f32 %v3494_v50, %v3041_v20  ;;  %v4897_v32 = vpop.f32.mrb[102].mxu0 }
 0x1b4   : > { %4014 = vst.msk [vmem:[%s6072_s24 + $0xd8] sm:$0xff] %vm304_vm0, %v3950_v16  ;;  %v3881_v35 = vmul.f32 %v6056_v15, %v3810_v36  ;;  %v3809_v40 = vld [vmem:[#allocation3 + $0xe0] sm:$0xff]  ;;  %3750 = vst.msk [vmem:[#allocation3 + $0x108] sm:$0xff] %vm304_vm0, %v3686_v25  ;;  %v2856_v60 = vadd.f32 %v4897_v32, %v2212_v30  ;;  %v2688_v57 = vpop.f32.mrb[103].mxu0 }
 0x1b5   : > { %4013 = vst.msk [vmem:[%s6072_s24 + $0xd0] sm:$0xff] %vm304_vm0, %v3949_v24  ;;  %v3880_v1 = vmul.f32 %v6056_v15, %v3809_v40  ;;  %3749 = vst.msk [vmem:[#allocation3 + $0x100] sm:$0xff] %vm304_vm0, %v3685_v27  ;;  %v2855_v3 = vadd.f32 %v2688_v57, %v2211_v62  ;;  %v3044_v5 = vld [vmem:[#allocation3 + $0x118] sm:$0xff]  ;;  %v4997_v11 = vpop.f32.mrb[102].mxu1  ;;  %v2217_v36 = vld [vmem:[#allocation3 + $0x160] sm:$0xff] }
 0x1b6   : > { %v3952_v7 = vadd.f32 %v6064_v18, %v3881_v35  ;;  %2920 = vst.msk [vmem:[#allocation3 + $0x138] sm:$0xff] %vm304_vm0, %v2856_v60  ;;  %v3688_v9 = vadd.f32 %v4991_v4, %v3044_v5  ;;  %v3043_v38 = vld [vmem:[#allocation3 + $0x110] sm:$0xff]  ;;  %v3524_v28 = vpop.f32.mrb[103].mxu1  ;;  %v2220_v5 = vld [vmem:[#allocation3 + $0x178] sm:$0xff] }
 0x1b7   : > { %v3951_v13 = vadd.f32 %v6064_v18, %v3880_v1  ;;  %v3812_v19 = vld [vmem:[#allocation3 + $0xf8] sm:$0xff]  ;;  %2919 = vst.msk [vmem:[#allocation3 + $0x130] sm:$0xff] %vm304_vm0, %v2855_v3  ;;  %v3687_v43 = vadd.f32 %v3504_v10, %v3043_v38  ;;  %v4900_v26 = vpop.f32.mrb[104].mxu0 }
 0x1b8   : > { %4016 = vst.msk [vmem:[%s6072_s24 + $0xe8] sm:$0xff] %vm304_vm0, %v3952_v7  ;;  %v3883_v31 = vmul.f32 %v6056_v15, %v3812_v19  ;;  %v3811_v17 = vld [vmem:[#allocation3 + $0xf0] sm:$0xff]  ;;  %3752 = vst.msk [vmem:[#allocation3 + $0x118] sm:$0xff] %vm304_vm0, %v3688_v9  ;;  %v2858_v34 = vadd.f32 %v4900_v26, %v2214_v23  ;;  %v2698_v39 = vpop.f32.mrb[105].mxu0 }
 0x1b9   : > { %4015 = vst.msk [vmem:[%s6072_s24 + $0xe0] sm:$0xff] %vm304_vm0, %v3951_v13  ;;  %v3882_v42 = vmul.f32 %v6056_v15, %v3811_v17  ;;  %3751 = vst.msk [vmem:[#allocation3 + $0x110] sm:$0xff] %vm304_vm0, %v3687_v43  ;;  %v2857_v47 = vadd.f32 %v2698_v39, %v2213_v37  ;;  %v3046_v50 = vld [vmem:[#allocation3 + $0x128] sm:$0xff]  ;;  %v5000_v55 = vpop.f32.mrb[104].mxu1  ;;  %v2219_v19 = vld [vmem:[#allocation3 + $0x170] sm:$0xff] }
 0x1ba   : > { %v3954_v45 = vadd.f32 %v6064_v18, %v3883_v31  ;;  %2922 = vst.msk [vmem:[#allocation3 + $0x148] sm:$0xff] %vm304_vm0, %v2858_v34  ;;  %v3690_v49 = vadd.f32 %v4994_v22, %v3046_v50  ;;  %v3045_v52 = vld [vmem:[#allocation3 + $0x120] sm:$0xff]  ;;  %v3534_v41 = vpop.f32.mrb[105].mxu1  ;;  %v2222_v50 = vld [vmem:[#allocation3 + $0x188] sm:$0xff] }
 0x1bb   : > { %v3953_v53 = vadd.f32 %v6064_v18, %v3882_v42  ;;  %v3814_v58 = vld [vmem:[#allocation3 + $0x108] sm:$0xff]  ;;  %2921 = vst.msk [vmem:[#allocation3 + $0x140] sm:$0xff] %vm304_vm0, %v2857_v47  ;;  %v3689_v63 = vadd.f32 %v3514_v33, %v3045_v52  ;;  %v4903_v2 = vpop.f32.mrb[106].mxu0 }
 0x1bc   : > { %4018 = vst.msk [vmem:[%s6072_s24 + $0xf8] sm:$0xff] %vm304_vm0, %v3954_v45  ;;  %v3885_v12 = vmul.f32 %v6056_v15, %v3814_v58  ;;  %v3813_v4 = vld [vmem:[#allocation3 + $0x100] sm:$0xff]  ;;  %3754 = vst.msk [vmem:[#allocation3 + $0x128] sm:$0xff] %vm304_vm0, %v3690_v49  ;;  %v2860_v8 = vadd.f32 %v4903_v2, %v2216_v51  ;;  %v2708_v61 = vpop.f32.mrb[107].mxu0 }
 0x1bd   : > { %4017 = vst.msk [vmem:[%s6072_s24 + $0xf0] sm:$0xff] %vm304_vm0, %v3953_v53  ;;  %v3884_v29 = vmul.f32 %v6056_v15, %v3813_v4  ;;  %3753 = vst.msk [vmem:[#allocation3 + $0x120] sm:$0xff] %vm304_vm0, %v3689_v63  ;;  %v2859_v46 = vadd.f32 %v2708_v61, %v2215_v44  ;;  %v3048_v10 = vld [vmem:[#allocation3 + $0x138] sm:$0xff]  ;;  %v5003_v56 = vpop.f32.mrb[106].mxu1  ;;  %v2221_v58 = vld [vmem:[#allocation3 + $0x180] sm:$0xff] }
 0x1be   : > { %v3956_v48 = vadd.f32 %v6064_v18, %v3885_v12  ;;  %2924 = vst.msk [vmem:[#allocation3 + $0x158] sm:$0xff] %vm304_vm0, %v2860_v8  ;;  %v3692_v6 = vadd.f32 %v4997_v11, %v3048_v10  ;;  %v3047_v54 = vld [vmem:[#allocation3 + $0x130] sm:$0xff]  ;;  %v3544_v25 = vpop.f32.mrb[107].mxu1  ;;  %v2224_v10 = vld [vmem:[#allocation3 + $0x198] sm:$0xff] }
 0x1bf   : > { %v3955_v59 = vadd.f32 %v6064_v18, %v3884_v29  ;;  %v3816_v0 = vld [vmem:[#allocation3 + $0x118] sm:$0xff]  ;;  %2923 = vst.msk [vmem:[#allocation3 + $0x150] sm:$0xff] %vm304_vm0, %v2859_v46  ;;  %v3691_v21 = vadd.f32 %v3524_v28, %v3047_v54  ;;  %v4906_v16 = vpop.f32.mrb[108].mxu0 }
 0x1c0   : > { %4020 = vst.msk [vmem:[%s6072_s24 + $0x108] sm:$0xff] %vm304_vm0, %v3956_v48  ;;  %v3887_v20 = vmul.f32 %v6056_v15, %v3816_v0  ;;  %v3815_v22 = vld [vmem:[#allocation3 + $0x110] sm:$0xff]  ;;  %3756 = vst.msk [vmem:[#allocation3 + $0x138] sm:$0xff] %vm304_vm0, %v3692_v6  ;;  %v2862_v24 = vadd.f32 %v4906_v16, %v2218_v14  ;;  %v2718_v27 = vpop.f32.mrb[109].mxu0 }
 0x1c1   : > { %4019 = vst.msk [vmem:[%s6072_s24 + $0x100] sm:$0xff] %vm304_vm0, %v3955_v59  ;;  %v3886_v30 = vmul.f32 %v6056_v15, %v3815_v22  ;;  %3755 = vst.msk [vmem:[#allocation3 + $0x130] sm:$0xff] %vm304_vm0, %v3691_v21  ;;  %v2861_v32 = vadd.f32 %v2718_v27, %v2217_v36  ;;  %v3050_v33 = vld [vmem:[#allocation3 + $0x148] sm:$0xff]  ;;  %v5006_v62 = vpop.f32.mrb[108].mxu1  ;;  %v2223_v0 = vld [vmem:[#allocation3 + $0x190] sm:$0xff] }
 0x1c2   : > { %v3958_v35 = vadd.f32 %v6064_v18, %v3887_v20  ;;  %2926 = vst.msk [vmem:[#allocation3 + $0x168] sm:$0xff] %vm304_vm0, %v2862_v24  ;;  %v3694_v40 = vadd.f32 %v5000_v55, %v3050_v33  ;;  %v3049_v60 = vld [vmem:[#allocation3 + $0x140] sm:$0xff]  ;;  %v3554_v9 = vpop.f32.mrb[109].mxu1 }
 0x1c3   : > { %v3957_v57 = vadd.f32 %v6064_v18, %v3886_v30  ;;  %v3818_v1 = vld [vmem:[#allocation3 + $0x128] sm:$0xff]  ;;  %2925 = vst.msk [vmem:[#allocation3 + $0x160] sm:$0xff] %vm304_vm0, %v2861_v32  ;;  %v3693_v3 = vadd.f32 %v3534_v41, %v3049_v60  ;;  %v4909_v7 = vpop.f32.mrb[110].mxu0 }
 0x1c4   : > { %4022 = vst.msk [vmem:[%s6072_s24 + $0x118] sm:$0xff] %vm304_vm0, %v3958_v35  ;;  %v3889_v38 = vmul.f32 %v6056_v15, %v3818_v1  ;;  %v3817_v11 = vld [vmem:[#allocation3 + $0x120] sm:$0xff]  ;;  %3758 = vst.msk [vmem:[#allocation3 + $0x148] sm:$0xff] %vm304_vm0, %v3694_v40  ;;  %v2864_v13 = vadd.f32 %v4909_v7, %v2220_v5  ;;  %v2728_v43 = vpop.f32.mrb[111].mxu0  ;;  %v6325_v40 = vld [vmem:[%s6459_s4] ss:$0 sm:$0xff] }
 0x1c5   : > { %4021 = vst.msk [vmem:[%s6072_s24 + $0x110] sm:$0xff] %vm304_vm0, %v3957_v57  ;;  %v3888_v23 = vmul.f32 %v6056_v15, %v3817_v11  ;;  %3757 = vst.msk [vmem:[#allocation3 + $0x140] sm:$0xff] %vm304_vm0, %v3693_v3  ;;  %v2863_v26 = vadd.f32 %v2728_v43, %v2219_v19  ;;  %v3052_v28 = vld [vmem:[#allocation3 + $0x158] sm:$0xff]  ;;  %v5009_v37 = vpop.f32.mrb[110].mxu1  ;;  %v2225_v57 = vld [vmem:[#allocation3 + $0x1a0] sm:$0xff] }
 0x1c6   : > { %v3960_v31 = vadd.f32 %v6064_v18, %v3889_v38  ;;  %2928 = vst.msk [vmem:[#allocation3 + $0x178] sm:$0xff] %vm304_vm0, %v2864_v13  ;;  %v3696_v17 = vadd.f32 %v5003_v56, %v3052_v28  ;;  %v3051_v34 = vld [vmem:[#allocation3 + $0x150] sm:$0xff]  ;;  %v3564_v49 = vpop.f32.mrb[111].mxu1  ;;  %v2228_v28 = vld [vmem:[#allocation3 + $0x1b8] sm:$0xff] }
 0x1c7   : > { %v3959_v39 = vadd.f32 %v6064_v18, %v3888_v23  ;;  %v3820_v42 = vld [vmem:[#allocation3 + $0x138] sm:$0xff]  ;;  %2927 = vst.msk [vmem:[#allocation3 + $0x170] sm:$0xff] %vm304_vm0, %v2863_v26  ;;  %v3695_v47 = vadd.f32 %v3544_v25, %v3051_v34  ;;  %v4912_v45 = vpop.f32.mrb[112].mxu0 }
 0x1c8   : > { %4024 = vst.msk [vmem:[%s6072_s24 + $0x128] sm:$0xff] %vm304_vm0, %v3960_v31  ;;  %v3891_v52 = vmul.f32 %v6056_v15, %v3820_v42  ;;  %v3819_v55 = vld [vmem:[#allocation3 + $0x130] sm:$0xff]  ;;  %3760 = vst.msk [vmem:[#allocation3 + $0x158] sm:$0xff] %vm304_vm0, %v3696_v17  ;;  %v2866_v53 = vadd.f32 %v4912_v45, %v2222_v50  ;;  %v2738_v63 = vpop.f32.mrb[113].mxu0 }
 0x1c9   : > { %4023 = vst.msk [vmem:[%s6072_s24 + $0x120] sm:$0xff] %vm304_vm0, %v3959_v39  ;;  %v3890_v51 = vmul.f32 %v6056_v15, %v3819_v55  ;;  %3759 = vst.msk [vmem:[#allocation3 + $0x150] sm:$0xff] %vm304_vm0, %v3695_v47  ;;  %v2865_v2 = vadd.f32 %v2738_v63, %v2221_v58  ;;  %v3054_v41 = vld [vmem:[#allocation3 + $0x168] sm:$0xff]  ;;  %v5012_v44 = vpop.f32.mrb[112].mxu1  ;;  %v2227_v42 = vld [vmem:[#allocation3 + $0x1b0] sm:$0xff] }
 0x1ca   : > { %v3962_v12 = vadd.f32 %v6064_v18, %v3891_v52  ;;  %2930 = vst.msk [vmem:[#allocation3 + $0x188] sm:$0xff] %vm304_vm0, %v2866_v53  ;;  %v3698_v4 = vadd.f32 %v5006_v62, %v3054_v41  ;;  %v3053_v8 = vld [vmem:[#allocation3 + $0x160] sm:$0xff]  ;;  %v3574_v6 = vpop.f32.mrb[113].mxu1  ;;  %v2230_v41 = vld [vmem:[#allocation3 + $0x1c8] sm:$0xff] }
 0x1cb   : > { %v3961_v61 = vadd.f32 %v6064_v18, %v3890_v51  ;;  %v3822_v29 = vld [vmem:[#allocation3 + $0x148] sm:$0xff]  ;;  %2929 = vst.msk [vmem:[#allocation3 + $0x180] sm:$0xff] %vm304_vm0, %v2865_v2  ;;  %v3697_v46 = vadd.f32 %v3554_v9, %v3053_v8  ;;  %v4915_v48 = vpop.f32.mrb[114].mxu0  ;;  %v6336_v9 = vld [vmem:[%s6460_s5] ss:$0 sm:$0xff] }
 0x1cc   : > { %4026 = vst.msk [vmem:[%s6072_s24 + $0x138] sm:$0xff] %vm304_vm0, %v3962_v12  ;;  %v3893_v54 = vmul.f32 %v6056_v15, %v3822_v29  ;;  %v3821_v56 = vld [vmem:[#allocation3 + $0x140] sm:$0xff]  ;;  %3762 = vst.msk [vmem:[#allocation3 + $0x168] sm:$0xff] %vm304_vm0, %v3698_v4  ;;  %v2868_v59 = vadd.f32 %v4915_v48, %v2224_v10  ;;  %v2748_v21 = vpop.f32.mrb[115].mxu0 }
 0x1cd   : > { %4025 = vst.msk [vmem:[%s6072_s24 + $0x130] sm:$0xff] %vm304_vm0, %v3961_v61  ;;  %v3892_v14 = vmul.f32 %v6056_v15, %v3821_v56  ;;  %3761 = vst.msk [vmem:[#allocation3 + $0x160] sm:$0xff] %vm304_vm0, %v3697_v46  ;;  %v2867_v16 = vadd.f32 %v2748_v21, %v2223_v0  ;;  %v3056_v25 = vld [vmem:[#allocation3 + $0x178] sm:$0xff]  ;;  %v5015_v36 = vpop.f32.mrb[114].mxu1  ;;  %v2226_v15 = vld [vmem:[#allocation3 + $0x1a8] sm:$0xff] }
 0x1ce   : > { %v3964_v20 = vadd.f32 %v6064_v18, %v3893_v54  ;;  %2932 = vst.msk [vmem:[#allocation3 + $0x198] sm:$0xff] %vm304_vm0, %v2868_v59  ;;  %v3700_v22 = vadd.f32 %v5009_v37, %v3056_v25  ;;  %v3055_v24 = vld [vmem:[#allocation3 + $0x170] sm:$0xff]  ;;  %v3584_v35 = vpop.f32.mrb[115].mxu1  ;;  %v2229_v29 = vld [vmem:[#allocation3 + $0x1c0] sm:$0xff]  ;;  %v2232_v25 = vld [vmem:[#allocation3 + $0x1d8] sm:$0xff] }
 0x1cf   : > { %v3963_v27 = vadd.f32 %v6064_v18, %v3892_v14  ;;  %v3824_v30 = vld [vmem:[#allocation3 + $0x158] sm:$0xff]  ;;  %2931 = vst.msk [vmem:[#allocation3 + $0x190] sm:$0xff] %vm304_vm0, %v2867_v16  ;;  %v3699_v32 = vadd.f32 %v3564_v49, %v3055_v24  ;;  %v4918_v33 = vpop.f32.mrb[116].mxu0 }
 0x1d0   : > { %4028 = vst.msk [vmem:[%s6072_s24 + $0x148] sm:$0xff] %vm304_vm0, %v3964_v20  ;;  %v3895_v60 = vmul.f32 %v6325_v40, %v3824_v30  ;;  %v3823_v62 = vld [vmem:[#allocation3 + $0x150] sm:$0xff]  ;;  %3764 = vst.msk [vmem:[#allocation3 + $0x178] sm:$0xff] %vm304_vm0, %v3700_v22  ;;  %v2870_v18 = vadd.f32 %v4918_v33, %v2226_v15  ;;  %v2758_v1 = vpop.f32.mrb[117].mxu0 }
 0x1d1   : > { %4027 = vst.msk [vmem:[%s6072_s24 + $0x140] sm:$0xff] %vm304_vm0, %v3963_v27  ;;  %v3894_v3 = vmul.f32 %v6325_v40, %v3823_v62  ;;  %3763 = vst.msk [vmem:[#allocation3 + $0x170] sm:$0xff] %vm304_vm0, %v3699_v32  ;;  %v2869_v5 = vadd.f32 %v2758_v1, %v2225_v57  ;;  %v3058_v7 = vld [vmem:[#allocation3 + $0x188] sm:$0xff]  ;;  %v5018_v19 = vpop.f32.mrb[116].mxu1  ;;  %v2231_v30 = vld [vmem:[#allocation3 + $0x1d0] sm:$0xff] }
 0x1d2   : > { %v3966_v38 = vadd.f32 %v6336_v9, %v3895_v60  ;;  %2934 = vst.msk [vmem:[#allocation3 + $0x1a8] sm:$0xff] %vm304_vm0, %v2870_v18  ;;  %v3702_v11 = vadd.f32 %v5012_v44, %v3058_v7  ;;  %v3057_v13 = vld [vmem:[#allocation3 + $0x180] sm:$0xff]  ;;  %v3594_v17 = vpop.f32.mrb[117].mxu1  ;;  %v2234_v7 = vld [vmem:[#allocation3 + $0x1e8] sm:$0xff] }
 0x1d3   : > { %v3965_v43 = vadd.f32 %v6336_v9, %v3894_v3  ;;  %v3826_v23 = vld [vmem:[#allocation3 + $0x168] sm:$0xff]  ;;  %2933 = vst.msk [vmem:[#allocation3 + $0x1a0] sm:$0xff] %vm304_vm0, %v2869_v5  ;;  %v3701_v26 = vadd.f32 %v3574_v6, %v3057_v13  ;;  %v4921_v31 = vpop.f32.mrb[118].mxu0 }
 0x1d4   : > { %4030 = vst.msk [vmem:[%s6072_s24 + $0x158] sm:$0xff] %vm304_vm0, %v3966_v38  ;;  %v3897_v34 = vmul.f32 %v6325_v40, %v3826_v23  ;;  %v3825_v37 = vld [vmem:[#allocation3 + $0x160] sm:$0xff]  ;;  %3766 = vst.msk [vmem:[#allocation3 + $0x188] sm:$0xff] %vm304_vm0, %v3702_v11  ;;  %v2872_v39 = vadd.f32 %v4921_v31, %v2228_v28  ;;  %v2768_v47 = vpop.f32.mrb[119].mxu0 }
 0x1d5   : > { %4029 = vst.msk [vmem:[%s6072_s24 + $0x150] sm:$0xff] %vm304_vm0, %v3965_v43  ;;  %v3896_v50 = vmul.f32 %v6325_v40, %v3825_v37  ;;  %3765 = vst.msk [vmem:[#allocation3 + $0x180] sm:$0xff] %vm304_vm0, %v3701_v26  ;;  %v2871_v45 = vadd.f32 %v2768_v47, %v2227_v42  ;;  %v3060_v49 = vld [vmem:[#allocation3 + $0x198] sm:$0xff]  ;;  %v5021_v58 = vpop.f32.mrb[118].mxu1  ;;  %v2233_v23 = vld [vmem:[#allocation3 + $0x1e0] sm:$0xff] }
 0x1d6   : > { %v3968_v52 = vadd.f32 %v6336_v9, %v3897_v34  ;;  %2936 = vst.msk [vmem:[#allocation3 + $0x1b8] sm:$0xff] %vm304_vm0, %v2872_v39  ;;  %v3704_v55 = vadd.f32 %v5015_v36, %v3060_v49  ;;  %v3059_v53 = vld [vmem:[#allocation3 + $0x190] sm:$0xff]  ;;  %v3604_v4 = vpop.f32.mrb[119].mxu1  ;;  %v2236_v49 = vld [vmem:[#allocation3 + $0x1f8] sm:$0xff] }
 0x1d7   : > { %v3967_v63 = vadd.f32 %v6336_v9, %v3896_v50  ;;  %v3828_v51 = vld [vmem:[#allocation3 + $0x178] sm:$0xff]  ;;  %2935 = vst.msk [vmem:[#allocation3 + $0x1b0] sm:$0xff] %vm304_vm0, %v2871_v45  ;;  %v3703_v2 = vadd.f32 %v3584_v35, %v3059_v53  ;;  %v4924_v12 = vpop.f32.mrb[120].mxu0 }
 0x1d8   : > { %4032 = vst.msk [vmem:[%s6072_s24 + $0x168] sm:$0xff] %vm304_vm0, %v3968_v52  ;;  %v3899_v8 = vmul.f32 %v6325_v40, %v3828_v51  ;;  %v3827_v44 = vld [vmem:[#allocation3 + $0x170] sm:$0xff]  ;;  %3768 = vst.msk [vmem:[#allocation3 + $0x198] sm:$0xff] %vm304_vm0, %v3704_v55  ;;  %v2874_v61 = vadd.f32 %v4924_v12, %v2230_v41  ;;  %v2778_v46 = vpop.f32.mrb[121].mxu0 }
 0x1d9   : > { %4031 = vst.msk [vmem:[%s6072_s24 + $0x160] sm:$0xff] %vm304_vm0, %v3967_v63  ;;  %v3898_v10 = vmul.f32 %v6325_v40, %v3827_v44  ;;  %3767 = vst.msk [vmem:[#allocation3 + $0x190] sm:$0xff] %vm304_vm0, %v3703_v2  ;;  %v2873_v48 = vadd.f32 %v2778_v46, %v2229_v29  ;;  %v3062_v6 = vld [vmem:[#allocation3 + $0x1a8] sm:$0xff]  ;;  %v5024_v0 = vpop.f32.mrb[120].mxu1  ;;  %v2235_v51 = vld [vmem:[#allocation3 + $0x1f0] sm:$0xff] }
 0x1da   : > { %v3970_v54 = vadd.f32 %v6336_v9, %v3899_v8  ;;  %2938 = vst.msk [vmem:[#allocation3 + $0x1c8] sm:$0xff] %vm304_vm0, %v2874_v61  ;;  %v3706_v56 = vadd.f32 %v5018_v19, %v3062_v6  ;;  %v3061_v59 = vld [vmem:[#allocation3 + $0x1a0] sm:$0xff]  ;;  %v3614_v22 = vpop.f32.mrb[121].mxu1 }
 0x1db   : > { %v3969_v21 = vadd.f32 %v6336_v9, %v3898_v10  ;;  %v3830_v14 = vld [vmem:[#allocation3 + $0x188] sm:$0xff]  ;;  %2937 = vst.msk [vmem:[#allocation3 + $0x1c0] sm:$0xff] %vm304_vm0, %v2873_v48  ;;  %v3705_v16 = vadd.f32 %v3594_v17, %v3061_v59  ;;  %v4927_v20 = vpop.f32.mrb[122].mxu0 }
 0x1dc   : > { %4034 = vst.msk [vmem:[%s6072_s24 + $0x178] sm:$0xff] %vm304_vm0, %v3970_v54  ;;  %v3901_v24 = vmul.f32 %v6325_v40, %v3830_v14  ;;  %v3829_v36 = vld [vmem:[#allocation3 + $0x180] sm:$0xff]  ;;  %3770 = vst.msk [vmem:[#allocation3 + $0x1a8] sm:$0xff] %vm304_vm0, %v3706_v56  ;;  %v2876_v27 = vadd.f32 %v4927_v20, %v2232_v25  ;;  %v2788_v32 = vpop.f32.mrb[123].mxu0 }
 0x1dd   : > { %4033 = vst.msk [vmem:[%s6072_s24 + $0x170] sm:$0xff] %vm304_vm0, %v3969_v21  ;;  %v3900_v15 = vmul.f32 %v6325_v40, %v3829_v36  ;;  %3769 = vst.msk [vmem:[#allocation3 + $0x1a0] sm:$0xff] %vm304_vm0, %v3705_v16  ;;  %v2875_v33 = vadd.f32 %v2788_v32, %v2231_v30  ;;  %v3064_v35 = vld [vmem:[#allocation3 + $0x1b8] sm:$0xff]  ;;  %v5027_v57 = vpop.f32.mrb[122].mxu1 }
 0x1de   : > { %v3972_v60 = vadd.f32 %v6336_v9, %v3901_v24  ;;  %2940 = vst.msk [vmem:[#allocation3 + $0x1d8] sm:$0xff] %vm304_vm0, %v2876_v27  ;;  %v3708_v62 = vadd.f32 %v5021_v58, %v3064_v35  ;;  %v3063_v18 = vld [vmem:[#allocation3 + $0x1b0] sm:$0xff]  ;;  %v3624_v11 = vpop.f32.mrb[123].mxu1 }
 0x1df   : > { %v3971_v1 = vadd.f32 %v6336_v9, %v3900_v15  ;;  %v3832_v3 = vld [vmem:[#allocation3 + $0x198] sm:$0xff]  ;;  %2939 = vst.msk [vmem:[#allocation3 + $0x1d0] sm:$0xff] %vm304_vm0, %v2875_v33  ;;  %v3707_v5 = vadd.f32 %v3604_v4, %v3063_v18  ;;  %v4930_v38 = vpop.f32.mrb[124].mxu0 }
 0x1e0   : > { %4036 = vst.msk [vmem:[%s6072_s24 + $0x188] sm:$0xff] %vm304_vm0, %v3972_v60  ;;  %v3903_v13 = vmul.f32 %v6325_v40, %v3832_v3  ;;  %v3831_v19 = vld [vmem:[#allocation3 + $0x190] sm:$0xff]  ;;  %3772 = vst.msk [vmem:[#allocation3 + $0x1b8] sm:$0xff] %vm304_vm0, %v3708_v62  ;;  %v2878_v43 = vadd.f32 %v4930_v38, %v2234_v7  ;;  %v2798_v26 = vpop.f32.mrb[125].mxu0 }
 0x1e1   : > { %4035 = vst.msk [vmem:[%s6072_s24 + $0x180] sm:$0xff] %vm304_vm0, %v3971_v1  ;;  %v3902_v28 = vmul.f32 %v6325_v40, %v3831_v19  ;;  %3771 = vst.msk [vmem:[#allocation3 + $0x1b0] sm:$0xff] %vm304_vm0, %v3707_v5  ;;  %v2877_v31 = vadd.f32 %v2798_v26, %v2233_v23  ;;  %v3066_v17 = vld [vmem:[#allocation3 + $0x1c8] sm:$0xff]  ;;  %v5030_v42 = vpop.f32.mrb[124].mxu1 }
 0x1e2   : > { %v3974_v34 = vadd.f32 %v6336_v9, %v3903_v13  ;;  %2942 = vst.msk [vmem:[#allocation3 + $0x1e8] sm:$0xff] %vm304_vm0, %v2878_v43  ;;  %v3710_v37 = vadd.f32 %v5024_v0, %v3066_v17  ;;  %v3065_v39 = vld [vmem:[#allocation3 + $0x1c0] sm:$0xff]  ;;  %v3634_v55 = vpop.f32.mrb[125].mxu1 }
 0x1e3   : > { %v3973_v47 = vadd.f32 %v6336_v9, %v3902_v28  ;;  %v3834_v50 = vld [vmem:[#allocation3 + $0x1a8] sm:$0xff]  ;;  %2941 = vst.msk [vmem:[#allocation3 + $0x1e0] sm:$0xff] %vm304_vm0, %v2877_v31  ;;  %v3709_v45 = vadd.f32 %v3614_v22, %v3065_v39  ;;  %v4933_v52 = vpop.f32.mrb[126].mxu0 }
 0x1e4   : > { %4038 = vst.msk [vmem:[%s6072_s24 + $0x198] sm:$0xff] %vm304_vm0, %v3974_v34  ;;  %v3905_v53 = vmul.f32 %v6325_v40, %v3834_v50  ;;  %v3833_v58 = vld [vmem:[#allocation3 + $0x1a0] sm:$0xff]  ;;  %3774 = vst.msk [vmem:[#allocation3 + $0x1c8] sm:$0xff] %vm304_vm0, %v3710_v37  ;;  %v2880_v63 = vadd.f32 %v4933_v52, %v2236_v49  ;;  %v2808_v2 = vpop.f32.mrb[127].mxu0 }
 0x1e5   : > { %4037 = vst.msk [vmem:[%s6072_s24 + $0x190] sm:$0xff] %vm304_vm0, %v3973_v47  ;;  %v3904_v41 = vmul.f32 %v6325_v40, %v3833_v58  ;;  %3773 = vst.msk [vmem:[#allocation3 + $0x1c0] sm:$0xff] %vm304_vm0, %v3709_v45  ;;  %v2879_v12 = vadd.f32 %v2808_v2, %v2235_v51  ;;  %v3068_v4 = vld [vmem:[#allocation3 + $0x1d8] sm:$0xff]  ;;  %v5033_v29 = vpop.f32.mrb[126].mxu1 }
 0x1e6   : > { %v3976_v8 = vadd.f32 %v6336_v9, %v3905_v53  ;;  %2944 = vst.msk [vmem:[#allocation3 + $0x1f8] sm:$0xff] %vm304_vm0, %v2880_v63  ;;  %v3712_v44 = vadd.f32 %v5027_v57, %v3068_v4  ;;  %v3067_v61 = vld [vmem:[#allocation3 + $0x1d0] sm:$0xff]  ;;  %v3644_v6 = vpop.f32.mrb[127].mxu1 }
 0x1e7   : > { %v3975_v46 = vadd.f32 %v6336_v9, %v3904_v41  ;;  %v3836_v10 = vld [vmem:[#allocation3 + $0x1b8] sm:$0xff]  ;;  %2943 = vst.msk [vmem:[#allocation3 + $0x1f0] sm:$0xff] %vm304_vm0, %v2879_v12  ;;  %v3711_v48 = vadd.f32 %v3624_v11, %v3067_v61 }
 0x1e8   : > { %4040 = vst.msk [vmem:[%s6072_s24 + $0x1a8] sm:$0xff] %vm304_vm0, %v3976_v8  ;;  %v3907_v54 = vmul.f32 %v6325_v40, %v3836_v10  ;;  %v3835_v56 = vld [vmem:[#allocation3 + $0x1b0] sm:$0xff]  ;;  %3776 = vst.msk [vmem:[#allocation3 + $0x1d8] sm:$0xff] %vm304_vm0, %v3712_v44 }
 0x1e9   : > { %4039 = vst.msk [vmem:[%s6072_s24 + $0x1a0] sm:$0xff] %vm304_vm0, %v3975_v46  ;;  %v3906_v59 = vmul.f32 %v6325_v40, %v3835_v56  ;;  %3775 = vst.msk [vmem:[#allocation3 + $0x1d0] sm:$0xff] %vm304_vm0, %v3711_v48  ;;  %v3070_v0 = vld [vmem:[#allocation3 + $0x1e8] sm:$0xff] }
 0x1ea   : > { %v3978_v21 = vadd.f32 %v6336_v9, %v3907_v54  ;;  %v3714_v14 = vadd.f32 %v5030_v42, %v3070_v0  ;;  %v3069_v16 = vld [vmem:[#allocation3 + $0x1e0] sm:$0xff] }
 0x1eb   : > { %v3977_v25 = vadd.f32 %v6336_v9, %v3906_v59  ;;  %v3838_v20 = vld [vmem:[#allocation3 + $0x1c8] sm:$0xff]  ;;  %v3713_v22 = vadd.f32 %v3634_v55, %v3069_v16 }
 0x1ec   : > { %4042 = vst.msk [vmem:[%s6072_s24 + $0x1b8] sm:$0xff] %vm304_vm0, %v3978_v21  ;;  %v3909_v24 = vmul.f32 %v6325_v40, %v3838_v20  ;;  %v3837_v36 = vld [vmem:[#allocation3 + $0x1c0] sm:$0xff]  ;;  %3778 = vst.msk [vmem:[#allocation3 + $0x1e8] sm:$0xff] %vm304_vm0, %v3714_v14 }
 0x1ed   : > { %4041 = vst.msk [vmem:[%s6072_s24 + $0x1b0] sm:$0xff] %vm304_vm0, %v3977_v25  ;;  %v3908_v27 = vmul.f32 %v6325_v40, %v3837_v36  ;;  %3777 = vst.msk [vmem:[#allocation3 + $0x1e0] sm:$0xff] %vm304_vm0, %v3713_v22  ;;  %v3072_v30 = vld [vmem:[#allocation3 + $0x1f8] sm:$0xff] }
 0x1ee   : > { %v3980_v32 = vadd.f32 %v6336_v9, %v3909_v24  ;;  %v3716_v15 = vadd.f32 %v5033_v29, %v3072_v30  ;;  %v3071_v33 = vld [vmem:[#allocation3 + $0x1f0] sm:$0xff] }
 0x1ef   : > { %v3979_v35 = vadd.f32 %v6336_v9, %v3908_v27  ;;  %v3840_v60 = vld [vmem:[#allocation3 + $0x1d8] sm:$0xff]  ;;  %v3715_v62 = vadd.f32 %v3644_v6, %v3071_v33 }
 0x1f0   : > { %4044 = vst.msk [vmem:[%s6072_s24 + $0x1c8] sm:$0xff] %vm304_vm0, %v3980_v32  ;;  %v3911_v18 = vmul.f32 %v6325_v40, %v3840_v60  ;;  %v3839_v57 = vld [vmem:[#allocation3 + $0x1d0] sm:$0xff]  ;;  %3780 = vst.msk [vmem:[#allocation3 + $0x1f8] sm:$0xff] %vm304_vm0, %v3716_v15 }
 0x1f1   : > { %4043 = vst.msk [vmem:[%s6072_s24 + $0x1c0] sm:$0xff] %vm304_vm0, %v3979_v35  ;;  %v3910_v1 = vmul.f32 %v6325_v40, %v3839_v57  ;;  %3779 = vst.msk [vmem:[#allocation3 + $0x1f0] sm:$0xff] %vm304_vm0, %v3715_v62 }
 0x1f2   : > { %v3982_v3 = vadd.f32 %v6336_v9, %v3911_v18 }
 0x1f3   : > { %v3981_v5 = vadd.f32 %v6336_v9, %v3910_v1  ;;  %v3842_v7 = vld [vmem:[#allocation3 + $0x1e8] sm:$0xff] }
 0x1f4   : > { %4046 = vst.msk [vmem:[%s6072_s24 + $0x1d8] sm:$0xff] %vm304_vm0, %v3982_v3  ;;  %v3913_v38 = vmul.f32 %v6325_v40, %v3842_v7  ;;  %v3841_v11 = vld [vmem:[#allocation3 + $0x1e0] sm:$0xff] }
 0x1f5   : > { %4045 = vst.msk [vmem:[%s6072_s24 + $0x1d0] sm:$0xff] %vm304_vm0, %v3981_v5  ;;  %v3912_v13 = vmul.f32 %v6325_v40, %v3841_v11 }
 0x1f6   : > { %v3984_v19 = vadd.f32 %v6336_v9, %v3913_v38 }
 0x1f7   : > { %v3983_v43 = vadd.f32 %v6336_v9, %v3912_v13  ;;  %v3844_v23 = vld [vmem:[#allocation3 + $0x1f8] sm:$0xff] }
 0x1f8   : > { %4048 = vst.msk [vmem:[%s6072_s24 + $0x1e8] sm:$0xff] %vm304_vm0, %v3984_v19  ;;  %v3915_v26 = vmul.f32 %v6325_v40, %v3844_v23  ;;  %v3843_v28 = vld [vmem:[#allocation3 + $0x1f0] sm:$0xff] }
 0x1f9   : > { %4047 = vst.msk [vmem:[%s6072_s24 + $0x1e0] sm:$0xff] %vm304_vm0, %v3983_v43  ;;  %v3914_v31 = vmul.f32 %v6325_v40, %v3843_v28 }
 0x1fa   : > { %v3986_v17 = vadd.f32 %v6336_v9, %v3915_v26 }
 0x1fb   : > { %v3985_v34 = vadd.f32 %v6336_v9, %v3914_v31 }
 0x1fc   : > { %4050 = vst.msk [vmem:[%s6072_s24 + $0x1f8] sm:$0xff] %vm304_vm0, %v3986_v17 }
 0x1fd   : > { %4049 = vst.msk [vmem:[%s6072_s24 + $0x1f0] sm:$0xff] %vm304_vm0, %v3985_v34 }
 0x1fe PF: > { %s16_s21 = sadd.s32 1, %s5067_s21  }
 0x1ff   : > { %p13_p4 = scmp.ge.s32.totalorder %s16_s21, 7  }
 0x201   :  { %15 = sbr.rel (!%p13_p4) target bundleno = 1 (0x1), region = 75 }

</bundles_post_ra>
